<compile_context>
chip_gen: v6e
topology: v6e:2x2x1
jax: 0.10.0
libtpu: 0.0.40
codegen_flags: <defaults>
</compile_context>

<pallas_src>
import jax
import jax.numpy as jnp
from jax.experimental import pallas as pl
from jax.experimental.pallas import tpu as pltpu

C_IN = 198
C_OUT = 198
KH = 30
W_SP = 10
K_CONV = C_IN * KH            # 5940  (conv-as-matmul contraction length)
FLAT = C_OUT * W_SP           # 1980
HID = 128
OUT_DIM = 300


# ---------------------------------------------------------------------------
# Fused kernel: conv (single full-K matmul) + 5-layer MLP
# ---------------------------------------------------------------------------
def _emg_kernel(x_ref, wc_ref, bc_ref, w1_ref, b1_ref, w2_ref, b2_ref,
                w3_ref, b3_ref, w4_ref, b4_ref, w5_ref, b5_ref,
                o_ref, conv_buf):
    nb = o_ref.shape[0]                          # batch size

    # Conv2d(kernel=(30,1)) collapses H, so it is one (W*B, K) @ (K, OC)
    # matmul over the full contraction, accumulated in f32 on the MXU.
    conv = jnp.dot(x_ref[...], wc_ref[...],
                   preferred_element_type=jnp.float32) + bc_ref[...]
    conv_buf[...] = conv.astype(jnp.bfloat16)    # rows ordered (w, b)

    # fc_in: contract over (oc, w) without materializing the (B, 1980)
    # PyTorch flatten.  Per-w row blocks come back from the VMEM scratch as
    # plain offset vector loads (no sublane shuffles on a live value);
    # w1_ref[w] holds the (OC, HID) block of fc_in matching conv position w.
    acc = jnp.broadcast_to(b1_ref[...], (nb, HID))
    for w in range(W_SP):                        # static, fully unrolled
        acc = acc + jnp.dot(conv_buf[pl.ds(w * nb, nb), :], w1_ref[w],
                            preferred_element_type=jnp.float32)
    a = jnp.maximum(acc, 0.0)

    a = jnp.maximum(
        jnp.dot(a.astype(jnp.bfloat16), w2_ref[...],
                preferred_element_type=jnp.float32) + b2_ref[...], 0.0)
    a = jnp.maximum(
        jnp.dot(a.astype(jnp.bfloat16), w3_ref[...],
                preferred_element_type=jnp.float32) + b3_ref[...], 0.0)
    a = jnp.maximum(
        jnp.dot(a.astype(jnp.bfloat16), w4_ref[...],
                preferred_element_type=jnp.float32) + b4_ref[...], 0.0)
    o_ref[...] = (
        jnp.dot(a.astype(jnp.bfloat16), w5_ref[...],
                preferred_element_type=jnp.float32) + b5_ref[...])


# ---------------------------------------------------------------------------
# One-time parameter preparation (hoisted out of the forward path)
# ---------------------------------------------------------------------------
def prepare_params(params):
    """PyTorch-layout params -> kernel layout (transposed/regrouped/bf16)."""
    (w_conv, b_conv, w1, b1, w2, b2, w3, b3, w4, b4, w5, b5) = params

    # conv weight (OC, IC, KH, 1) -> (K, OC), bf16.  No K padding needed.
    wc = jnp.transpose(w_conv[:, :, :, 0].reshape(C_OUT, K_CONV),
                       (1, 0)).astype(jnp.bfloat16)
    bc = b_conv.reshape(1, C_OUT).astype(jnp.float32)

    # fc_in consumes PyTorch flatten order oc*W + w; regroup into a per-w
    # stack of (OC, HID) blocks matching the kernel's (w, b) conv row order.
    w1r = jnp.transpose(w1.reshape(HID, C_OUT, W_SP), (2, 1, 0)).astype(jnp.bfloat16)

    def lin(w):   # (out, in) -> (in, out), bf16
        return jnp.transpose(w, (1, 0)).astype(jnp.bfloat16)

    def bias(b):
        return b.reshape(1, -1).astype(jnp.float32)

    return (wc, bc, w1r, bias(b1), lin(w2), bias(b2), lin(w3), bias(b3),
            lin(w4), bias(b4), lin(w5), bias(b5))


# ---------------------------------------------------------------------------
# Forward
# ---------------------------------------------------------------------------
def emg_estimator_forward(x, prepped):
    """x: (B, 198, 30, 10) NCHW float32 -> (B, 30, 10, 1)."""
    (wc, bc, w1r, b1, w2, b2, w3, b3, w4, b4, w5, b5) = prepped
    B = x.shape[0]
    M = W_SP * B

    # TODO(synk): this NCHW -> (w, b, ic*kh) reorder stays as one small XLA
    # transpose (~0.7 MB round trip); doing it in-kernel would be a costly
    # lane relayout because W=10 is the source minor dim.  The pad op from the
    # previous version is gone (full-K block, no padding).
    x_mat = jnp.transpose(x, (3, 0, 1, 2)).reshape(M, K_CONV).astype(jnp.bfloat16)

    def full(a):   # full-array block, VMEM-resident for the single grid step
        nd = a.ndim
        return pl.BlockSpec(a.shape, lambda i, _nd=nd: (0,) * _nd)

    operands = (x_mat, wc, bc, w1r, b1, w2, b2, w3, b3, w4, b4, w5, b5)

    y = pl.pallas_call(
        _emg_kernel,
        out_shape=jax.ShapeDtypeStruct((B, OUT_DIM), jnp.float32),
        grid=(1,),
        in_specs=[full(a) for a in operands],
        out_specs=pl.BlockSpec((B, OUT_DIM), lambda i: (0, 0)),
        scratch_shapes=[pltpu.VMEM((M, C_OUT), jnp.bfloat16)],
        compiler_params=pltpu.CompilerParams(
            dimension_semantics=("arbitrary",),
            vmem_limit_bytes=32 * 1024 * 1024),
    )(*operands)

    return y.reshape(B, 30, 10, 1)


# ---------------------------------------------------------------------------
# Pure-JAX reference (f32, highest precision) for sanity check
# ---------------------------------------------------------------------------
def reference_forward(x, params):
    (w_conv, b_conv, w1, b1, w2, b2, w3, b3, w4, b4, w5, b5) = params
    B = x.shape[0]
    conv = jnp.einsum('bchw,och->bow', x, w_conv[..., 0],
                      precision='highest') + b_conv[None, :, None]
    h = conv.reshape(B, FLAT)
    a = jax.nn.relu(jnp.dot(h, w1.T, precision='highest') + b1)
    a = jax.nn.relu(jnp.dot(a, w2.T, precision='highest') + b2)
    a = jax.nn.relu(jnp.dot(a, w3.T, precision='highest') + b3)
    a = jax.nn.relu(jnp.dot(a, w4.T, precision='highest') + b4)
    y = jnp.dot(a, w5.T, precision='highest') + b5
    return y.reshape(B, 30, 10, 1)


# ---------------------------------------------------------------------------
# Main
# ---------------------------------------------------------------------------
if __name__ == "__main__":
    key = jax.random.PRNGKey(0)
    keys = jax.random.split(key, 16)
    B = 2

    x = jax.random.normal(keys[0], (B, C_IN, KH, W_SP), dtype=jnp.float32)

    def init(k, shape, fan_in):
        bound = 1.0 / (fan_in ** 0.5)
        return jax.random.uniform(k, shape, jnp.float32, -bound, bound)

    # PyTorch-layout parameters (conv: (OC, IC, KH, KW); linear: (out, in))
    w_conv   = init(keys[1],  (C_OUT, C_IN, KH, 1), C_IN * KH)
    b_conv   = init(keys[2],  (C_OUT,),             C_IN * KH)
    w_fc_in  = init(keys[3],  (HID, FLAT), FLAT)
    b_fc_in  = init(keys[4],  (HID,),      FLAT)
    w_fc_2   = init(keys[5],  (HID, HID),  HID)
    b_fc_2   = init(keys[6],  (HID,),      HID)
    w_fc_3   = init(keys[7],  (HID, HID),  HID)
    b_fc_3   = init(keys[8],  (HID,),      HID)
    w_fc_4   = init(keys[9],  (HID, HID),  HID)
    b_fc_4   = init(keys[10], (HID,),      HID)
    w_fc_out = init(keys[11], (OUT_DIM, HID), HID)
    b_fc_out = init(keys[12], (OUT_DIM,),     HID)

    params = (w_conv, b_conv, w_fc_in, b_fc_in, w_fc_2, b_fc_2,
              w_fc_3, b_fc_3, w_fc_4, b_fc_4, w_fc_out, b_fc_out)

    # One-time, offline parameter preparation (not part of the forward path).
    prepped = jax.block_until_ready(prepare_params(params))

    fwd = jax.jit(emg_estimator_forward)
    out = jax.block_until_ready(fwd(x, prepped))
    assert out.shape == (B, 30, 10, 1), out.shape

    ref = jax.block_until_ready(reference_forward(x, params))
    assert jnp.allclose(out, ref, rtol=1e-2, atol=1e-2), float(
        jnp.max(jnp.abs(out - ref)))

    print("KERNEL_OK")
</pallas_src>

<mosaic_0001>
module attributes {stable_mosaic.version = 11 : i64} {
  func.func @_emg_kernel(%arg0: i32, %arg1: memref<20x5940xbf16, #tpu.memory_space<vmem>>, %arg2: memref<5940x198xbf16, #tpu.memory_space<vmem>>, %arg3: memref<1x198xf32, #tpu.memory_space<vmem>>, %arg4: memref<10x198x128xbf16, #tpu.memory_space<vmem>>, %arg5: memref<1x128xf32, #tpu.memory_space<vmem>>, %arg6: memref<128x128xbf16, #tpu.memory_space<vmem>>, %arg7: memref<1x128xf32, #tpu.memory_space<vmem>>, %arg8: memref<128x128xbf16, #tpu.memory_space<vmem>>, %arg9: memref<1x128xf32, #tpu.memory_space<vmem>>, %arg10: memref<128x128xbf16, #tpu.memory_space<vmem>>, %arg11: memref<1x128xf32, #tpu.memory_space<vmem>>, %arg12: memref<128x300xbf16, #tpu.memory_space<vmem>>, %arg13: memref<1x300xf32, #tpu.memory_space<vmem>>, %arg14: memref<2x300xf32, #tpu.memory_space<vmem>>, %arg15: memref<20x198xbf16, #tpu.memory_space<vmem>>) attributes {dimension_semantics = [#tpu.dimension_semantics<arbitrary>], iteration_bounds = array<i64: 1>, scalar_prefetch = 0 : i64, scratch_operands = 1 : i64, tpu.core_type = #tpu.core_type<tc>, window_params = [{pipeline_mode = #tpu.pipeline_mode<synchronous>, transform_indices = @transform_0, window_bounds = array<i64: 20, 5940>}, {pipeline_mode = #tpu.pipeline_mode<synchronous>, transform_indices = @transform_1, window_bounds = array<i64: 5940, 198>}, {pipeline_mode = #tpu.pipeline_mode<synchronous>, transform_indices = @transform_2, window_bounds = array<i64: 1, 198>}, {pipeline_mode = #tpu.pipeline_mode<synchronous>, transform_indices = @transform_3, window_bounds = array<i64: 10, 198, 128>}, {pipeline_mode = #tpu.pipeline_mode<synchronous>, transform_indices = @transform_4, window_bounds = array<i64: 1, 128>}, {pipeline_mode = #tpu.pipeline_mode<synchronous>, transform_indices = @transform_5, window_bounds = array<i64: 128, 128>}, {pipeline_mode = #tpu.pipeline_mode<synchronous>, transform_indices = @transform_6, window_bounds = array<i64: 1, 128>}, {pipeline_mode = #tpu.pipeline_mode<synchronous>, transform_indices = @transform_7, window_bounds = array<i64: 128, 128>}, {pipeline_mode = #tpu.pipeline_mode<synchronous>, transform_indices = @transform_8, window_bounds = array<i64: 1, 128>}, {pipeline_mode = #tpu.pipeline_mode<synchronous>, transform_indices = @transform_9, window_bounds = array<i64: 128, 128>}, {pipeline_mode = #tpu.pipeline_mode<synchronous>, transform_indices = @transform_10, window_bounds = array<i64: 1, 128>}, {pipeline_mode = #tpu.pipeline_mode<synchronous>, transform_indices = @transform_11, window_bounds = array<i64: 128, 300>}, {pipeline_mode = #tpu.pipeline_mode<synchronous>, transform_indices = @transform_12, window_bounds = array<i64: 1, 300>}, {pipeline_mode = #tpu.pipeline_mode<synchronous>, transform_indices = @transform_13, window_bounds = array<i64: 2, 300>}]} {
    %c0 = arith.constant 0 : index
    %c0_0 = arith.constant 0 : index
    %0 = vector.load %arg1[%c0, %c0_0] : memref<20x5940xbf16, #tpu.memory_space<vmem>>, vector<20x5940xbf16>
    %c0_1 = arith.constant 0 : index
    %c0_2 = arith.constant 0 : index
    %1 = vector.load %arg2[%c0_1, %c0_2] : memref<5940x198xbf16, #tpu.memory_space<vmem>>, vector<5940x198xbf16>
    %cst = arith.constant dense<0.000000e+00> : vector<20x198xf32>
    %2 = tpu.matmul %0, %1, %cst {dimension_numbers = #tpu.dot_dimension_numbers<[1], [0], [0], [1], [0, 0, 1, 1], [], []>} : vector<20x5940xbf16>, vector<5940x198xbf16>, vector<20x198xf32> -> vector<20x198xf32>
    %c0_3 = arith.constant 0 : index
    %c0_4 = arith.constant 0 : index
    %3 = vector.load %arg3[%c0_3, %c0_4] : memref<1x198xf32, #tpu.memory_space<vmem>>, vector<1x198xf32>
    %4 = vector.broadcast %3 : vector<1x198xf32> to vector<20x198xf32>
    %5 = arith.addf %2, %4 : vector<20x198xf32>
    %6 = arith.truncf %5 : vector<20x198xf32> to vector<20x198xbf16>
    %c0_5 = arith.constant 0 : index
    %c0_6 = arith.constant 0 : index
    %7 = vector.load %arg15[%c0_5, %c0_6] : memref<20x198xbf16, #tpu.memory_space<vmem>>, vector<20x198xbf16>
    tpu.vector_store %arg15[%c0_5, %c0_6], %6 {strides = array<i32>} : memref<20x198xbf16, #tpu.memory_space<vmem>>, vector<20x198xbf16>,
    %c0_7 = arith.constant 0 : index
    %c0_8 = arith.constant 0 : index
    %8 = vector.load %arg5[%c0_7, %c0_8] : memref<1x128xf32, #tpu.memory_space<vmem>>, vector<1x128xf32>
    %9 = vector.shape_cast %8 : vector<1x128xf32> to vector<1x128xf32>
    %10 = vector.broadcast %9 : vector<1x128xf32> to vector<2x128xf32>
    %c0_9 = arith.constant 0 : index
    %c0_10 = arith.constant 0 : index
    %11 = vector.load %arg15[%c0_9, %c0_10] : memref<20x198xbf16, #tpu.memory_space<vmem>>, vector<2x198xbf16>
    %c0_11 = arith.constant 0 : index
    %c0_12 = arith.constant 0 : index
    %c0_13 = arith.constant 0 : index
    %12 = vector.load %arg4[%c0_11, %c0_12, %c0_13] : memref<10x198x128xbf16, #tpu.memory_space<vmem>>, vector<1x198x128xbf16>
    %13 = vector.shape_cast %12 : vector<1x198x128xbf16> to vector<198x128xbf16>
    %cst_14 = arith.constant dense<0.000000e+00> : vector<2x128xf32>
    %14 = tpu.matmul %11, %13, %cst_14 {dimension_numbers = #tpu.dot_dimension_numbers<[1], [0], [0], [1], [0, 0, 1, 1], [], []>} : vector<2x198xbf16>, vector<198x128xbf16>, vector<2x128xf32> -> vector<2x128xf32>
    %15 = arith.addf %10, %14 : vector<2x128xf32>
    %c2 = arith.constant 2 : index
    %c0_15 = arith.constant 0 : index
    %16 = vector.load %arg15[%c2, %c0_15] : memref<20x198xbf16, #tpu.memory_space<vmem>>, vector<2x198xbf16>
    %c1 = arith.constant 1 : index
    %c0_16 = arith.constant 0 : index
    %c0_17 = arith.constant 0 : index
    %17 = vector.load %arg4[%c1, %c0_16, %c0_17] : memref<10x198x128xbf16, #tpu.memory_space<vmem>>, vector<1x198x128xbf16>
    %18 = vector.shape_cast %17 : vector<1x198x128xbf16> to vector<198x128xbf16>
    %cst_18 = arith.constant dense<0.000000e+00> : vector<2x128xf32>
    %19 = tpu.matmul %16, %18, %cst_18 {dimension_numbers = #tpu.dot_dimension_numbers<[1], [0], [0], [1], [0, 0, 1, 1], [], []>} : vector<2x198xbf16>, vector<198x128xbf16>, vector<2x128xf32> -> vector<2x128xf32>
    %20 = arith.addf %15, %19 : vector<2x128xf32>
    %c4 = arith.constant 4 : index
    %c0_19 = arith.constant 0 : index
    %21 = vector.load %arg15[%c4, %c0_19] : memref<20x198xbf16, #tpu.memory_space<vmem>>, vector<2x198xbf16>
    %c2_20 = arith.constant 2 : index
    %c0_21 = arith.constant 0 : index
    %c0_22 = arith.constant 0 : index
    %22 = vector.load %arg4[%c2_20, %c0_21, %c0_22] : memref<10x198x128xbf16, #tpu.memory_space<vmem>>, vector<1x198x128xbf16>
    %23 = vector.shape_cast %22 : vector<1x198x128xbf16> to vector<198x128xbf16>
    %cst_23 = arith.constant dense<0.000000e+00> : vector<2x128xf32>
    %24 = tpu.matmul %21, %23, %cst_23 {dimension_numbers = #tpu.dot_dimension_numbers<[1], [0], [0], [1], [0, 0, 1, 1], [], []>} : vector<2x198xbf16>, vector<198x128xbf16>, vector<2x128xf32> -> vector<2x128xf32>
    %25 = arith.addf %20, %24 : vector<2x128xf32>
    %c6 = arith.constant 6 : index
    %c0_24 = arith.constant 0 : index
    %26 = vector.load %arg15[%c6, %c0_24] : memref<20x198xbf16, #tpu.memory_space<vmem>>, vector<2x198xbf16>
    %c3 = arith.constant 3 : index
    %c0_25 = arith.constant 0 : index
    %c0_26 = arith.constant 0 : index
    %27 = vector.load %arg4[%c3, %c0_25, %c0_26] : memref<10x198x128xbf16, #tpu.memory_space<vmem>>, vector<1x198x128xbf16>
    %28 = vector.shape_cast %27 : vector<1x198x128xbf16> to vector<198x128xbf16>
    %cst_27 = arith.constant dense<0.000000e+00> : vector<2x128xf32>
    %29 = tpu.matmul %26, %28, %cst_27 {dimension_numbers = #tpu.dot_dimension_numbers<[1], [0], [0], [1], [0, 0, 1, 1], [], []>} : vector<2x198xbf16>, vector<198x128xbf16>, vector<2x128xf32> -> vector<2x128xf32>
    %30 = arith.addf %25, %29 : vector<2x128xf32>
    %c8 = arith.constant 8 : index
    %c0_28 = arith.constant 0 : index
    %31 = vector.load %arg15[%c8, %c0_28] : memref<20x198xbf16, #tpu.memory_space<vmem>>, vector<2x198xbf16>
    %c4_29 = arith.constant 4 : index
    %c0_30 = arith.constant 0 : index
    %c0_31 = arith.constant 0 : index
    %32 = vector.load %arg4[%c4_29, %c0_30, %c0_31] : memref<10x198x128xbf16, #tpu.memory_space<vmem>>, vector<1x198x128xbf16>
    %33 = vector.shape_cast %32 : vector<1x198x128xbf16> to vector<198x128xbf16>
    %cst_32 = arith.constant dense<0.000000e+00> : vector<2x128xf32>
    %34 = tpu.matmul %31, %33, %cst_32 {dimension_numbers = #tpu.dot_dimension_numbers<[1], [0], [0], [1], [0, 0, 1, 1], [], []>} : vector<2x198xbf16>, vector<198x128xbf16>, vector<2x128xf32> -> vector<2x128xf32>
    %35 = arith.addf %30, %34 : vector<2x128xf32>
    %c10 = arith.constant 10 : index
    %c0_33 = arith.constant 0 : index
    %36 = vector.load %arg15[%c10, %c0_33] : memref<20x198xbf16, #tpu.memory_space<vmem>>, vector<2x198xbf16>
    %c5 = arith.constant 5 : index
    %c0_34 = arith.constant 0 : index
    %c0_35 = arith.constant 0 : index
    %37 = vector.load %arg4[%c5, %c0_34, %c0_35] : memref<10x198x128xbf16, #tpu.memory_space<vmem>>, vector<1x198x128xbf16>
    %38 = vector.shape_cast %37 : vector<1x198x128xbf16> to vector<198x128xbf16>
    %cst_36 = arith.constant dense<0.000000e+00> : vector<2x128xf32>
    %39 = tpu.matmul %36, %38, %cst_36 {dimension_numbers = #tpu.dot_dimension_numbers<[1], [0], [0], [1], [0, 0, 1, 1], [], []>} : vector<2x198xbf16>, vector<198x128xbf16>, vector<2x128xf32> -> vector<2x128xf32>
    %40 = arith.addf %35, %39 : vector<2x128xf32>
    %c12 = arith.constant 12 : index
    %c0_37 = arith.constant 0 : index
    %41 = vector.load %arg15[%c12, %c0_37] : memref<20x198xbf16, #tpu.memory_space<vmem>>, vector<2x198xbf16>
    %c6_38 = arith.constant 6 : index
    %c0_39 = arith.constant 0 : index
    %c0_40 = arith.constant 0 : index
    %42 = vector.load %arg4[%c6_38, %c0_39, %c0_40] : memref<10x198x128xbf16, #tpu.memory_space<vmem>>, vector<1x198x128xbf16>
    %43 = vector.shape_cast %42 : vector<1x198x128xbf16> to vector<198x128xbf16>
    %cst_41 = arith.constant dense<0.000000e+00> : vector<2x128xf32>
    %44 = tpu.matmul %41, %43, %cst_41 {dimension_numbers = #tpu.dot_dimension_numbers<[1], [0], [0], [1], [0, 0, 1, 1], [], []>} : vector<2x198xbf16>, vector<198x128xbf16>, vector<2x128xf32> -> vector<2x128xf32>
    %45 = arith.addf %40, %44 : vector<2x128xf32>
    %c14 = arith.constant 14 : index
    %c0_42 = arith.constant 0 : index
    %46 = vector.load %arg15[%c14, %c0_42] : memref<20x198xbf16, #tpu.memory_space<vmem>>, vector<2x198xbf16>
    %c7 = arith.constant 7 : index
    %c0_43 = arith.constant 0 : index
    %c0_44 = arith.constant 0 : index
    %47 = vector.load %arg4[%c7, %c0_43, %c0_44] : memref<10x198x128xbf16, #tpu.memory_space<vmem>>, vector<1x198x128xbf16>
    %48 = vector.shape_cast %47 : vector<1x198x128xbf16> to vector<198x128xbf16>
    %cst_45 = arith.constant dense<0.000000e+00> : vector<2x128xf32>
    %49 = tpu.matmul %46, %48, %cst_45 {dimension_numbers = #tpu.dot_dimension_numbers<[1], [0], [0], [1], [0, 0, 1, 1], [], []>} : vector<2x198xbf16>, vector<198x128xbf16>, vector<2x128xf32> -> vector<2x128xf32>
    %50 = arith.addf %45, %49 : vector<2x128xf32>
    %c16 = arith.constant 16 : index
    %c0_46 = arith.constant 0 : index
    %51 = vector.load %arg15[%c16, %c0_46] : memref<20x198xbf16, #tpu.memory_space<vmem>>, vector<2x198xbf16>
    %c8_47 = arith.constant 8 : index
    %c0_48 = arith.constant 0 : index
    %c0_49 = arith.constant 0 : index
    %52 = vector.load %arg4[%c8_47, %c0_48, %c0_49] : memref<10x198x128xbf16, #tpu.memory_space<vmem>>, vector<1x198x128xbf16>
    %53 = vector.shape_cast %52 : vector<1x198x128xbf16> to vector<198x128xbf16>
    %cst_50 = arith.constant dense<0.000000e+00> : vector<2x128xf32>
    %54 = tpu.matmul %51, %53, %cst_50 {dimension_numbers = #tpu.dot_dimension_numbers<[1], [0], [0], [1], [0, 0, 1, 1], [], []>} : vector<2x198xbf16>, vector<198x128xbf16>, vector<2x128xf32> -> vector<2x128xf32>
    %55 = arith.addf %50, %54 : vector<2x128xf32>
    %c18 = arith.constant 18 : index
    %c0_51 = arith.constant 0 : index
    %56 = vector.load %arg15[%c18, %c0_51] : memref<20x198xbf16, #tpu.memory_space<vmem>>, vector<2x198xbf16>
    %c9 = arith.constant 9 : index
    %c0_52 = arith.constant 0 : index
    %c0_53 = arith.constant 0 : index
    %57 = vector.load %arg4[%c9, %c0_52, %c0_53] : memref<10x198x128xbf16, #tpu.memory_space<vmem>>, vector<1x198x128xbf16>
    %58 = vector.shape_cast %57 : vector<1x198x128xbf16> to vector<198x128xbf16>
    %cst_54 = arith.constant dense<0.000000e+00> : vector<2x128xf32>
    %59 = tpu.matmul %56, %58, %cst_54 {dimension_numbers = #tpu.dot_dimension_numbers<[1], [0], [0], [1], [0, 0, 1, 1], [], []>} : vector<2x198xbf16>, vector<198x128xbf16>, vector<2x128xf32> -> vector<2x128xf32>
    %60 = arith.addf %55, %59 : vector<2x128xf32>
    %cst_55 = arith.constant 0.000000e+00 : f32
    %61 = vector.broadcast %cst_55 : f32 to vector<2x128xf32>
    %62 = arith.maximumf %60, %61 : vector<2x128xf32>
    %63 = arith.truncf %62 : vector<2x128xf32> to vector<2x128xbf16>
    %c0_56 = arith.constant 0 : index
    %c0_57 = arith.constant 0 : index
    %64 = vector.load %arg6[%c0_56, %c0_57] : memref<128x128xbf16, #tpu.memory_space<vmem>>, vector<128x128xbf16>
    %cst_58 = arith.constant dense<0.000000e+00> : vector<2x128xf32>
    %65 = tpu.matmul %63, %64, %cst_58 {dimension_numbers = #tpu.dot_dimension_numbers<[1], [0], [0], [1], [0, 0, 1, 1], [], []>} : vector<2x128xbf16>, vector<128x128xbf16>, vector<2x128xf32> -> vector<2x128xf32>
    %c0_59 = arith.constant 0 : index
    %c0_60 = arith.constant 0 : index
    %66 = vector.load %arg7[%c0_59, %c0_60] : memref<1x128xf32, #tpu.memory_space<vmem>>, vector<1x128xf32>
    %67 = vector.broadcast %66 : vector<1x128xf32> to vector<2x128xf32>
    %68 = arith.addf %65, %67 : vector<2x128xf32>
    %cst_61 = arith.constant 0.000000e+00 : f32
    %69 = vector.broadcast %cst_61 : f32 to vector<2x128xf32>
    %70 = arith.maximumf %68, %69 : vector<2x128xf32>
    %71 = arith.truncf %70 : vector<2x128xf32> to vector<2x128xbf16>
    %c0_62 = arith.constant 0 : index
    %c0_63 = arith.constant 0 : index
    %72 = vector.load %arg8[%c0_62, %c0_63] : memref<128x128xbf16, #tpu.memory_space<vmem>>, vector<128x128xbf16>
    %cst_64 = arith.constant dense<0.000000e+00> : vector<2x128xf32>
    %73 = tpu.matmul %71, %72, %cst_64 {dimension_numbers = #tpu.dot_dimension_numbers<[1], [0], [0], [1], [0, 0, 1, 1], [], []>} : vector<2x128xbf16>, vector<128x128xbf16>, vector<2x128xf32> -> vector<2x128xf32>
    %c0_65 = arith.constant 0 : index
    %c0_66 = arith.constant 0 : index
    %74 = vector.load %arg9[%c0_65, %c0_66] : memref<1x128xf32, #tpu.memory_space<vmem>>, vector<1x128xf32>
    %75 = vector.broadcast %74 : vector<1x128xf32> to vector<2x128xf32>
    %76 = arith.addf %73, %75 : vector<2x128xf32>
    %cst_67 = arith.constant 0.000000e+00 : f32
    %77 = vector.broadcast %cst_67 : f32 to vector<2x128xf32>
    %78 = arith.maximumf %76, %77 : vector<2x128xf32>
    %79 = arith.truncf %78 : vector<2x128xf32> to vector<2x128xbf16>
    %c0_68 = arith.constant 0 : index
    %c0_69 = arith.constant 0 : index
    %80 = vector.load %arg10[%c0_68, %c0_69] : memref<128x128xbf16, #tpu.memory_space<vmem>>, vector<128x128xbf16>
    %cst_70 = arith.constant dense<0.000000e+00> : vector<2x128xf32>
    %81 = tpu.matmul %79, %80, %cst_70 {dimension_numbers = #tpu.dot_dimension_numbers<[1], [0], [0], [1], [0, 0, 1, 1], [], []>} : vector<2x128xbf16>, vector<128x128xbf16>, vector<2x128xf32> -> vector<2x128xf32>
    %c0_71 = arith.constant 0 : index
    %c0_72 = arith.constant 0 : index
    %82 = vector.load %arg11[%c0_71, %c0_72] : memref<1x128xf32, #tpu.memory_space<vmem>>, vector<1x128xf32>
    %83 = vector.broadcast %82 : vector<1x128xf32> to vector<2x128xf32>
    %84 = arith.addf %81, %83 : vector<2x128xf32>
    %cst_73 = arith.constant 0.000000e+00 : f32
    %85 = vector.broadcast %cst_73 : f32 to vector<2x128xf32>
    %86 = arith.maximumf %84, %85 : vector<2x128xf32>
    %87 = arith.truncf %86 : vector<2x128xf32> to vector<2x128xbf16>
    %c0_74 = arith.constant 0 : index
    %c0_75 = arith.constant 0 : index
    %88 = vector.load %arg12[%c0_74, %c0_75] : memref<128x300xbf16, #tpu.memory_space<vmem>>, vector<128x300xbf16>
    %cst_76 = arith.constant dense<0.000000e+00> : vector<2x300xf32>
    %89 = tpu.matmul %87, %88, %cst_76 {dimension_numbers = #tpu.dot_dimension_numbers<[1], [0], [0], [1], [0, 0, 1, 1], [], []>} : vector<2x128xbf16>, vector<128x300xbf16>, vector<2x300xf32> -> vector<2x300xf32>
    %c0_77 = arith.constant 0 : index
    %c0_78 = arith.constant 0 : index
    %90 = vector.load %arg13[%c0_77, %c0_78] : memref<1x300xf32, #tpu.memory_space<vmem>>, vector<1x300xf32>
    %91 = vector.broadcast %90 : vector<1x300xf32> to vector<2x300xf32>
    %92 = arith.addf %89, %91 : vector<2x300xf32>
    %c0_79 = arith.constant 0 : index
    %c0_80 = arith.constant 0 : index
    %93 = vector.load %arg14[%c0_79, %c0_80] : memref<2x300xf32, #tpu.memory_space<vmem>>, vector<2x300xf32>
    tpu.vector_store %arg14[%c0_79, %c0_80], %92 {strides = array<i32>} : memref<2x300xf32, #tpu.memory_space<vmem>>, vector<2x300xf32>,
    return
  }
  func.func @transform_0(%arg0: i32) -> (i32, i32) {
    %c0_i32 = arith.constant 0 : i32
    %c0_i32_0 = arith.constant 0 : i32
    %c0_i32_1 = arith.constant 0 : i32
    return %c0_i32, %c0_i32_0 : i32, i32
  }
  func.func @transform_1(%arg0: i32) -> (i32, i32) {
    %c0_i32 = arith.constant 0 : i32
    %c0_i32_0 = arith.constant 0 : i32
    %c0_i32_1 = arith.constant 0 : i32
    return %c0_i32, %c0_i32_0 : i32, i32
  }
  func.func @transform_2(%arg0: i32) -> (i32, i32) {
    %c0_i32 = arith.constant 0 : i32
    %c0_i32_0 = arith.constant 0 : i32
    %c0_i32_1 = arith.constant 0 : i32
    return %c0_i32, %c0_i32_0 : i32, i32
  }
  func.func @transform_3(%arg0: i32) -> (i32, i32, i32) {
    %c0_i32 = arith.constant 0 : i32
    %c0_i32_0 = arith.constant 0 : i32
    %c0_i32_1 = arith.constant 0 : i32
    %c0_i32_2 = arith.constant 0 : i32
    return %c0_i32, %c0_i32_0, %c0_i32_1 : i32, i32, i32
  }
  func.func @transform_4(%arg0: i32) -> (i32, i32) {
    %c0_i32 = arith.constant 0 : i32
    %c0_i32_0 = arith.constant 0 : i32
    %c0_i32_1 = arith.constant 0 : i32
    return %c0_i32, %c0_i32_0 : i32, i32
  }
  func.func @transform_5(%arg0: i32) -> (i32, i32) {
    %c0_i32 = arith.constant 0 : i32
    %c0_i32_0 = arith.constant 0 : i32
    %c0_i32_1 = arith.constant 0 : i32
    return %c0_i32, %c0_i32_0 : i32, i32
  }
  func.func @transform_6(%arg0: i32) -> (i32, i32) {
    %c0_i32 = arith.constant 0 : i32
    %c0_i32_0 = arith.constant 0 : i32
    %c0_i32_1 = arith.constant 0 : i32
    return %c0_i32, %c0_i32_0 : i32, i32
  }
  func.func @transform_7(%arg0: i32) -> (i32, i32) {
    %c0_i32 = arith.constant 0 : i32
    %c0_i32_0 = arith.constant 0 : i32
    %c0_i32_1 = arith.constant 0 : i32
    return %c0_i32, %c0_i32_0 : i32, i32
  }
  func.func @transform_8(%arg0: i32) -> (i32, i32) {
    %c0_i32 = arith.constant 0 : i32
    %c0_i32_0 = arith.constant 0 : i32
    %c0_i32_1 = arith.constant 0 : i32
    return %c0_i32, %c0_i32_0 : i32, i32
  }
  func.func @transform_9(%arg0: i32) -> (i32, i32) {
    %c0_i32 = arith.constant 0 : i32
    %c0_i32_0 = arith.constant 0 : i32
    %c0_i32_1 = arith.constant 0 : i32
    return %c0_i32, %c0_i32_0 : i32, i32
  }
  func.func @transform_10(%arg0: i32) -> (i32, i32) {
    %c0_i32 = arith.constant 0 : i32
    %c0_i32_0 = arith.constant 0 : i32
    %c0_i32_1 = arith.constant 0 : i32
    return %c0_i32, %c0_i32_0 : i32, i32
  }
  func.func @transform_11(%arg0: i32) -> (i32, i32) {
    %c0_i32 = arith.constant 0 : i32
    %c0_i32_0 = arith.constant 0 : i32
    %c0_i32_1 = arith.constant 0 : i32
    return %c0_i32, %c0_i32_0 : i32, i32
  }
  func.func @transform_12(%arg0: i32) -> (i32, i32) {
    %c0_i32 = arith.constant 0 : i32
    %c0_i32_0 = arith.constant 0 : i32
    %c0_i32_1 = arith.constant 0 : i32
    return %c0_i32, %c0_i32_0 : i32, i32
  }
  func.func @transform_13(%arg0: i32) -> (i32, i32) {
    %c0_i32 = arith.constant 0 : i32
    %c0_i32_0 = arith.constant 0 : i32
    %c0_i32_1 = arith.constant 0 : i32
    return %c0_i32, %c0_i32_0 : i32, i32
  }
}

</mosaic_0001>

<bundles_post_ra>
// kernel: emg_estimator_forward.1
= control target key start
LH: loop header
LB: loop body
LE: loop exit
PB: predicated region body
PF: predicated region fallthrough
CT: control target
= control target key end

     0   :  { %vm4993_vm0 = vcmask 1041408   ;;  %vm4986_vm1 = vcmask 424960   ;;  %vm6370_vm2 = vcmask 1042432   ;;  %vm6244_vm3 = vcmask 1043456   ;;  %s14824_s1 = inlined_call_operand.vmem [shape: bf16[5940,198], index: 1, kind: input, shape index: {}]   ;;  %s14825_s0 = inlined_call_operand.vmem [shape: bf16[20,5940], index: 0, kind: input, shape index: {}]   ;;  %s14826_s2 = inlined_call_operand.vmem [shape: f32[1,198], index: 2, kind: input, shape index: {}]   ;;  %s14827_s3 = inlined_call_operand.vmem [shape: bf16[10,198,128], index: 3, kind: input, shape index: {}]   ;;  %s14828_s4 = inlined_call_operand.vmem [shape: f32[1,128], index: 4, kind: input, shape index: {}]   ;;  %s14829_s5 = inlined_call_operand.vmem [shape: bf16[128,128], index: 5, kind: input, shape index: {}]   ;;  %s14830_s7 = inlined_call_operand.vmem [shape: bf16[128,128], index: 7, kind: input, shape index: {}]   ;;  %s14831_s9 = inlined_call_operand.vmem [shape: bf16[128,128], index: 9, kind: input, shape index: {}]   ;;  %s14832_s6 = inlined_call_operand.vmem [shape: f32[1,128], index: 6, kind: input, shape index: {}]   ;;  %s14833_s11 = inlined_call_operand.vmem [shape: bf16[128,300], index: 11, kind: input, shape index: {}]   ;;  %s14834_s8 = inlined_call_operand.vmem [shape: f32[1,128], index: 8, kind: input, shape index: {}]   ;;  %s14835_s10 = inlined_call_operand.vmem [shape: f32[1,128], index: 10, kind: input, shape index: {}]   ;;  %s14836_s12 = inlined_call_operand.vmem [shape: f32[1,300], index: 12, kind: input, shape index: {}]   ;;  %s14837_s13 = inlined_call_operand.vmem [shape: f32[2,300], index: 13, kind: output, shape index: {}]  }
   0x1   :  { %v9856_v0 = vld [vmem:[%s14824_s1 + $0x74] ss:$8 sps:$4 sm:$0xff]   ;;  %v9858_v1 = vld [vmem:[%s14824_s1 + $0x70] ss:$8 sps:$4 sm:$0xff]   ;;  %v9862_v4 = vld [vmem:[%s14824_s1 + $0x64] ss:$8 sps:$4 sm:$0xff]  }
   0x2   :  { %5000 = vmatprep.subr.bf16.mxu0 %v9856_v0  ;;  %v9859_v2 = vld [vmem:[%s14824_s1 + $0x174] ss:$8 sps:$4 sm:$0xff]   ;;  %v9861_v3 = vld [vmem:[%s14824_s1 + $0x170] ss:$8 sps:$4 sm:$0xff]   ;;  %v9864_v5 = vld [vmem:[%s14824_s1 + $0x60] ss:$8 sps:$4 sm:$0xff]  }
   0x3   :  { %5001 = vmatpush1.bf16.msra.mxu0 %v9858_v1  ;;  %5051 = vmatprep.subr.bf16.mxu1 %v9859_v2  ;;  %v9865_v6 = vld [vmem:[%s14824_s1 + $0x164] ss:$8 sps:$4 sm:$0xff]   ;;  %v9867_v7 = vld [vmem:[%s14824_s1 + $0x160] ss:$8 sps:$4 sm:$0xff]   ;;  %v9868_v8 = vld [vmem:[%s14824_s1 + $0x54] ss:$8 sps:$4 sm:$0xff]  }
   0x4   :  { %5052 = vmatpush1.bf16.msra.mxu1 %v9861_v3  ;;  %5002 = vmatprep.subr.bf16.mxu0 %v9862_v4  ;;  %v9870_v9 = vld [vmem:[%s14824_s1 + $0x50] ss:$8 sps:$4 sm:$0xff]   ;;  %v9871_v10 = vld [vmem:[%s14824_s1 + $0x154] ss:$8 sps:$4 sm:$0xff]   ;;  %v9874_v11 = vld [vmem:[%s14824_s1 + $0x44] ss:$8 sps:$4 sm:$0xff]  }
   0x5   :  { %5053 = vmatprep.subr.bf16.mxu1 %v9865_v6  ;;  %v9873_v12 = vld [vmem:[%s14824_s1 + $0x150] ss:$8 sps:$4 sm:$0xff]   ;;  %v9877_v13 = vld [vmem:[%s14824_s1 + $0x144] ss:$8 sps:$4 sm:$0xff]   ;;  %v9876_v14 = vld [vmem:[%s14824_s1 + $0x40] ss:$8 sps:$4 sm:$0xff]  }
   0x6   :  { %v9880_v15 = vld [vmem:[%s14824_s1 + $0x34] ss:$8 sps:$4 sm:$0xff]   ;;  %v9879_v16 = vld [vmem:[%s14824_s1 + $0x140] ss:$8 sps:$4 sm:$0xff]   ;;  %v9882_v18 = vld [vmem:[%s14824_s1 + $0x30] ss:$8 sps:$4 sm:$0xff]  }
   0x7   :  { %5003 = vmatpush1.bf16.msra.mxu0 %v9864_v5  ;;  %v9883_v17 = vld [vmem:[%s14824_s1 + $0x134] ss:$8 sps:$4 sm:$0xff]   ;;  %v9886_v19 = vld [vmem:[%s14824_s1 + $0x24] ss:$8 sps:$4 sm:$0xff]   ;;  %v9885_v20 = vld [vmem:[%s14824_s1 + $0x130] ss:$8 sps:$4 sm:$0xff]  }
   0x8   :  { %5004 = vmatprep.subr.bf16.mxu0 %v9868_v8  ;;  %5054 = vmatpush1.bf16.msra.mxu1 %v9867_v7  ;;  %v9889_v21 = vld [vmem:[%s14824_s1 + $0x124] ss:$8 sps:$4 sm:$0xff]   ;;  %v9888_v22 = vld [vmem:[%s14824_s1 + $0x20] ss:$8 sps:$4 sm:$0xff]   ;;  %v9892_v23 = vld [vmem:[%s14824_s1 + $0x14] ss:$8 sps:$4 sm:$0xff]  }
   0x9   :  { %5055 = vmatprep.subr.bf16.mxu1 %v9871_v10  ;;  %v9891_v24 = vld [vmem:[%s14824_s1 + $0x120] ss:$8 sps:$4 sm:$0xff]   ;;  %v9895_v25 = vld [vmem:[%s14824_s1 + $0x114] ss:$8 sps:$4 sm:$0xff]   ;;  %v9894_v26 = vld [vmem:[%s14824_s1 + $0x10] ss:$8 sps:$4 sm:$0xff]  }
   0xa   :  { %v9898_v27 = vld [vmem:[%s14824_s1 + $0x4] ss:$8 sps:$4 sm:$0xff]   ;;  %v9897_v28 = vld [vmem:[%s14824_s1 + $0x110] ss:$8 sps:$4 sm:$0xff]   ;;  %v9900_v30 = vld [vmem:[%s14824_s1] ss:$8 sps:$4 sm:$0xff]  }
   0xb   :  { %5005 = vmatpush1.bf16.msra.mxu0 %v9870_v9  ;;  %v9901_v29 = vld [vmem:[%s14824_s1 + $0x104] ss:$8 sps:$4 sm:$0xff]   ;;  %v9904_v31 = vld [vmem:[%s14824_s1 + $0xf4] ss:$8 sps:$4 sm:$0xff]   ;;  %v9903_v32 = vld [vmem:[%s14824_s1 + $0x100] ss:$8 sps:$4 sm:$0xff]  }
   0xc   :  { %5006 = vmatprep.subr.bf16.mxu0 %v9874_v11  ;;  %5056 = vmatpush1.bf16.msra.mxu1 %v9873_v12  ;;  %v9907_v33 = vld [vmem:[%s14824_s1 + $0x1f4] ss:$8 sps:$4 sm:$0xff]   ;;  %v9906_v34 = vld [vmem:[%s14824_s1 + $0xf0] ss:$8 sps:$4 sm:$0xff]   ;;  %v9910_v35 = vld [vmem:[%s14824_s1 + $0xe4] ss:$8 sps:$4 sm:$0xff]  }
   0xd   :  { %5057 = vmatprep.subr.bf16.mxu1 %v9877_v13  ;;  %v9909_v36 = vld [vmem:[%s14824_s1 + $0x1f0] ss:$8 sps:$4 sm:$0xff]   ;;  %v9913_v37 = vld [vmem:[%s14824_s1 + $0x1e4] ss:$8 sps:$4 sm:$0xff]   ;;  %v9912_v38 = vld [vmem:[%s14824_s1 + $0xe0] ss:$8 sps:$4 sm:$0xff]  }
   0xe   :  { %v9916_v39 = vld [vmem:[%s14824_s1 + $0xd4] ss:$8 sps:$4 sm:$0xff]   ;;  %v9915_v40 = vld [vmem:[%s14824_s1 + $0x1e0] ss:$8 sps:$4 sm:$0xff]   ;;  %v9918_v42 = vld [vmem:[%s14824_s1 + $0xd0] ss:$8 sps:$4 sm:$0xff]  }
   0xf   :  { %5007 = vmatpush1.bf16.msra.mxu0 %v9876_v14  ;;  %v9919_v41 = vld [vmem:[%s14824_s1 + $0x1d4] ss:$8 sps:$4 sm:$0xff]   ;;  %v9922_v43 = vld [vmem:[%s14824_s1 + $0xc4] ss:$8 sps:$4 sm:$0xff]   ;;  %v9921_v44 = vld [vmem:[%s14824_s1 + $0x1d0] ss:$8 sps:$4 sm:$0xff]  }
  0x10   :  { %5008 = vmatprep.subr.bf16.mxu0 %v9880_v15  ;;  %5058 = vmatpush1.bf16.msra.mxu1 %v9879_v16  ;;  %v9925_v45 = vld [vmem:[%s14824_s1 + $0x1c4] ss:$8 sps:$4 sm:$0xff]   ;;  %v9924_v46 = vld [vmem:[%s14824_s1 + $0xc0] ss:$8 sps:$4 sm:$0xff]   ;;  %v9928_v48 = vld [vmem:[%s14824_s1 + $0xb4] ss:$8 sps:$4 sm:$0xff]  }
  0x11   :  { %5059 = vmatprep.subr.bf16.mxu1 %v9883_v17  ;;  %v9953_v47 = vld [vmem:[%s14825_s0 + $0x4] ss:$188 sps:$4 sm:$0xff]   ;;  %v9931_v50 = vld [vmem:[%s14824_s1 + $0x1b4] ss:$8 sps:$4 sm:$0xff]   ;;  %v9960_v51 = vld [vmem:[%s14825_s0 + $0xc] ss:$188 sps:$4 sm:$0xff]  }
  0x12   :  { %v9927_v49 = vld [vmem:[%s14824_s1 + $0x1c0] ss:$8 sps:$4 sm:$0xff]   ;;  %5032 = vmatprep.mubr.bf16.mxu0 %v9953_v47  ;;  %v9930_v52 = vld [vmem:[%s14824_s1 + $0xb0] ss:$8 sps:$4 sm:$0xff]   ;;  %v9934_v53 = vld [vmem:[%s14824_s1 + $0xa4] ss:$8 sps:$4 sm:$0xff]   ;;  %5083 = vmatprep.mubr.bf16.mxu1 %v9960_v51 }
  0x13   :  { %5009 = vmatpush1.bf16.msra.mxu0 %v9882_v18  ;;  %v9933_v54 = vld [vmem:[%s14824_s1 + $0x1b0] ss:$8 sps:$4 sm:$0xff]   ;;  %v9937_v55 = vld [vmem:[%s14824_s1 + $0x1a4] ss:$8 sps:$4 sm:$0xff]   ;;  %v9936_v56 = vld [vmem:[%s14824_s1 + $0xa0] ss:$8 sps:$4 sm:$0xff]  }
  0x14   :  { %5010 = vmatprep.subr.bf16.mxu0 %v9886_v19  ;;  %5060 = vmatpush1.bf16.msra.mxu1 %v9885_v20  ;;  %v9940_v57 = vld [vmem:[%s14824_s1 + $0x94] ss:$8 sps:$4 sm:$0xff]   ;;  %v9939_v58 = vld [vmem:[%s14824_s1 + $0x1a0] ss:$8 sps:$4 sm:$0xff]   ;;  %v9942_v60 = vld [vmem:[%s14824_s1 + $0x90] ss:$8 sps:$4 sm:$0xff]  }
  0x15   :  { %5061 = vmatprep.subr.bf16.mxu1 %v9889_v21  ;;  %v9943_v59 = vld [vmem:[%s14824_s1 + $0x194] ss:$8 sps:$4 sm:$0xff]   ;;  %v9946_v61 = vld [vmem:[%s14824_s1 + $0x84] ss:$8 sps:$4 sm:$0xff]   ;;  %v9945_v62 = vld [vmem:[%s14824_s1 + $0x190] ss:$8 sps:$4 sm:$0xff]  }
  0x16   :  { %v9949_v63 = vld [vmem:[%s14824_s1 + $0x184] ss:$8 sps:$4 sm:$0xff]   ;;  %v9948_v0 = vld [vmem:[%s14824_s1 + $0x80] ss:$8 sps:$4 sm:$0xff]   ;;  %v9957_v1 = vld [vmem:[%s14824_s1 + $0x274] ss:$8 sps:$4 sm:$0xff]  }
  0x17   :  { %5011 = vmatpush1.bf16.msra.mxu0 %v9888_v22  ;;  %v9954_v2 = vld [vmem:[%s14824_s1 + $0x180] ss:$8 sps:$4 sm:$0xff]   ;;  %v9963_v4 = vld [vmem:[%s14824_s1 + $0x374] ss:$8 sps:$4 sm:$0xff]   ;;  %v9955_v5 = vld [vmem:[%s14824_s1 + $0x270] ss:$8 sps:$4 sm:$0xff]  }
  0x18   :  { %5012 = vmatprep.subr.bf16.mxu0 %v9892_v23  ;;  %5062 = vmatpush1.bf16.msra.mxu1 %v9891_v24  ;;  %v9951_v3 = vld [vmem:[%s14825_s0] ss:$188 sps:$4 sm:$0xff]   ;;  %v9958_v6 = vld [vmem:[%s14825_s0 + $0x8] ss:$188 sps:$4 sm:$0xff]   ;;  %v9961_v8 = vld [vmem:[%s14824_s1 + $0x370] ss:$8 sps:$4 sm:$0xff]  }
  0x19   :  { %5063 = vmatprep.subr.bf16.mxu1 %v9895_v25  ;;  %v9966_v7 = vld [vmem:[%s14824_s1 + $0x264] ss:$8 sps:$4 sm:$0xff]   ;;  %v9964_v10 = vld [vmem:[%s14824_s1 + $0x260] ss:$8 sps:$4 sm:$0xff]   ;;  %v9972_v11 = vld [vmem:[%s14824_s1 + $0x254] ss:$8 sps:$4 sm:$0xff]  }
  0x1a   :  { %v9969_v9 = vld [vmem:[%s14824_s1 + $0x364] ss:$8 sps:$4 sm:$0xff]   ;;  %v9967_v12 = vld [vmem:[%s14824_s1 + $0x360] ss:$8 sps:$4 sm:$0xff]   ;;  %v9975_v13 = vld [vmem:[%s14824_s1 + $0x354] ss:$8 sps:$4 sm:$0xff]  }
  0x1b   :  { %5013 = vmatpush1.bf16.msra.mxu0 %v9894_v26  ;;  %v9970_v14 = vld [vmem:[%s14824_s1 + $0x250] ss:$8 sps:$4 sm:$0xff]   ;;  %v9978_v15 = vld [vmem:[%s14824_s1 + $0x244] ss:$8 sps:$4 sm:$0xff]   ;;  %v9976_v18 = vld [vmem:[%s14824_s1 + $0x240] ss:$8 sps:$4 sm:$0xff]  }
  0x1c   :  { %5014 = vmatprep.subr.bf16.mxu0 %v9898_v27  ;;  %5064 = vmatpush1.bf16.msra.mxu1 %v9897_v28  ;;  %v9973_v16 = vld [vmem:[%s14824_s1 + $0x350] ss:$8 sps:$4 sm:$0xff]   ;;  %v9981_v17 = vld [vmem:[%s14824_s1 + $0x344] ss:$8 sps:$4 sm:$0xff]   ;;  %v9984_v19 = vld [vmem:[%s14824_s1 + $0x234] ss:$8 sps:$4 sm:$0xff]  }
  0x1d   :  { %5065 = vmatprep.subr.bf16.mxu1 %v9901_v29  ;;  %v9979_v20 = vld [vmem:[%s14824_s1 + $0x340] ss:$8 sps:$4 sm:$0xff]   ;;  %v9987_v21 = vld [vmem:[%s14824_s1 + $0x334] ss:$8 sps:$4 sm:$0xff]   ;;  %v9982_v23 = vld [vmem:[%s14824_s1 + $0x230] ss:$8 sps:$4 sm:$0xff]  }
  0x1e   :  { %v93_v22 = vld [vmem:[%s14825_s0 + $0x178] sm:$0x33]  ;;  %v9990_v26 = vld [vmem:[%s14824_s1 + $0x224] ss:$8 sps:$4 sm:$0xff]   ;;  %v9988_v28 = vld [vmem:[%s14824_s1 + $0x220] ss:$8 sps:$4 sm:$0xff]  }
  0x1f   :  { %5015 = vmatpush1.bf16.msra.mxu0 %v9900_v30  ;;  %v8500_v24 = vcombine.high %v93_v22, %v93_v22  ;;  %v8499_v25 = vcombine.low %v93_v22, %v93_v22  ;;  %v9985_v27 = vld [vmem:[%s14824_s1 + $0x330] ss:$8 sps:$4 sm:$0xff]   ;;  %v9993_v29 = vld [vmem:[%s14824_s1 + $0x324] ss:$8 sps:$4 sm:$0xff]   ;;  %v10020_v51 = vld [vmem:[%s14824_s1 + $0x2d4] ss:$8 sps:$4 sm:$0xff]  }
  0x20   :  { %5016 = vmatprep.subr.bf16.mxu0 %v9904_v31  ;;  %5066 = vmatpush1.bf16.msra.mxu1 %v9903_v32  ;;  %v94_v30 = vld [vmem:[%s14825_s0 + $0x180] sm:$0x33]  ;;  %v9996_v31 = vld [vmem:[%s14824_s1 + $0x214] ss:$8 sps:$4 sm:$0xff]   ;;  %vm6245_vm4 = vcmask 572420   ;;  %vm6249_vm6 = vcmask 570372  }
  0x21   :  { %5067 = vmatprep.subr.bf16.mxu1 %v9907_v33  ;;  %v8502_v32 = vcombine.high %v94_v30, %v94_v30  ;;  %v8501_v33 = vcombine.low %v94_v30, %v94_v30  ;;  %v10014_v47 = vld [vmem:[%s14824_s1 + $0x2e4] ss:$8 sps:$4 sm:$0xff]   ;;  %vm14125_vm5 = vmor %vm6245_vm4, %vm6244_vm3  ;;  %vm6366_vm8 = vcmask 572416   ;;  %vm11296_vm9 = vmmov 0  }
  0x22   :  { %v10166_v30 = vld [vmem:[%s14825_s0 + $0x24] ss:$188 sps:$4 sm:$0xff]   ;;  %vm6250_vm7 = vmor %vm6249_vm6, %vm4993_vm0  ;;  %vm8443_vm10 = vcmask 1043458   ;;  %vm8445_vm12 = vcmask 357380  }
  0x23   :  { %5017 = vmatpush2.bf16.msra.mxu0 %v9906_v34  ;;  %v9991_v34 = vld [vmem:[%s14824_s1 + $0x320] ss:$8 sps:$4 sm:$0xff]   ;;  %vm8444_vm11 = vmor %vm8443_vm10, %vm4993_vm0 }
  0x24   :  { %5018 = vmatprep.subr.bf16.mxu0 %v9910_v35  ;;  %5068 = vmatpush2.bf16.msra.mxu1 %v9909_v36  ;;  %v9999_v35 = vld [vmem:[%s14824_s1 + $0x314] ss:$8 sps:$4 sm:$0xff]   ;;  %v9994_v36 = vld [vmem:[%s14824_s1 + $0x210] ss:$8 sps:$4 sm:$0xff]   ;;  %vm8446_vm13 = vmor %vm8445_vm12, %vm8444_vm11 }
  0x25   :  { %5069 = vmatprep.subr.bf16.mxu1 %v9913_v37  ;;  %v10002_v37 = vld [vmem:[%s14824_s1 + $0x204] ss:$8 sps:$4 sm:$0xff]  }
  0x27   :  { %5019 = vmatpush2.bf16.msra.mxu0 %v9912_v38  ;;  %v9997_v38 = vld [vmem:[%s14824_s1 + $0x310] ss:$8 sps:$4 sm:$0xff]  }
  0x28   :  { %5020 = vmatprep.subr.bf16.mxu0 %v9916_v39  ;;  %5070 = vmatpush2.bf16.msra.mxu1 %v9915_v40  ;;  %v10060_v39 = vld [vmem:[%s14825_s0 + $0x14] ss:$188 sps:$4 sm:$0xff]   ;;  %v10005_v40 = vld [vmem:[%s14824_s1 + $0x304] ss:$8 sps:$4 sm:$0xff]  }
  0x29   :  { %5071 = vmatprep.subr.bf16.mxu1 %v9919_v41  ;;  %v10000_v41 = vld [vmem:[%s14824_s1 + $0x200] ss:$8 sps:$4 sm:$0xff]  }
  0x2b   :  { %5021 = vmatpush2.bf16.msra.mxu0 %v9918_v42  ;;  %v10008_v42 = vld [vmem:[%s14824_s1 + $0x2f4] ss:$8 sps:$4 sm:$0xff]  }
  0x2c   :  { %5022 = vmatprep.subr.bf16.mxu0 %v9922_v43  ;;  %5072 = vmatpush2.bf16.msra.mxu1 %v9921_v44  ;;  %v10066_v43 = vld [vmem:[%s14825_s0 + $0x1c] ss:$188 sps:$4 sm:$0xff]   ;;  %v10003_v44 = vld [vmem:[%s14824_s1 + $0x300] ss:$8 sps:$4 sm:$0xff]  }
  0x2d   :  { %5073 = vmatprep.subr.bf16.mxu1 %v9925_v45  ;;  %v10011_v45 = vld [vmem:[%s14824_s1 + $0x3f4] ss:$8 sps:$4 sm:$0xff]  }
  0x2f   :  { %5023 = vmatpush2.bf16.msra.mxu0 %v9924_v46  ;;  %v10006_v46 = vld [vmem:[%s14824_s1 + $0x2f0] ss:$8 sps:$4 sm:$0xff]  }
  0x30   :  { %5024 = vmatprep.subr.bf16.mxu0 %v9928_v48  ;;  %5074 = vmatpush2.bf16.msra.mxu1 %v9927_v49  ;;  %v10009_v48 = vld [vmem:[%s14824_s1 + $0x3f0] ss:$8 sps:$4 sm:$0xff]   ;;  %v10017_v49 = vld [vmem:[%s14824_s1 + $0x3e4] ss:$8 sps:$4 sm:$0xff]  }
  0x31   :  { %5075 = vmatprep.subr.bf16.mxu1 %v9931_v50  ;;  %v10012_v50 = vld [vmem:[%s14824_s1 + $0x2e0] ss:$8 sps:$4 sm:$0xff]  }
  0x33   :  { %5025 = vmatpush2.bf16.msra.mxu0 %v9930_v52  ;;  %v10015_v52 = vld [vmem:[%s14824_s1 + $0x3e0] ss:$8 sps:$4 sm:$0xff]  }
  0x34   :  { %5026 = vmatprep.subr.bf16.mxu0 %v9934_v53  ;;  %5076 = vmatpush2.bf16.msra.mxu1 %v9933_v54  ;;  %v10023_v53 = vld [vmem:[%s14824_s1 + $0x3d4] ss:$8 sps:$4 sm:$0xff]   ;;  %v10018_v54 = vld [vmem:[%s14824_s1 + $0x2d0] ss:$8 sps:$4 sm:$0xff]  }
  0x35   :  { %5077 = vmatprep.subr.bf16.mxu1 %v9937_v55  ;;  %v10026_v55 = vld [vmem:[%s14824_s1 + $0x2c4] ss:$8 sps:$4 sm:$0xff]  }
  0x37   :  { %5027 = vmatpush2.bf16.msra.mxu0 %v9936_v56  ;;  %v10021_v56 = vld [vmem:[%s14824_s1 + $0x3d0] ss:$8 sps:$4 sm:$0xff]  }
  0x38   :  { %5028 = vmatprep.subr.bf16.mxu0 %v9940_v57  ;;  %5078 = vmatpush2.bf16.msra.mxu1 %v9939_v58  ;;  %v10029_v57 = vld [vmem:[%s14824_s1 + $0x3c4] ss:$8 sps:$4 sm:$0xff]   ;;  %v10024_v58 = vld [vmem:[%s14824_s1 + $0x2c0] ss:$8 sps:$4 sm:$0xff]  }
  0x39   :  { %5079 = vmatprep.subr.bf16.mxu1 %v9943_v59  ;;  %v10032_v59 = vld [vmem:[%s14824_s1 + $0x2b4] ss:$8 sps:$4 sm:$0xff]  }
  0x3b   :  { %5029 = vmatpush2.bf16.msra.mxu0 %v9942_v60  ;;  %v10027_v60 = vld [vmem:[%s14824_s1 + $0x3c0] ss:$8 sps:$4 sm:$0xff]  }
  0x3c   :  { %5030 = vmatprep.subr.bf16.mxu0 %v9946_v61  ;;  %5080 = vmatpush2.bf16.msra.mxu1 %v9945_v62  ;;  %v10036_v61 = vld [vmem:[%s14824_s1 + $0x3b4] ss:$8 sps:$4 sm:$0xff]   ;;  %v10030_v62 = vld [vmem:[%s14824_s1 + $0x2b0] ss:$8 sps:$4 sm:$0xff]  }
  0x3d   :  { %5081 = vmatprep.subr.bf16.mxu1 %v9949_v63  ;;  %v10040_v63 = vld [vmem:[%s14824_s1 + $0x2a4] ss:$8 sps:$4 sm:$0xff]  }
  0x3f   :  { %5031 = vmatpush2.bf16.msra.mxu0 %v9948_v0  ;;  %v10034_v0 = vld [vmem:[%s14824_s1 + $0x3b0] ss:$8 sps:$4 sm:$0xff]  }
  0x40   :  { %5102 = vmatprep.subr.bf16.mxu0 %v9957_v1  ;;  %5082 = vmatpush2.bf16.msra.mxu1 %v9954_v2  ;;  %v10043_v1 = vld [vmem:[%s14824_s1 + $0x3a4] ss:$8 sps:$4 sm:$0xff]   ;;  %v10038_v2 = vld [vmem:[%s14824_s1 + $0x2a0] ss:$8 sps:$4 sm:$0xff]  }
  0x41   :  { %5153 = vmatprep.subr.bf16.mxu1 %v9963_v4  ;;  %v10041_v4 = vld [vmem:[%s14824_s1 + $0x3a0] ss:$8 sps:$4 sm:$0xff]  }
  0x42   :  { %5033 = vmatmul.mubr.bf16.vlgmr.msra.gmra.mxu0 %v9951_v3  ;;  %v10047_v3 = vld [vmem:[%s14824_s1 + $0x294] ss:$8 sps:$4 sm:$0xff]  }
  0x43   :  { %5103 = vmatpush1.bf16.msra.mxu0 %v9955_v5  ;;  %5084 = vmatmul.mubr.bf16.vlgmr.msra.gmra.mxu1 %v9958_v6  ;;  %v10051_v5 = vld [vmem:[%s14824_s1 + $0x394] ss:$8 sps:$4 sm:$0xff]   ;;  %v10045_v6 = vld [vmem:[%s14824_s1 + $0x290] ss:$8 sps:$4 sm:$0xff]  }
  0x44   :  { %5104 = vmatprep.subr.bf16.mxu0 %v9966_v7  ;;  %5154 = vmatpush1.bf16.msra.mxu1 %v9961_v8  ;;  %v10054_v7 = vld [vmem:[%s14824_s1 + $0x284] ss:$8 sps:$4 sm:$0xff]   ;;  %v10049_v8 = vld [vmem:[%s14824_s1 + $0x390] ss:$8 sps:$4 sm:$0xff]  }
  0x45   :  { %5155 = vmatprep.subr.bf16.mxu1 %v9969_v9  ;;  %5042 = vmatprep.mubr.bf16.mxu0 %v8500_v24  ;;  %v10052_v9 = vld [vmem:[%s14824_s1 + $0x280] ss:$8 sps:$4 sm:$0xff]  }
  0x46   :  { %5093 = vmatprep.mubr.bf16.mxu1 %v8502_v32  ;;  %v10070_v24 = vld [vmem:[%s14824_s1 + $0x460] ss:$8 sps:$4 sm:$0xff]   ;;  %v10088_v32 = vld [vmem:[%s14824_s1 + $0x444] ss:$8 sps:$4 sm:$0xff]  }
  0x47   :  { %5105 = vmatpush1.bf16.msra.mxu0 %v9964_v10  ;;  %v10057_v10 = vld [vmem:[%s14824_s1 + $0x384] ss:$8 sps:$4 sm:$0xff]  }
  0x48   :  { %5106 = vmatprep.subr.bf16.mxu0 %v9972_v11  ;;  %5156 = vmatpush1.bf16.msra.mxu1 %v9967_v12  ;;  %v10055_v11 = vld [vmem:[%s14824_s1 + $0x380] ss:$8 sps:$4 sm:$0xff]   ;;  %v10063_v12 = vld [vmem:[%s14824_s1 + $0x474] ss:$8 sps:$4 sm:$0xff]  }
  0x49   :  { %5157 = vmatprep.subr.bf16.mxu1 %v9975_v13  ;;  %v95_v13 = vld [vmem:[%s14825_s0 + $0x188] sm:$0x33] }
  0x4a   :  { %5043 = vmatmul.mubr.bf16.gmra.mxu0 %v8499_v25  ;;  %v10080_v25 = vld [vmem:[%s14824_s1 + $0x454] ss:$8 sps:$4 sm:$0xff]  }
  0x4b   :  { %5107 = vmatpush1.bf16.msra.mxu0 %v9970_v14  ;;  %5094 = vmatmul.mubr.bf16.gmra.mxu1 %v8501_v33  ;;  %v10058_v14 = vld [vmem:[%s14825_s0 + $0x10] ss:$188 sps:$4 sm:$0xff]  }
  0x4c   :  { %5108 = vmatprep.subr.bf16.mxu0 %v9978_v15  ;;  %5158 = vmatpush1.bf16.msra.mxu1 %v9973_v16  ;;  %v10069_v15 = vld [vmem:[%s14824_s1 + $0x574] ss:$8 sps:$4 sm:$0xff]   ;;  %v10083_v33 = vld [vmem:[%s14824_s1 + $0x550] ss:$8 sps:$4 sm:$0xff]  }
  0x4d   :  { %5159 = vmatprep.subr.bf16.mxu1 %v9981_v17  ;;  %5134 = vmatprep.mubr.bf16.mxu0 %v10060_v39  ;;  %v96_v16 = vld [vmem:[%s14825_s0 + $0x190] sm:$0x33] }
  0x4e   :  { %5185 = vmatprep.mubr.bf16.mxu1 %v10066_v43  ;;  %v10061_v17 = vld [vmem:[%s14824_s1 + $0x470] ss:$8 sps:$4 sm:$0xff]   ;;  %v8506_v22 = vcombine.high %v96_v16, %v96_v16  ;;  %v10097_v39 = vld [vmem:[%s14824_s1 + $0x534] ss:$8 sps:$4 sm:$0xff]   ;;  %v10103_v43 = vld [vmem:[%s14824_s1 + $0x524] ss:$8 sps:$4 sm:$0xff]  }
  0x4f   :  { %5109 = vmatpush1.bf16.msra.mxu0 %v9976_v18  ;;  %v10064_v18 = vld [vmem:[%s14825_s0 + $0x18] ss:$188 sps:$4 sm:$0xff]  }
  0x50   :  { %5110 = vmatprep.subr.bf16.mxu0 %v9984_v19  ;;  %5160 = vmatpush1.bf16.msra.mxu1 %v9979_v20  ;;  %v8504_v19 = vcombine.high %v95_v13, %v95_v13  ;;  %v10072_v20 = vld [vmem:[%s14824_s1 + $0x464] ss:$8 sps:$4 sm:$0xff]  }
  0x51   :  { %5161 = vmatprep.subr.bf16.mxu1 %v9987_v21  ;;  %v10067_v21 = vld [vmem:[%s14824_s1 + $0x570] ss:$8 sps:$4 sm:$0xff]  }
  0x53   :  { %5111 = vmatpush1.bf16.msra.mxu0 %v9982_v23  ;;  %v10075_v23 = vld [vmem:[%s14824_s1 + $0x564] ss:$8 sps:$4 sm:$0xff]  }
  0x54   :  { %5112 = vmatprep.subr.bf16.mxu0 %v9990_v26  ;;  %5162 = vmatpush1.bf16.msra.mxu1 %v9985_v27  ;;  %v10073_v26 = vld [vmem:[%s14824_s1 + $0x560] ss:$8 sps:$4 sm:$0xff]   ;;  %v8503_v27 = vcombine.low %v95_v13, %v95_v13  ;;  %v10154_v13 = vld [vmem:[%s14824_s1 + $0x494] ss:$8 sps:$4 sm:$0xff]  }
  0x55   :  { %5163 = vmatprep.subr.bf16.mxu1 %v9993_v29  ;;  %v10078_v29 = vld [vmem:[%s14824_s1 + $0x450] ss:$8 sps:$4 sm:$0xff]  }
  0x57   :  { %5113 = vmatpush1.bf16.msra.mxu0 %v9988_v28  ;;  %v10085_v28 = vld [vmem:[%s14824_s1 + $0x554] ss:$8 sps:$4 sm:$0xff]  }
  0x58   :  { %5114 = vmatprep.subr.bf16.mxu0 %v9996_v31  ;;  %5164 = vmatpush1.bf16.msra.mxu1 %v9991_v34  ;;  %v8505_v31 = vcombine.low %v96_v16, %v96_v16  ;;  %v10091_v34 = vld [vmem:[%s14824_s1 + $0x544] ss:$8 sps:$4 sm:$0xff]   ;;  %v10152_v16 = vld [vmem:[%s14824_s1 + $0x490] ss:$8 sps:$4 sm:$0xff]  }
  0x59   :  { %5165 = vmatprep.subr.bf16.mxu1 %v9999_v35  ;;  %v10172_v35 = vld [vmem:[%s14825_s0 + $0x2c] ss:$188 sps:$4 sm:$0xff]  }
  0x5b   :  { %5115 = vmatpush1.bf16.msra.mxu0 %v9994_v36  ;;  %v10086_v36 = vld [vmem:[%s14824_s1 + $0x440] ss:$8 sps:$4 sm:$0xff]  }
  0x5c   :  { %5116 = vmatprep.subr.bf16.mxu0 %v10002_v37  ;;  %5166 = vmatpush1.bf16.msra.mxu1 %v9997_v38  ;;  %v10094_v37 = vld [vmem:[%s14824_s1 + $0x434] ss:$8 sps:$4 sm:$0xff]   ;;  %v10089_v38 = vld [vmem:[%s14824_s1 + $0x540] ss:$8 sps:$4 sm:$0xff]  }
  0x5d   :  { %5167 = vmatprep.subr.bf16.mxu1 %v10005_v40  ;;  %v10092_v40 = vld [vmem:[%s14824_s1 + $0x430] ss:$8 sps:$4 sm:$0xff]  }
  0x5f   :  { %5117 = vmatpush1.bf16.msra.mxu0 %v10000_v41  ;;  %v10100_v41 = vld [vmem:[%s14824_s1 + $0x424] ss:$8 sps:$4 sm:$0xff]  }
  0x60   :  { %5118 = vmatprep.subr.bf16.mxu0 %v10008_v42  ;;  %5168 = vmatpush1.bf16.msra.mxu1 %v10003_v44  ;;  %v10095_v42 = vld [vmem:[%s14824_s1 + $0x530] ss:$8 sps:$4 sm:$0xff]   ;;  %v10098_v44 = vld [vmem:[%s14824_s1 + $0x420] ss:$8 sps:$4 sm:$0xff]  }
  0x61   :  { %5169 = vmatprep.subr.bf16.mxu1 %v10011_v45  ;;  %v10106_v45 = vld [vmem:[%s14824_s1 + $0x414] ss:$8 sps:$4 sm:$0xff]  }
  0x63   :  { %5119 = vmatpush2.bf16.msra.mxu0 %v10006_v46  ;;  %v10101_v46 = vld [vmem:[%s14824_s1 + $0x520] ss:$8 sps:$4 sm:$0xff]  }
  0x64   :  { %5120 = vmatprep.subr.bf16.mxu0 %v10014_v47  ;;  %5170 = vmatpush2.bf16.msra.mxu1 %v10009_v48  ;;  %v10109_v47 = vld [vmem:[%s14824_s1 + $0x514] ss:$8 sps:$4 sm:$0xff]   ;;  %v10104_v48 = vld [vmem:[%s14824_s1 + $0x410] ss:$8 sps:$4 sm:$0xff]  }
  0x65   :  { %5171 = vmatprep.subr.bf16.mxu1 %v10017_v49  ;;  %v10112_v49 = vld [vmem:[%s14824_s1 + $0x404] ss:$8 sps:$4 sm:$0xff]  }
  0x67   :  { %5121 = vmatpush2.bf16.msra.mxu0 %v10012_v50  ;;  %v10107_v50 = vld [vmem:[%s14824_s1 + $0x510] ss:$8 sps:$4 sm:$0xff]  }
  0x68   :  { %5122 = vmatprep.subr.bf16.mxu0 %v10020_v51  ;;  %5172 = vmatpush2.bf16.msra.mxu1 %v10015_v52  ;;  %v10115_v51 = vld [vmem:[%s14824_s1 + $0x504] ss:$8 sps:$4 sm:$0xff]   ;;  %v10110_v52 = vld [vmem:[%s14824_s1 + $0x400] ss:$8 sps:$4 sm:$0xff]  }
  0x69   :  { %5173 = vmatprep.subr.bf16.mxu1 %v10023_v53  ;;  %v10118_v53 = vld [vmem:[%s14824_s1 + $0x4f4] ss:$8 sps:$4 sm:$0xff]  }
  0x6b   :  { %5123 = vmatpush2.bf16.msra.mxu0 %v10018_v54  ;;  %v10113_v54 = vld [vmem:[%s14824_s1 + $0x500] ss:$8 sps:$4 sm:$0xff]  }
  0x6c   :  { %5124 = vmatprep.subr.bf16.mxu0 %v10026_v55  ;;  %5174 = vmatpush2.bf16.msra.mxu1 %v10021_v56  ;;  %v10121_v55 = vld [vmem:[%s14824_s1 + $0x5f4] ss:$8 sps:$4 sm:$0xff]   ;;  %v10116_v56 = vld [vmem:[%s14824_s1 + $0x4f0] ss:$8 sps:$4 sm:$0xff]  }
  0x6d   :  { %5175 = vmatprep.subr.bf16.mxu1 %v10029_v57  ;;  %v10124_v57 = vld [vmem:[%s14824_s1 + $0x4e4] ss:$8 sps:$4 sm:$0xff]  }
  0x6f   :  { %5125 = vmatpush2.bf16.msra.mxu0 %v10024_v58  ;;  %v10119_v58 = vld [vmem:[%s14824_s1 + $0x5f0] ss:$8 sps:$4 sm:$0xff]  }
  0x70   :  { %5126 = vmatprep.subr.bf16.mxu0 %v10032_v59  ;;  %5176 = vmatpush2.bf16.msra.mxu1 %v10027_v60  ;;  %v10127_v59 = vld [vmem:[%s14824_s1 + $0x5e4] ss:$8 sps:$4 sm:$0xff]   ;;  %v10122_v60 = vld [vmem:[%s14824_s1 + $0x4e0] ss:$8 sps:$4 sm:$0xff]  }
  0x71   :  { %5177 = vmatprep.subr.bf16.mxu1 %v10036_v61  ;;  %v10130_v61 = vld [vmem:[%s14824_s1 + $0x4d4] ss:$8 sps:$4 sm:$0xff]  }
  0x73   :  { %5127 = vmatpush2.bf16.msra.mxu0 %v10030_v62  ;;  %v10125_v62 = vld [vmem:[%s14824_s1 + $0x5e0] ss:$8 sps:$4 sm:$0xff]  }
  0x74   :  { %5128 = vmatprep.subr.bf16.mxu0 %v10040_v63  ;;  %5178 = vmatpush2.bf16.msra.mxu1 %v10034_v0  ;;  %v10133_v63 = vld [vmem:[%s14824_s1 + $0x5d4] ss:$8 sps:$4 sm:$0xff]   ;;  %v10128_v0 = vld [vmem:[%s14824_s1 + $0x4d0] ss:$8 sps:$4 sm:$0xff]  }
  0x75   :  { %5179 = vmatprep.subr.bf16.mxu1 %v10043_v1  ;;  %v10136_v1 = vld [vmem:[%s14824_s1 + $0x4c4] ss:$8 sps:$4 sm:$0xff]  }
  0x77   :  { %5129 = vmatpush2.bf16.msra.mxu0 %v10038_v2  ;;  %v10131_v2 = vld [vmem:[%s14824_s1 + $0x5d0] ss:$8 sps:$4 sm:$0xff]  }
  0x78   :  { %5130 = vmatprep.subr.bf16.mxu0 %v10047_v3  ;;  %5180 = vmatpush2.bf16.msra.mxu1 %v10041_v4  ;;  %v10139_v3 = vld [vmem:[%s14824_s1 + $0x5c4] ss:$8 sps:$4 sm:$0xff]   ;;  %v10134_v4 = vld [vmem:[%s14824_s1 + $0x4c0] ss:$8 sps:$4 sm:$0xff]  }
  0x79   :  { %5181 = vmatprep.subr.bf16.mxu1 %v10051_v5  ;;  %v10142_v5 = vld [vmem:[%s14824_s1 + $0x4b4] ss:$8 sps:$4 sm:$0xff]  }
  0x7b   :  { %5131 = vmatpush2.bf16.msra.mxu0 %v10045_v6  ;;  %v10137_v6 = vld [vmem:[%s14824_s1 + $0x5c0] ss:$8 sps:$4 sm:$0xff]  }
  0x7c   :  { %5132 = vmatprep.subr.bf16.mxu0 %v10054_v7  ;;  %5182 = vmatpush2.bf16.msra.mxu1 %v10049_v8  ;;  %v10145_v7 = vld [vmem:[%s14824_s1 + $0x5b4] ss:$8 sps:$4 sm:$0xff]   ;;  %v10140_v8 = vld [vmem:[%s14824_s1 + $0x4b0] ss:$8 sps:$4 sm:$0xff]  }
  0x7d   :  { %5183 = vmatprep.subr.bf16.mxu1 %v10057_v10  ;;  %v10143_v10 = vld [vmem:[%s14824_s1 + $0x5b0] ss:$8 sps:$4 sm:$0xff]  }
  0x7f   :  { %5133 = vmatpush2.bf16.msra.mxu0 %v10052_v9  ;;  %v10148_v9 = vld [vmem:[%s14824_s1 + $0x4a4] ss:$8 sps:$4 sm:$0xff]  }
  0x80   :  { %5204 = vmatprep.subr.bf16.mxu0 %v10063_v12  ;;  %5184 = vmatpush2.bf16.msra.mxu1 %v10055_v11  ;;  %v10151_v11 = vld [vmem:[%s14824_s1 + $0x5a4] ss:$8 sps:$4 sm:$0xff]   ;;  %v10146_v12 = vld [vmem:[%s14824_s1 + $0x4a0] ss:$8 sps:$4 sm:$0xff]  }
  0x81   :  { %5255 = vmatprep.subr.bf16.mxu1 %v10069_v15  ;;  %v10157_v15 = vld [vmem:[%s14824_s1 + $0x594] ss:$8 sps:$4 sm:$0xff]  }
  0x82   :  { %5135 = vmatmul.mubr.bf16.vlgmr.msra.gmra.mxu0 %v10058_v14  ;;  %v10149_v14 = vld [vmem:[%s14824_s1 + $0x5a0] ss:$8 sps:$4 sm:$0xff]  }
  0x83   :  { %5205 = vmatpush1.bf16.msra.mxu0 %v10061_v17  ;;  %5144 = vmatprep.mubr.bf16.mxu0 %v8504_v19  ;;  %v10160_v17 = vld [vmem:[%s14824_s1 + $0x484] ss:$8 sps:$4 sm:$0xff]  }
  0x84   :  { %5186 = vmatmul.mubr.bf16.vlgmr.msra.gmra.mxu1 %v10064_v18  ;;  %5206 = vmatprep.subr.bf16.mxu0 %v10072_v20  ;;  %v10155_v18 = vld [vmem:[%s14824_s1 + $0x590] ss:$8 sps:$4 sm:$0xff]   ;;  %v10163_v19 = vld [vmem:[%s14824_s1 + $0x584] ss:$8 sps:$4 sm:$0xff]   ;;  %v10158_v20 = vld [vmem:[%s14824_s1 + $0x480] ss:$8 sps:$4 sm:$0xff]  }
  0x85   :  { %5256 = vmatpush1.bf16.msra.mxu1 %v10067_v21  ;;  %5195 = vmatprep.mubr.bf16.mxu1 %v8506_v22  ;;  %v10161_v21 = vld [vmem:[%s14824_s1 + $0x580] ss:$8 sps:$4 sm:$0xff]   ;;  %v10169_v22 = vld [vmem:[%s14824_s1 + $0x674] ss:$8 sps:$4 sm:$0xff]  }
  0x86   :  { %5257 = vmatprep.subr.bf16.mxu1 %v10075_v23  ;;  %v97_v23 = vld [vmem:[%s14825_s0 + $0x198] sm:$0x33] }
  0x87   :  { %5207 = vmatpush1.bf16.msra.mxu0 %v10070_v24  ;;  %v10164_v24 = vld [vmem:[%s14825_s0 + $0x20] ss:$188 sps:$4 sm:$0xff]  }
  0x88   :  { %5208 = vmatprep.subr.bf16.mxu0 %v10080_v25  ;;  %v10167_v25 = vld [vmem:[%s14824_s1 + $0x670] ss:$8 sps:$4 sm:$0xff]  }
  0x89   :  { %5258 = vmatpush1.bf16.msra.mxu1 %v10073_v26  ;;  %v10175_v26 = vld [vmem:[%s14824_s1 + $0x774] ss:$8 sps:$4 sm:$0xff]  }
  0x8a   :  { %5145 = vmatmul.mubr.bf16.gmra.mxu0 %v8503_v27  ;;  %5259 = vmatprep.subr.bf16.mxu1 %v10085_v28  ;;  %v98_v27 = vld [vmem:[%s14825_s0 + $0x1a0] sm:$0x33] }
  0x8b   :  { %5209 = vmatpush1.bf16.msra.mxu0 %v10078_v29  ;;  %5236 = vmatprep.mubr.bf16.mxu0 %v10166_v30  ;;  %v10170_v28 = vld [vmem:[%s14825_s0 + $0x28] ss:$188 sps:$4 sm:$0xff]   ;;  %v8508_v29 = vcombine.high %v97_v23, %v97_v23 }
  0x8c   :  { %5196 = vmatmul.mubr.bf16.gmra.mxu1 %v8505_v31  ;;  %5210 = vmatprep.subr.bf16.mxu0 %v10088_v32  ;;  %v10178_v30 = vld [vmem:[%s14824_s1 + $0x664] ss:$8 sps:$4 sm:$0xff]   ;;  %v10173_v31 = vld [vmem:[%s14824_s1 + $0x770] ss:$8 sps:$4 sm:$0xff]   ;;  %v8510_v32 = vcombine.high %v98_v27, %v98_v27 }
  0x8d   :  { %5260 = vmatpush1.bf16.msra.mxu1 %v10083_v33  ;;  %5287 = vmatprep.mubr.bf16.mxu1 %v10172_v35  ;;  %v10181_v33 = vld [vmem:[%s14824_s1 + $0x764] ss:$8 sps:$4 sm:$0xff]   ;;  %v10186_v35 = vld [vmem:[%s14824_s1 + $0x654] ss:$8 sps:$4 sm:$0xff]  }
  0x8e   :  { %5261 = vmatprep.subr.bf16.mxu1 %v10091_v34  ;;  %v10176_v34 = vld [vmem:[%s14824_s1 + $0x660] ss:$8 sps:$4 sm:$0xff]  }
  0x8f   :  { %5211 = vmatpush1.bf16.msra.mxu0 %v10086_v36  ;;  %v10179_v36 = vld [vmem:[%s14824_s1 + $0x760] ss:$8 sps:$4 sm:$0xff]  }
  0x90   :  { %5212 = vmatprep.subr.bf16.mxu0 %v10094_v37  ;;  %v8507_v37 = vcombine.low %v97_v23, %v97_v23  ;;  %v862_v23 = vlaneseq }
  0x91   :  { %5262 = vmatpush1.bf16.msra.mxu1 %v10089_v38  ;;  %v10184_v38 = vld [vmem:[%s14824_s1 + $0x650] ss:$8 sps:$4 sm:$0xff]  }
  0x92   :  { %5263 = vmatprep.subr.bf16.mxu1 %v10097_v39  ;;  %v10191_v39 = vld [vmem:[%s14824_s1 + $0x754] ss:$8 sps:$4 sm:$0xff]  }
  0x93   :  { %5213 = vmatpush1.bf16.msra.mxu0 %v10092_v40  ;;  %v10272_v40 = vld [vmem:[%s14825_s0 + $0x34] ss:$188 sps:$4 sm:$0xff]  }
  0x94   :  { %5214 = vmatprep.subr.bf16.mxu0 %v10100_v41  ;;  %v8509_v41 = vcombine.low %v98_v27, %v98_v27  ;;  %v10258_v27 = vld [vmem:[%s14824_s1 + $0x690] ss:$8 sps:$4 sm:$0xff]  }
  0x95   :  { %5264 = vmatpush1.bf16.msra.mxu1 %v10095_v42  ;;  %v10194_v42 = vld [vmem:[%s14824_s1 + $0x644] ss:$8 sps:$4 sm:$0xff]  }
  0x96   :  { %5265 = vmatprep.subr.bf16.mxu1 %v10103_v43  ;;  %v10189_v43 = vld [vmem:[%s14824_s1 + $0x750] ss:$8 sps:$4 sm:$0xff]  }
  0x97   :  { %5215 = vmatpush1.bf16.msra.mxu0 %v10098_v44  ;;  %v10278_v44 = vld [vmem:[%s14825_s0 + $0x3c] ss:$188 sps:$4 sm:$0xff]  }
  0x98   :  { %5216 = vmatprep.subr.bf16.mxu0 %v10106_v45  ;;  %v10197_v45 = vld [vmem:[%s14824_s1 + $0x744] ss:$8 sps:$4 sm:$0xff]  }
  0x99   :  { %5266 = vmatpush1.bf16.msra.mxu1 %v10101_v46  ;;  %v10192_v46 = vld [vmem:[%s14824_s1 + $0x640] ss:$8 sps:$4 sm:$0xff]  }
  0x9a   :  { %5267 = vmatprep.subr.bf16.mxu1 %v10109_v47  ;;  %v10200_v47 = vld [vmem:[%s14824_s1 + $0x634] ss:$8 sps:$4 sm:$0xff]  }
  0x9b   :  { %5217 = vmatpush1.bf16.msra.mxu0 %v10104_v48  ;;  %v10195_v48 = vld [vmem:[%s14824_s1 + $0x740] ss:$8 sps:$4 sm:$0xff]  }
  0x9c   :  { %5218 = vmatprep.subr.bf16.mxu0 %v10112_v49  ;;  %v10203_v49 = vld [vmem:[%s14824_s1 + $0x734] ss:$8 sps:$4 sm:$0xff]  }
  0x9d   :  { %5268 = vmatpush1.bf16.msra.mxu1 %v10107_v50  ;;  %v10198_v50 = vld [vmem:[%s14824_s1 + $0x630] ss:$8 sps:$4 sm:$0xff]  }
  0x9e   :  { %5269 = vmatprep.subr.bf16.mxu1 %v10115_v51  ;;  %v10206_v51 = vld [vmem:[%s14824_s1 + $0x624] ss:$8 sps:$4 sm:$0xff]  }
  0x9f   :  { %5219 = vmatpush1.bf16.msra.mxu0 %v10110_v52  ;;  %v10201_v52 = vld [vmem:[%s14824_s1 + $0x730] ss:$8 sps:$4 sm:$0xff]  }
  0xa0   :  { %5220 = vmatprep.subr.bf16.mxu0 %v10118_v53  ;;  %v10209_v53 = vld [vmem:[%s14824_s1 + $0x724] ss:$8 sps:$4 sm:$0xff]  }
  0xa1   :  { %5270 = vmatpush1.bf16.msra.mxu1 %v10113_v54  ;;  %v10204_v54 = vld [vmem:[%s14824_s1 + $0x620] ss:$8 sps:$4 sm:$0xff]  }
  0xa2   :  { %5271 = vmatprep.subr.bf16.mxu1 %v10121_v55  ;;  %v10212_v55 = vld [vmem:[%s14824_s1 + $0x614] ss:$8 sps:$4 sm:$0xff]  }
  0xa3   :  { %5221 = vmatpush2.bf16.msra.mxu0 %v10116_v56  ;;  %v10207_v56 = vld [vmem:[%s14824_s1 + $0x720] ss:$8 sps:$4 sm:$0xff]  }
  0xa4   :  { %5222 = vmatprep.subr.bf16.mxu0 %v10124_v57  ;;  %v10215_v57 = vld [vmem:[%s14824_s1 + $0x714] ss:$8 sps:$4 sm:$0xff]  }
  0xa5   :  { %5272 = vmatpush2.bf16.msra.mxu1 %v10119_v58  ;;  %v10210_v58 = vld [vmem:[%s14824_s1 + $0x610] ss:$8 sps:$4 sm:$0xff]  }
  0xa6   :  { %5273 = vmatprep.subr.bf16.mxu1 %v10127_v59  ;;  %v10218_v59 = vld [vmem:[%s14824_s1 + $0x604] ss:$8 sps:$4 sm:$0xff]  }
  0xa7   :  { %5223 = vmatpush2.bf16.msra.mxu0 %v10122_v60  ;;  %v10213_v60 = vld [vmem:[%s14824_s1 + $0x710] ss:$8 sps:$4 sm:$0xff]  }
  0xa8   :  { %5224 = vmatprep.subr.bf16.mxu0 %v10130_v61  ;;  %v10221_v61 = vld [vmem:[%s14824_s1 + $0x704] ss:$8 sps:$4 sm:$0xff]  }
  0xa9   :  { %5274 = vmatpush2.bf16.msra.mxu1 %v10125_v62  ;;  %v10216_v62 = vld [vmem:[%s14824_s1 + $0x600] ss:$8 sps:$4 sm:$0xff]  }
  0xaa   :  { %5275 = vmatprep.subr.bf16.mxu1 %v10133_v63  ;;  %v10224_v63 = vld [vmem:[%s14824_s1 + $0x6f4] ss:$8 sps:$4 sm:$0xff]  }
  0xab   :  { %5225 = vmatpush2.bf16.msra.mxu0 %v10128_v0  ;;  %v10219_v0 = vld [vmem:[%s14824_s1 + $0x700] ss:$8 sps:$4 sm:$0xff]  }
  0xac   :  { %5226 = vmatprep.subr.bf16.mxu0 %v10136_v1  ;;  %v10227_v1 = vld [vmem:[%s14824_s1 + $0x7f4] ss:$8 sps:$4 sm:$0xff]  }
  0xad   :  { %5276 = vmatpush2.bf16.msra.mxu1 %v10131_v2  ;;  %v10222_v2 = vld [vmem:[%s14824_s1 + $0x6f0] ss:$8 sps:$4 sm:$0xff]  }
  0xae   :  { %5277 = vmatprep.subr.bf16.mxu1 %v10139_v3  ;;  %v10230_v3 = vld [vmem:[%s14824_s1 + $0x6e4] ss:$8 sps:$4 sm:$0xff]  }
  0xaf   :  { %5227 = vmatpush2.bf16.msra.mxu0 %v10134_v4  ;;  %v10225_v4 = vld [vmem:[%s14824_s1 + $0x7f0] ss:$8 sps:$4 sm:$0xff]  }
  0xb0   :  { %5228 = vmatprep.subr.bf16.mxu0 %v10142_v5  ;;  %v10233_v5 = vld [vmem:[%s14824_s1 + $0x7e4] ss:$8 sps:$4 sm:$0xff]  }
  0xb1   :  { %5278 = vmatpush2.bf16.msra.mxu1 %v10137_v6  ;;  %v10228_v6 = vld [vmem:[%s14824_s1 + $0x6e0] ss:$8 sps:$4 sm:$0xff]  }
  0xb2   :  { %5279 = vmatprep.subr.bf16.mxu1 %v10145_v7  ;;  %v10236_v7 = vld [vmem:[%s14824_s1 + $0x6d4] ss:$8 sps:$4 sm:$0xff]  }
  0xb3   :  { %5229 = vmatpush2.bf16.msra.mxu0 %v10140_v8  ;;  %v10231_v8 = vld [vmem:[%s14824_s1 + $0x7e0] ss:$8 sps:$4 sm:$0xff]  }
  0xb4   :  { %5230 = vmatprep.subr.bf16.mxu0 %v10148_v9  ;;  %v10239_v9 = vld [vmem:[%s14824_s1 + $0x7d4] ss:$8 sps:$4 sm:$0xff]  }
  0xb5   :  { %5280 = vmatpush2.bf16.msra.mxu1 %v10143_v10  ;;  %v10234_v10 = vld [vmem:[%s14824_s1 + $0x6d0] ss:$8 sps:$4 sm:$0xff]  }
  0xb6   :  { %5281 = vmatprep.subr.bf16.mxu1 %v10151_v11  ;;  %v10242_v11 = vld [vmem:[%s14824_s1 + $0x6c4] ss:$8 sps:$4 sm:$0xff]  }
  0xb7   :  { %5231 = vmatpush2.bf16.msra.mxu0 %v10146_v12  ;;  %v10237_v12 = vld [vmem:[%s14824_s1 + $0x7d0] ss:$8 sps:$4 sm:$0xff]  }
  0xb8   :  { %5232 = vmatprep.subr.bf16.mxu0 %v10154_v13  ;;  %v10245_v13 = vld [vmem:[%s14824_s1 + $0x7c4] ss:$8 sps:$4 sm:$0xff]  }
  0xb9   :  { %5282 = vmatpush2.bf16.msra.mxu1 %v10149_v14  ;;  %v10240_v14 = vld [vmem:[%s14824_s1 + $0x6c0] ss:$8 sps:$4 sm:$0xff]  }
  0xba   :  { %5283 = vmatprep.subr.bf16.mxu1 %v10157_v15  ;;  %v10248_v15 = vld [vmem:[%s14824_s1 + $0x6b4] ss:$8 sps:$4 sm:$0xff]  }
  0xbb   :  { %5233 = vmatpush2.bf16.msra.mxu0 %v10152_v16  ;;  %v10243_v16 = vld [vmem:[%s14824_s1 + $0x7c0] ss:$8 sps:$4 sm:$0xff]  }
  0xbc   :  { %5234 = vmatprep.subr.bf16.mxu0 %v10160_v17  ;;  %v10251_v17 = vld [vmem:[%s14824_s1 + $0x7b4] ss:$8 sps:$4 sm:$0xff]  }
  0xbd   :  { %5284 = vmatpush2.bf16.msra.mxu1 %v10155_v18  ;;  %v10246_v18 = vld [vmem:[%s14824_s1 + $0x6b0] ss:$8 sps:$4 sm:$0xff]  }
  0xbe   :  { %5285 = vmatprep.subr.bf16.mxu1 %v10163_v19  ;;  %v10254_v19 = vld [vmem:[%s14824_s1 + $0x6a4] ss:$8 sps:$4 sm:$0xff]  }
  0xbf   :  { %5235 = vmatpush2.bf16.msra.mxu0 %v10158_v20  ;;  %v10249_v20 = vld [vmem:[%s14824_s1 + $0x7b0] ss:$8 sps:$4 sm:$0xff]  }
  0xc0   :  { %5306 = vmatprep.subr.bf16.mxu0 %v10169_v22  ;;  %v10252_v22 = vld [vmem:[%s14824_s1 + $0x6a0] ss:$8 sps:$4 sm:$0xff]  }
  0xc1   :  { %5286 = vmatpush2.bf16.msra.mxu1 %v10161_v21  ;;  %v10257_v21 = vld [vmem:[%s14824_s1 + $0x7a4] ss:$8 sps:$4 sm:$0xff]  }
  0xc2   :  { %5237 = vmatmul.mubr.bf16.vlgmr.msra.gmra.mxu0 %v10164_v24  ;;  %5357 = vmatprep.subr.bf16.mxu1 %v10175_v26  ;;  %v10260_v24 = vld [vmem:[%s14824_s1 + $0x694] ss:$8 sps:$4 sm:$0xff]  }
  0xc3   :  { %5307 = vmatpush1.bf16.msra.mxu0 %v10167_v25  ;;  %5246 = vmatprep.mubr.bf16.mxu0 %v8508_v29  ;;  %v10255_v25 = vld [vmem:[%s14824_s1 + $0x7a0] ss:$8 sps:$4 sm:$0xff]   ;;  %v10263_v26 = vld [vmem:[%s14824_s1 + $0x794] ss:$8 sps:$4 sm:$0xff]   ;;  %v10261_v29 = vld [vmem:[%s14824_s1 + $0x790] ss:$8 sps:$4 sm:$0xff]  }
  0xc4   :  { %5288 = vmatmul.mubr.bf16.vlgmr.msra.gmra.mxu1 %v10170_v28  ;;  %5308 = vmatprep.subr.bf16.mxu0 %v10178_v30  ;;  %v12181_v28 = vshrl.u32 %v862_v23, 7  ;;  %v10266_v30 = vld [vmem:[%s14824_s1 + $0x684] ss:$8 sps:$4 sm:$0xff]  }
  0xc5   :  { %5358 = vmatpush1.bf16.msra.mxu1 %v10173_v31  ;;  %5297 = vmatprep.mubr.bf16.mxu1 %v8510_v32  ;;  %v10264_v31 = vld [vmem:[%s14824_s1 + $0x680] ss:$8 sps:$4 sm:$0xff]   ;;  %v10269_v32 = vld [vmem:[%s14824_s1 + $0x784] ss:$8 sps:$4 sm:$0xff]  }
  0xc6   :  { %5359 = vmatprep.subr.bf16.mxu1 %v10181_v33  ;;  %v10267_v33 = vld [vmem:[%s14824_s1 + $0x780] ss:$8 sps:$4 sm:$0xff]  }
  0xc7   :  { %5309 = vmatpush1.bf16.msra.mxu0 %v10176_v34  ;;  %v860_v34 = vld [vmem:[%s14826_s2] sm:$0x3] }
  0xc8   :  { %5310 = vmatprep.subr.bf16.mxu0 %v10186_v35  ;;  %v864_v35 = vsub.s32 0, %v12181_v28 }
  0xc9   :  { %5360 = vmatpush1.bf16.msra.mxu1 %v10179_v36  ;;  %v10270_v36 = vld [vmem:[%s14825_s0 + $0x30] ss:$188 sps:$4 sm:$0xff]  }
  0xca   :  { %5247 = vmatmul.mubr.bf16.gmra.mxu0 %v8507_v37  ;;  %5361 = vmatprep.subr.bf16.mxu1 %v10191_v39  ;;  %v10275_v37 = vld [vmem:[%s14824_s1 + $0x874] ss:$8 sps:$4 sm:$0xff]   ;;  %v868_v39 = vsub.s32 1, %v12181_v28 }
  0xcb   :  { %5311 = vmatpush1.bf16.msra.mxu0 %v10184_v38  ;;  %5338 = vmatprep.mubr.bf16.mxu0 %v10272_v40  ;;  %v99_v38 = vld [vmem:[%s14825_s0 + $0x1a8] sm:$0x33]  ;;  %v10281_v40 = vld [vmem:[%s14824_s1 + $0x974] ss:$8 sps:$4 sm:$0xff]  }
  0xcc   :  { %5298 = vmatmul.mubr.bf16.gmra.mxu1 %v8509_v41  ;;  %5312 = vmatprep.subr.bf16.mxu0 %v10194_v42  ;;  %v100_v41 = vld [vmem:[%s14825_s0 + $0x1b0] sm:$0x33]  ;;  %v12220_v42 = vrot.slane %v860_v34, %v864_v35 }
  0xcd   :  { %5362 = vmatpush1.bf16.msra.mxu1 %v10189_v43  ;;  %5389 = vmatprep.mubr.bf16.mxu1 %v10278_v44  ;;  %v10273_v43 = vld [vmem:[%s14824_s1 + $0x870] ss:$8 sps:$4 sm:$0xff]   ;;  %v8512_v44 = vcombine.high %v99_v38, %v99_v38 }
  0xce   :  { %5363 = vmatprep.subr.bf16.mxu1 %v10197_v45  ;;  %v10276_v45 = vld [vmem:[%s14825_s0 + $0x38] ss:$188 sps:$4 sm:$0xff]  }
  0xcf   :  { %5313 = vmatpush1.bf16.msra.mxu0 %v10192_v46  ;;  %v10284_v46 = vld [vmem:[%s14824_s1 + $0x864] ss:$8 sps:$4 sm:$0xff]  }
  0xd0   :  { %5314 = vmatprep.subr.bf16.mxu0 %v10200_v47  ;;  %v12233_v47 = vrot.slane %v860_v34, %v868_v39 }
  0xd1   :  { %5364 = vmatpush1.bf16.msra.mxu1 %v10195_v48  ;;  %v10279_v48 = vld [vmem:[%s14824_s1 + $0x970] ss:$8 sps:$4 sm:$0xff]  }
  0xd2   :  { %5365 = vmatprep.subr.bf16.mxu1 %v10203_v49  ;;  %v8514_v49 = vcombine.high %v100_v41, %v100_v41 }
  0xd3   :  { %5315 = vmatpush1.bf16.msra.mxu0 %v10198_v50 }
  0xd4   :  { %5316 = vmatprep.subr.bf16.mxu0 %v10206_v51  ;;  %v10287_v51 = vld [vmem:[%s14824_s1 + $0x964] ss:$8 sps:$4 sm:$0xff]  }
  0xd5   :  { %5366 = vmatpush1.bf16.msra.mxu1 %v10201_v52 }
  0xd6   :  { %5367 = vmatprep.subr.bf16.mxu1 %v10209_v53  ;;  %v10282_v53 = vld [vmem:[%s14824_s1 + $0x860] ss:$8 sps:$4 sm:$0xff]  }
  0xd7   :  { %5317 = vmatpush1.bf16.msra.mxu0 %v10204_v54 }
  0xd8   :  { %5318 = vmatprep.subr.bf16.mxu0 %v10212_v55 }
  0xd9   :  { %5368 = vmatpush1.bf16.msra.mxu1 %v10207_v56  ;;  %v10292_v56 = vld [vmem:[%s14824_s1 + $0x854] ss:$8 sps:$4 sm:$0xff]  }
  0xda   :  { %5369 = vmatprep.subr.bf16.mxu1 %v10215_v57 }
  0xdb   :  { %5319 = vmatpush1.bf16.msra.mxu0 %v10210_v58 }
  0xdc   :  { %5320 = vmatprep.subr.bf16.mxu0 %v10218_v59  ;;  %v10285_v59 = vld [vmem:[%s14824_s1 + $0x960] ss:$8 sps:$4 sm:$0xff]  }
  0xdd   :  { %5370 = vmatpush1.bf16.msra.mxu1 %v10213_v60 }
  0xde   :  { %5371 = vmatprep.subr.bf16.mxu1 %v10221_v61 }
  0xdf   :  { %5321 = vmatpush1.bf16.msra.mxu0 %v10216_v62  ;;  %v8511_v62 = vcombine.low %v99_v38, %v99_v38 }
  0xe0   :  { %5322 = vmatprep.subr.bf16.mxu0 %v10224_v63  ;;  %v10297_v63 = vld [vmem:[%s14824_s1 + $0x954] ss:$8 sps:$4 sm:$0xff]  }
  0xe1   :  { %5372 = vmatpush1.bf16.msra.mxu1 %v10219_v0 }
  0xe2   :  { %5373 = vmatprep.subr.bf16.mxu1 %v10227_v1 }
  0xe3   :  { %5323 = vmatpush2.bf16.msra.mxu0 %v10222_v2  ;;  %v10290_v2 = vld [vmem:[%s14824_s1 + $0x850] ss:$8 sps:$4 sm:$0xff]  }
  0xe4   :  { %5324 = vmatprep.subr.bf16.mxu0 %v10230_v3  ;;  %v10378_v3 = vld [vmem:[%s14825_s0 + $0x44] ss:$188 sps:$4 sm:$0xff]  }
  0xe5   :  { %5374 = vmatpush2.bf16.msra.mxu1 %v10225_v4 }
  0xe6   :  { %5375 = vmatprep.subr.bf16.mxu1 %v10233_v5  ;;  %v8513_v5 = vcombine.low %v100_v41, %v100_v41 }
  0xe7   :  { %5325 = vmatpush2.bf16.msra.mxu0 %v10228_v6  ;;  %v10295_v6 = vld [vmem:[%s14824_s1 + $0x950] ss:$8 sps:$4 sm:$0xff]  }
  0xe8   :  { %5326 = vmatprep.subr.bf16.mxu0 %v10236_v7  ;;  %v10300_v7 = vld [vmem:[%s14824_s1 + $0x844] ss:$8 sps:$4 sm:$0xff]  }
  0xe9   :  { %5376 = vmatpush2.bf16.msra.mxu1 %v10231_v8 }
  0xea   :  { %5377 = vmatprep.subr.bf16.mxu1 %v10239_v9  ;;  %v10384_v9 = vld [vmem:[%s14825_s0 + $0x4c] ss:$188 sps:$4 sm:$0xff]  }
  0xeb   :  { %5327 = vmatpush2.bf16.msra.mxu0 %v10234_v10  ;;  %v10303_v10 = vld [vmem:[%s14824_s1 + $0x944] ss:$8 sps:$4 sm:$0xff]  }
  0xec   :  { %5328 = vmatprep.subr.bf16.mxu0 %v10242_v11  ;;  %v10298_v11 = vld [vmem:[%s14824_s1 + $0x840] ss:$8 sps:$4 sm:$0xff]  }
  0xed   :  { %5378 = vmatpush2.bf16.msra.mxu1 %v10237_v12  ;;  %v10306_v12 = vld [vmem:[%s14824_s1 + $0x834] ss:$8 sps:$4 sm:$0xff]  }
  0xee   :  { %5379 = vmatprep.subr.bf16.mxu1 %v10245_v13  ;;  %v10301_v13 = vld [vmem:[%s14824_s1 + $0x940] ss:$8 sps:$4 sm:$0xff]  }
  0xef   :  { %5329 = vmatpush2.bf16.msra.mxu0 %v10240_v14  ;;  %v10309_v14 = vld [vmem:[%s14824_s1 + $0x934] ss:$8 sps:$4 sm:$0xff]  }
  0xf0   :  { %5330 = vmatprep.subr.bf16.mxu0 %v10248_v15  ;;  %v10304_v15 = vld [vmem:[%s14824_s1 + $0x830] ss:$8 sps:$4 sm:$0xff]  }
  0xf1   :  { %5380 = vmatpush2.bf16.msra.mxu1 %v10243_v16 }
  0xf2   :  { %5381 = vmatprep.subr.bf16.mxu1 %v10251_v17  ;;  %v10312_v17 = vld [vmem:[%s14824_s1 + $0x824] ss:$8 sps:$4 sm:$0xff]  }
  0xf3   :  { %5331 = vmatpush2.bf16.msra.mxu0 %v10246_v18  ;;  %v10307_v18 = vld [vmem:[%s14824_s1 + $0x930] ss:$8 sps:$4 sm:$0xff]  }
  0xf4   :  { %5332 = vmatprep.subr.bf16.mxu0 %v10254_v19  ;;  %v10315_v19 = vld [vmem:[%s14824_s1 + $0x924] ss:$8 sps:$4 sm:$0xff]  }
  0xf5   :  { %5382 = vmatpush2.bf16.msra.mxu1 %v10249_v20 }
  0xf6   :  { %5383 = vmatprep.subr.bf16.mxu1 %v10257_v21  ;;  %v10310_v21 = vld [vmem:[%s14824_s1 + $0x820] ss:$8 sps:$4 sm:$0xff]  }
  0xf7   :  { %5333 = vmatpush2.bf16.msra.mxu0 %v10252_v22  ;;  %v10318_v22 = vld [vmem:[%s14824_s1 + $0x814] ss:$8 sps:$4 sm:$0xff]  }
  0xf8   :  { %5334 = vmatprep.subr.bf16.mxu0 %v10260_v24 }
  0xf9   :  { %5384 = vmatpush2.bf16.msra.mxu1 %v10255_v25 }
  0xfa   :  { %5385 = vmatprep.subr.bf16.mxu1 %v10263_v26  ;;  %v10313_v26 = vld [vmem:[%s14824_s1 + $0x920] ss:$8 sps:$4 sm:$0xff]  }
  0xfb   :  { %5335 = vmatpush2.bf16.msra.mxu0 %v10258_v27  ;;  %v10321_v27 = vld [vmem:[%s14824_s1 + $0x914] ss:$8 sps:$4 sm:$0xff]  }
  0xfc   :  { %5336 = vmatprep.subr.bf16.mxu0 %v10266_v30 }
  0xfd   :  { %5386 = vmatpush2.bf16.msra.mxu1 %v10261_v29 }
  0xfe   :  { %5387 = vmatprep.subr.bf16.mxu1 %v10269_v32 }
  0xff   :  { %5337 = vmatpush2.bf16.msra.mxu0 %v10264_v31  ;;  %v10316_v31 = vld [vmem:[%s14824_s1 + $0x810] ss:$8 sps:$4 sm:$0xff]  }
 0x100   :  { %5408 = vmatprep.subr.bf16.mxu0 %v10275_v37  ;;  %v10319_v37 = vld [vmem:[%s14824_s1 + $0x910] ss:$8 sps:$4 sm:$0xff]  }
 0x101   :  { %5388 = vmatpush2.bf16.msra.mxu1 %v10267_v33  ;;  %v10324_v33 = vld [vmem:[%s14824_s1 + $0x804] ss:$8 sps:$4 sm:$0xff]  }
 0x102   :  { %v5034_v50 = vpop.f32.mrf.mxu0  ;;  %5339 = vmatmul.mubr.bf16.vlgmr.msra.gmra.mxu0 %v10270_v36  ;;  %5459 = vmatprep.subr.bf16.mxu1 %v10281_v40  ;;  %v10327_v40 = vld [vmem:[%s14824_s1 + $0x904] ss:$8 sps:$4 sm:$0xff]  }
 0x103   :  { %v5035_v52 = vadd.f32 %v5034_v50, %v12220_v42  ;;  %5409 = vmatpush1.bf16.msra.mxu0 %v10273_v43  ;;  %5348 = vmatprep.mubr.bf16.mxu0 %v8512_v44  ;;  %v5085_v55 = vpop.f32.mrf.mxu1  ;;  %v10330_v44 = vld [vmem:[%s14824_s1 + $0x8f4] ss:$8 sps:$4 sm:$0xff]   ;;  %v10336_v50 = vld [vmem:[%s14824_s1 + $0x8e4] ss:$8 sps:$4 sm:$0xff]  }
 0x104   :  { %v5036_v54 = vpop.f32.mrf.mxu0  ;;  %5390 = vmatmul.mubr.bf16.vlgmr.msra.gmra.mxu1 %v10276_v45  ;;  %5410 = vmatprep.subr.bf16.mxu0 %v10284_v46  ;;  %v10325_v45 = vld [vmem:[%s14824_s1 + $0x900] ss:$8 sps:$4 sm:$0xff]  }
 0x105   :  { %v5037_v57 = vadd.f32 %v5036_v54, %v12233_v47  ;;  %v12249_v58 = vadd.f32 %v5085_v55, %v5035_v52  ;;  %5460 = vmatpush1.bf16.msra.mxu1 %v10279_v48  ;;  %5399 = vmatprep.mubr.bf16.mxu1 %v8514_v49  ;;  %v5087_v61 = vpop.f32.mrf.mxu1  ;;  %v10333_v48 = vld [vmem:[%s14824_s1 + $0x9f4] ss:$8 sps:$4 sm:$0xff]   ;;  %v10328_v49 = vld [vmem:[%s14824_s1 + $0x8f0] ss:$8 sps:$4 sm:$0xff]   ;;  %v10339_v52 = vld [vmem:[%s14824_s1 + $0x9e4] ss:$8 sps:$4 sm:$0xff]  }
 0x106   :  { %v5038_v60 = vpop.f32.mrf.mxu0  ;;  %5461 = vmatprep.subr.bf16.mxu1 %v10287_v51  ;;  %v10331_v51 = vld [vmem:[%s14824_s1 + $0x9f0] ss:$8 sps:$4 sm:$0xff]   ;;  %v10342_v54 = vld [vmem:[%s14824_s1 + $0x8d4] ss:$8 sps:$4 sm:$0xff]   ;;  %v10337_v55 = vld [vmem:[%s14824_s1 + $0x9e0] ss:$8 sps:$4 sm:$0xff]  }
 0x107   :  { %v5039_v0 = vadd.f32 %v5038_v60, %v12220_v42  ;;  %v12258_v1 = vadd.f32 %v5087_v61, %v5037_v57  ;;  %5411 = vmatpush1.bf16.msra.mxu0 %v10282_v53  ;;  %v5089_v4 = vpop.f32.mrf.mxu1  ;;  %v10334_v53 = vld [vmem:[%s14824_s1 + $0x8e0] ss:$8 sps:$4 sm:$0xff]   ;;  %v10340_v57 = vld [vmem:[%s14824_s1 + $0x8d0] ss:$8 sps:$4 sm:$0xff]   ;;  %v10351_v61 = vld [vmem:[%s14824_s1 + $0x9c4] ss:$8 sps:$4 sm:$0xff]  }
 0x108   :  { %5412 = vmatprep.subr.bf16.mxu0 %v10292_v56  ;;  %v12295_v16 = vpop.f32.mrf.mxu0  ;;  %v10345_v56 = vld [vmem:[%s14824_s1 + $0x9d4] ss:$8 sps:$4 sm:$0xff]   ;;  %v10343_v60 = vld [vmem:[%s14824_s1 + $0x9d0] ss:$8 sps:$4 sm:$0xff]  }
 0x109   :  { %v12272_v8 = vadd.f32 %v5089_v4, %v5039_v0  ;;  %5462 = vmatpush1.bf16.msra.mxu1 %v10285_v59  ;;  %v12313_v25 = vpop.f32.mrf.mxu1  ;;  %v10348_v59 = vld [vmem:[%s14824_s1 + $0x8c4] ss:$8 sps:$4 sm:$0xff]   ;;  %v10349_v0 = vld [vmem:[%s14824_s1 + $0x9c0] ss:$8 sps:$4 sm:$0xff]  }
 0x10a   :  { %5349 = vmatmul.mubr.bf16.gmra.mxu0 %v8511_v62  ;;  %5463 = vmatprep.subr.bf16.mxu1 %v10297_v63  ;;  %v5044_v20 = vpop.f32.mrf.mxu0  ;;  %v10346_v62 = vld [vmem:[%s14824_s1 + $0x8c0] ss:$8 sps:$4 sm:$0xff]   ;;  %v10354_v63 = vld [vmem:[%s14824_s1 + $0x8b4] ss:$8 sps:$4 sm:$0xff]   ;;  %v10360_v4 = vld [vmem:[%s14824_s1 + $0x8a4] ss:$8 sps:$4 sm:$0xff]  }
 0x10b   :  { %5413 = vmatpush1.bf16.msra.mxu0 %v10290_v2  ;;  %5440 = vmatprep.mubr.bf16.mxu0 %v10378_v3  ;;  %v5045_v23 = vadd.f32 %v5044_v20, %v12220_v42  ;;  %v5095_v32 = vpop.f32.mrf.mxu1  ;;  %v10322_v42 = vld [vmem:[%s14824_s1 + $0x800] ss:$8 sps:$4 sm:$0xff]   ;;  %v10357_v2 = vld [vmem:[%s14824_s1 + $0x9b4] ss:$8 sps:$4 sm:$0xff]   ;;  %v10352_v3 = vld [vmem:[%s14824_s1 + $0x8b0] ss:$8 sps:$4 sm:$0xff]  }
 0x10c   :  { %5400 = vmatmul.mubr.bf16.gmra.mxu1 %v8513_v5  ;;  %5414 = vmatprep.subr.bf16.mxu0 %v10300_v7  ;;  %v5046_v24 = vpop.f32.mrf.mxu0  ;;  %v10355_v5 = vld [vmem:[%s14824_s1 + $0x9b0] ss:$8 sps:$4 sm:$0xff]   ;;  %v10358_v7 = vld [vmem:[%s14824_s1 + $0x8a0] ss:$8 sps:$4 sm:$0xff]  }
 0x10d   :  { %5464 = vmatpush1.bf16.msra.mxu1 %v10295_v6  ;;  %5491 = vmatprep.mubr.bf16.mxu1 %v10384_v9  ;;  %v5047_v29 = vadd.f32 %v5046_v24, %v12233_v47  ;;  %v12328_v36 = vadd.f32 %v5095_v32, %v5045_v23  ;;  %v5097_v38 = vpop.f32.mrf.mxu1  ;;  %v10363_v6 = vld [vmem:[%s14824_s1 + $0x9a4] ss:$8 sps:$4 sm:$0xff]   ;;  %v10366_v9 = vld [vmem:[%s14824_s1 + $0x894] ss:$8 sps:$4 sm:$0xff]   ;;  %v10379_v24 = vld [vmem:[%s14824_s1 + $0xa70] ss:$8 sps:$4 sm:$0xff]  }
 0x10e   :  { %5465 = vmatprep.subr.bf16.mxu1 %v10303_v10  ;;  %v5048_v30 = vpop.f32.mrf.mxu0  ;;  %v10361_v10 = vld [vmem:[%s14824_s1 + $0x9a0] ss:$8 sps:$4 sm:$0xff]   ;;  %v101_v20 = vld [vmem:[%s14825_s0 + $0x1b8] sm:$0x33] }
 0x10f   :  { %5415 = vmatpush1.bf16.msra.mxu0 %v10298_v11  ;;  %v12336_v41 = vadd.f32 %v5097_v38, %v5047_v29  ;;  %v5099_v43 = vpop.f32.mrf.mxu1  ;;  %v10369_v11 = vld [vmem:[%s14824_s1 + $0x994] ss:$8 sps:$4 sm:$0xff]   ;;  %v102_v23 = vld [vmem:[%s14825_s0 + $0x1c0] sm:$0x33]  ;;  %v10385_v30 = vld [vmem:[%s14824_s1 + $0xb70] ss:$8 sps:$4 sm:$0xff]  }
 0x110   :  { %5416 = vmatprep.subr.bf16.mxu0 %v10306_v12  ;;  %v5049_v34 = vpop.f32.mrf.mxu0  ;;  %v10364_v12 = vld [vmem:[%s14824_s1 + $0x890] ss:$8 sps:$4 sm:$0xff]   ;;  %v10390_v29 = vld [vmem:[%s14824_s1 + $0xa64] ss:$8 sps:$4 sm:$0xff]  }
 0x111   :  { %5466 = vmatpush1.bf16.msra.mxu1 %v10301_v13  ;;  %v5100_v46 = vpop.f32.mrf.mxu1  ;;  %v10372_v13 = vld [vmem:[%s14824_s1 + $0x884] ss:$8 sps:$4 sm:$0xff]  }
 0x112   :  { %5467 = vmatprep.subr.bf16.mxu1 %v10309_v14  ;;  %v10367_v14 = vld [vmem:[%s14824_s1 + $0x990] ss:$8 sps:$4 sm:$0xff]  }
 0x113   :  { %5417 = vmatpush1.bf16.msra.mxu0 %v10304_v15  ;;  %v10370_v15 = vld [vmem:[%s14824_s1 + $0x880] ss:$8 sps:$4 sm:$0xff]  }
 0x114   :  { %5418 = vmatprep.subr.bf16.mxu0 %v10312_v17  ;;  %v10375_v17 = vld [vmem:[%s14824_s1 + $0x984] ss:$8 sps:$4 sm:$0xff]  }
 0x115   :  { %5468 = vmatpush1.bf16.msra.mxu1 %v10307_v18  ;;  %v10373_v18 = vld [vmem:[%s14824_s1 + $0x980] ss:$8 sps:$4 sm:$0xff]  }
 0x116   :  { %5469 = vmatprep.subr.bf16.mxu1 %v10315_v19  ;;  %v10381_v19 = vld [vmem:[%s14824_s1 + $0xa74] ss:$8 sps:$4 sm:$0xff]  }
 0x117   :  { %5419 = vmatpush1.bf16.msra.mxu0 %v10310_v21  ;;  %v10376_v21 = vld [vmem:[%s14825_s0 + $0x40] ss:$188 sps:$4 sm:$0xff]  }
 0x118   :  { %5420 = vmatprep.subr.bf16.mxu0 %v10318_v22  ;;  %v10387_v22 = vld [vmem:[%s14824_s1 + $0xb74] ss:$8 sps:$4 sm:$0xff]  }
 0x119   :  { %5470 = vmatpush1.bf16.msra.mxu1 %v10313_v26  ;;  %v10382_v26 = vld [vmem:[%s14825_s0 + $0x48] ss:$188 sps:$4 sm:$0xff]  }
 0x11a   :  { %5471 = vmatprep.subr.bf16.mxu1 %v10321_v27  ;;  %v8516_v27 = vcombine.high %v101_v20, %v101_v20 }
 0x11b   :  { %5421 = vmatpush1.bf16.msra.mxu0 %v10316_v31  ;;  %v8518_v31 = vcombine.high %v102_v23, %v102_v23 }
 0x11c   :  { %5422 = vmatprep.subr.bf16.mxu0 %v10324_v33  ;;  %v10393_v33 = vld [vmem:[%s14824_s1 + $0xb64] ss:$8 sps:$4 sm:$0xff]  }
 0x11d   :  { %5472 = vmatpush1.bf16.msra.mxu1 %v10319_v37  ;;  %v10388_v37 = vld [vmem:[%s14824_s1 + $0xa60] ss:$8 sps:$4 sm:$0xff]  }
 0x11e   :  { %5473 = vmatprep.subr.bf16.mxu1 %v10327_v40 }
 0x11f   :  { %5423 = vmatpush1.bf16.msra.mxu0 %v10322_v42  ;;  %v10398_v42 = vld [vmem:[%s14824_s1 + $0xa54] ss:$8 sps:$4 sm:$0xff]  }
 0x120   :  { %5424 = vmatprep.subr.bf16.mxu0 %v10330_v44 }
 0x121   :  { %5474 = vmatpush1.bf16.msra.mxu1 %v10325_v45 }
 0x122   :  { %5475 = vmatprep.subr.bf16.mxu1 %v10333_v48  ;;  %v8515_v48 = vcombine.low %v101_v20, %v101_v20  ;;  %v10419_v20 = vld [vmem:[%s14824_s1 + $0xb20] ss:$8 sps:$4 sm:$0xff]  }
 0x123   :  { %5425 = vmatpush2.bf16.msra.mxu0 %v10328_v49  ;;  %v10396_v49 = vld [vmem:[%s14824_s1 + $0xa50] ss:$8 sps:$4 sm:$0xff]  }
 0x124   :  { %5426 = vmatprep.subr.bf16.mxu0 %v10336_v50 }
 0x125   :  { %5476 = vmatpush2.bf16.msra.mxu1 %v10331_v51 }
 0x126   :  { %5477 = vmatprep.subr.bf16.mxu1 %v10339_v52  ;;  %v10484_v52 = vld [vmem:[%s14825_s0 + $0x54] ss:$188 sps:$4 sm:$0xff]  }
 0x127   :  { %5427 = vmatpush2.bf16.msra.mxu0 %v10334_v53 }
 0x128   :  { %5428 = vmatprep.subr.bf16.mxu0 %v10342_v54 }
 0x129   :  { %5478 = vmatpush2.bf16.msra.mxu1 %v10337_v55  ;;  %v8517_v55 = vcombine.low %v102_v23, %v102_v23  ;;  %v10427_v23 = vld [vmem:[%s14824_s1 + $0xb14] ss:$8 sps:$4 sm:$0xff]  }
 0x12a   :  { %5479 = vmatprep.subr.bf16.mxu1 %v10345_v56  ;;  %v10401_v56 = vld [vmem:[%s14824_s1 + $0xb50] ss:$8 sps:$4 sm:$0xff]  }
 0x12b   :  { %5429 = vmatpush2.bf16.msra.mxu0 %v10340_v57 }
 0x12c   :  { %5430 = vmatprep.subr.bf16.mxu0 %v10348_v59  ;;  %v10404_v59 = vld [vmem:[%s14824_s1 + $0xa40] ss:$8 sps:$4 sm:$0xff]  }
 0x12d   :  { %5480 = vmatpush2.bf16.msra.mxu1 %v10343_v60  ;;  %v10490_v60 = vld [vmem:[%s14825_s0 + $0x5c] ss:$188 sps:$4 sm:$0xff]  }
 0x12e   :  { %5481 = vmatprep.subr.bf16.mxu1 %v10351_v61 }
 0x12f   :  { %5431 = vmatpush2.bf16.msra.mxu0 %v10346_v62 }
 0x130   :  { %5432 = vmatprep.subr.bf16.mxu0 %v10354_v63  ;;  %v10409_v63 = vld [vmem:[%s14824_s1 + $0xb44] ss:$8 sps:$4 sm:$0xff]  }
 0x131   :  { %5482 = vmatpush2.bf16.msra.mxu1 %v10349_v0 }
 0x132   :  { %5483 = vmatprep.subr.bf16.mxu1 %v10357_v2  ;;  %v10407_v2 = vld [vmem:[%s14824_s1 + $0xb40] ss:$8 sps:$4 sm:$0xff]  }
 0x133   :  { %5433 = vmatpush2.bf16.msra.mxu0 %v10352_v3 }
 0x134   :  { %5434 = vmatprep.subr.bf16.mxu0 %v10360_v4 }
 0x135   :  { %5484 = vmatpush2.bf16.msra.mxu1 %v10355_v5  ;;  %v10412_v5 = vld [vmem:[%s14824_s1 + $0xa34] ss:$8 sps:$4 sm:$0xff]  }
 0x136   :  { %5485 = vmatprep.subr.bf16.mxu1 %v10363_v6 }
 0x137   :  { %5435 = vmatpush2.bf16.msra.mxu0 %v10358_v7 }
 0x138   :  { %5436 = vmatprep.subr.bf16.mxu0 %v10366_v9 }
 0x139   :  { %5486 = vmatpush2.bf16.msra.mxu1 %v10361_v10  ;;  %v10415_v10 = vld [vmem:[%s14824_s1 + $0xb34] ss:$8 sps:$4 sm:$0xff]  }
 0x13a   :  { %5487 = vmatprep.subr.bf16.mxu1 %v10369_v11 }
 0x13b   :  { %5437 = vmatpush2.bf16.msra.mxu0 %v10364_v12 }
 0x13c   :  { %5438 = vmatprep.subr.bf16.mxu0 %v10372_v13  ;;  %v10418_v13 = vld [vmem:[%s14824_s1 + $0xa24] ss:$8 sps:$4 sm:$0xff]  }
 0x13d   :  { %5488 = vmatpush2.bf16.msra.mxu1 %v10367_v14 }
 0x13e   :  { %5489 = vmatprep.subr.bf16.mxu1 %v10375_v17  ;;  %v10416_v17 = vld [vmem:[%s14824_s1 + $0xa20] ss:$8 sps:$4 sm:$0xff]  }
 0x13f   :  { %5439 = vmatpush2.bf16.msra.mxu0 %v10370_v15 }
 0x140   :  { %5510 = vmatprep.subr.bf16.mxu0 %v10381_v19 }
 0x141   :  { %5490 = vmatpush2.bf16.msra.mxu1 %v10373_v18  ;;  %v10421_v18 = vld [vmem:[%s14824_s1 + $0xb24] ss:$8 sps:$4 sm:$0xff]  }
 0x142   :  { %v5136_v32 = vpop.f32.mrf.mxu0  ;;  %5441 = vmatmul.mubr.bf16.vlgmr.msra.gmra.mxu0 %v10376_v21  ;;  %5561 = vmatprep.subr.bf16.mxu1 %v10387_v22  ;;  %v10424_v21 = vld [vmem:[%s14824_s1 + $0xa14] ss:$8 sps:$4 sm:$0xff]   ;;  %v10422_v22 = vld [vmem:[%s14824_s1 + $0xa10] ss:$8 sps:$4 sm:$0xff]  }
 0x143   :  { %v5137_v34 = vadd.f32 %v5136_v32, %v12249_v58  ;;  %5511 = vmatpush1.bf16.msra.mxu0 %v10379_v24  ;;  %5450 = vmatprep.mubr.bf16.mxu0 %v8516_v27  ;;  %v10391_v58 = vld [vmem:[%s14824_s1 + $0xb60] ss:$8 sps:$4 sm:$0xff]   ;;  %v10425_v24 = vld [vmem:[%s14824_s1 + $0xb10] ss:$8 sps:$4 sm:$0xff]  }
 0x144   :  { %v5138_v38 = vpop.f32.mrf.mxu0  ;;  %v5187_v40 = vpop.f32.mrf.mxu1  ;;  %5492 = vmatmul.mubr.bf16.vlgmr.msra.gmra.mxu1 %v10382_v26  ;;  %5512 = vmatprep.subr.bf16.mxu0 %v10390_v29  ;;  %v10430_v26 = vld [vmem:[%s14824_s1 + $0xa04] ss:$8 sps:$4 sm:$0xff]   ;;  %v10428_v27 = vld [vmem:[%s14824_s1 + $0xa00] ss:$8 sps:$4 sm:$0xff]   ;;  %v10434_v32 = vld [vmem:[%s14824_s1 + $0xaf0] ss:$8 sps:$4 sm:$0xff]  }
 0x145   :  { %v5139_v43 = vadd.f32 %v5138_v38, %v12258_v1  ;;  %v12478_v44 = vadd.f32 %v5187_v40, %v5137_v34  ;;  %5562 = vmatpush1.bf16.msra.mxu1 %v10385_v30  ;;  %5501 = vmatprep.mubr.bf16.mxu1 %v8518_v31  ;;  %v10403_v1 = vld [vmem:[%s14824_s1 + $0xb54] ss:$8 sps:$4 sm:$0xff]   ;;  %v10433_v29 = vld [vmem:[%s14824_s1 + $0xb04] ss:$8 sps:$4 sm:$0xff]   ;;  %v10431_v30 = vld [vmem:[%s14824_s1 + $0xb00] ss:$8 sps:$4 sm:$0xff]  }
 0x146   :  { %v5140_v45 = vpop.f32.mrf.mxu0  ;;  %v5189_v46 = vpop.f32.mrf.mxu1  ;;  %5563 = vmatprep.subr.bf16.mxu1 %v10393_v33  ;;  %v10436_v31 = vld [vmem:[%s14824_s1 + $0xaf4] ss:$8 sps:$4 sm:$0xff]   ;;  %v10437_v34 = vld [vmem:[%s14824_s1 + $0xbf0] ss:$8 sps:$4 sm:$0xff]   ;;  %v10440_v38 = vld [vmem:[%s14824_s1 + $0xae0] ss:$8 sps:$4 sm:$0xff]  }
 0x147   :  { %v5141_v50 = vadd.f32 %v5140_v45, %v12272_v8  ;;  %v12490_v51 = vadd.f32 %v5189_v46, %v5139_v43  ;;  %5513 = vmatpush1.bf16.msra.mxu0 %v10388_v37  ;;  %v10406_v8 = vld [vmem:[%s14824_s1 + $0xa44] ss:$8 sps:$4 sm:$0xff]   ;;  %v10439_v33 = vld [vmem:[%s14824_s1 + $0xbf4] ss:$8 sps:$4 sm:$0xff]   ;;  %v10449_v46 = vld [vmem:[%s14824_s1 + $0xbd0] ss:$8 sps:$4 sm:$0xff]  }
 0x148   :  { %v12495_v53 = vpop.f32.mrf.mxu0  ;;  %v5191_v54 = vpop.f32.mrf.mxu1  ;;  %5514 = vmatprep.subr.bf16.mxu0 %v10398_v42  ;;  %v10442_v37 = vld [vmem:[%s14824_s1 + $0xae4] ss:$8 sps:$4 sm:$0xff]   ;;  %v10443_v42 = vld [vmem:[%s14824_s1 + $0xbe0] ss:$8 sps:$4 sm:$0xff]   ;;  %v10448_v43 = vld [vmem:[%s14824_s1 + $0xad4] ss:$8 sps:$4 sm:$0xff]  }
 0x149   :  { %v12503_v57 = vadd.f32 %v5191_v54, %v5141_v50  ;;  %5564 = vmatpush1.bf16.msra.mxu1 %v10391_v58  ;;  %v10445_v40 = vld [vmem:[%s14824_s1 + $0xbe4] ss:$8 sps:$4 sm:$0xff]   ;;  %v10446_v58 = vld [vmem:[%s14824_s1 + $0xad0] ss:$8 sps:$4 sm:$0xff]   ;;  %v10451_v45 = vld [vmem:[%s14824_s1 + $0xbd4] ss:$8 sps:$4 sm:$0xff]  }
 0x14a   :  { %v5146_v61 = vpop.f32.mrf.mxu0  ;;  %v12511_v62 = vpop.f32.mrf.mxu1  ;;  %5451 = vmatmul.mubr.bf16.gmra.mxu0 %v8515_v48  ;;  %5565 = vmatprep.subr.bf16.mxu1 %v10403_v1  ;;  %v10454_v48 = vld [vmem:[%s14824_s1 + $0xac4] ss:$8 sps:$4 sm:$0xff]   ;;  %v10455_v50 = vld [vmem:[%s14824_s1 + $0xbc0] ss:$8 sps:$4 sm:$0xff]   ;;  %v10458_v54 = vld [vmem:[%s14824_s1 + $0xab0] ss:$8 sps:$4 sm:$0xff]  }
 0x14b   :  { %v5147_v0 = vadd.f32 %v5146_v61, %v12328_v36  ;;  %5515 = vmatpush1.bf16.msra.mxu0 %v10396_v49  ;;  %5542 = vmatprep.mubr.bf16.mxu0 %v10484_v52  ;;  %v10410_v36 = vld [vmem:[%s14824_s1 + $0xa30] ss:$8 sps:$4 sm:$0xff]   ;;  %v10452_v49 = vld [vmem:[%s14824_s1 + $0xac0] ss:$8 sps:$4 sm:$0xff]   ;;  %v10457_v1 = vld [vmem:[%s14824_s1 + $0xbc4] ss:$8 sps:$4 sm:$0xff]  }
 0x14c   :  { %v5148_v3 = vpop.f32.mrf.mxu0  ;;  %v5197_v4 = vpop.f32.mrf.mxu1  ;;  %5502 = vmatmul.mubr.bf16.gmra.mxu1 %v8517_v55  ;;  %5516 = vmatprep.subr.bf16.mxu0 %v10406_v8  ;;  %v10460_v52 = vld [vmem:[%s14824_s1 + $0xab4] ss:$8 sps:$4 sm:$0xff]   ;;  %v10466_v8 = vld [vmem:[%s14824_s1 + $0xaa4] ss:$8 sps:$4 sm:$0xff]   ;;  %v10467_v61 = vld [vmem:[%s14824_s1 + $0xba0] ss:$8 sps:$4 sm:$0xff]  }
 0x14d   :  { %v5149_v6 = vadd.f32 %v5148_v3, %v12336_v41  ;;  %v12524_v7 = vadd.f32 %v5197_v4, %v5147_v0  ;;  %5566 = vmatpush1.bf16.msra.mxu1 %v10401_v56  ;;  %5593 = vmatprep.mubr.bf16.mxu1 %v10490_v60  ;;  %v10413_v41 = vld [vmem:[%s14824_s1 + $0xb30] ss:$8 sps:$4 sm:$0xff]   ;;  %v10463_v55 = vld [vmem:[%s14824_s1 + $0xbb4] ss:$8 sps:$4 sm:$0xff]   ;;  %v10469_v60 = vld [vmem:[%s14824_s1 + $0xba4] ss:$8 sps:$4 sm:$0xff]  }
 0x14e   :  { %v5199_v9 = vpop.f32.mrf.mxu1  ;;  %5567 = vmatprep.subr.bf16.mxu1 %v10409_v63  ;;  %v5150_v11 = vpop.f32.mrf.mxu0  ;;  %v10461_v56 = vld [vmem:[%s14824_s1 + $0xbb0] ss:$8 sps:$4 sm:$0xff]   ;;  %v10472_v63 = vld [vmem:[%s14824_s1 + $0xa94] ss:$8 sps:$4 sm:$0xff]   ;;  %v10478_v4 = vld [vmem:[%s14824_s1 + $0xa84] ss:$8 sps:$4 sm:$0xff]  }
 0x14f   :  { %v12532_v12 = vadd.f32 %v5199_v9, %v5149_v6  ;;  %5517 = vmatpush1.bf16.msra.mxu0 %v10404_v59  ;;  %v10464_v59 = vld [vmem:[%s14824_s1 + $0xaa0] ss:$8 sps:$4 sm:$0xff]   ;;  %v10470_v0 = vld [vmem:[%s14824_s1 + $0xa90] ss:$8 sps:$4 sm:$0xff]   ;;  %v10481_v6 = vld [vmem:[%s14824_s1 + $0xb84] ss:$8 sps:$4 sm:$0xff]  }
 0x150   :  { %5518 = vmatprep.subr.bf16.mxu0 %v10412_v5  ;;  %v5151_v14 = vpop.f32.mrf.mxu0  ;;  %v5201_v15 = vpop.f32.mrf.mxu1  ;;  %v10473_v3 = vld [vmem:[%s14824_s1 + $0xb90] ss:$8 sps:$4 sm:$0xff]   ;;  %v10476_v5 = vld [vmem:[%s14824_s1 + $0xa80] ss:$8 sps:$4 sm:$0xff]   ;;  %v10487_v9 = vld [vmem:[%s14824_s1 + $0xc74] ss:$8 sps:$4 sm:$0xff]  }
 0x151   :  { %5568 = vmatpush1.bf16.msra.mxu1 %v10407_v2  ;;  %v10475_v2 = vld [vmem:[%s14824_s1 + $0xb94] ss:$8 sps:$4 sm:$0xff]   ;;  %v103_v11 = vld [vmem:[%s14825_s0 + $0x1c8] sm:$0x33]  ;;  %v10485_v15 = vld [vmem:[%s14824_s1 + $0xc70] ss:$8 sps:$4 sm:$0xff]  }
 0x152   :  { %5569 = vmatprep.subr.bf16.mxu1 %v10415_v10  ;;  %v5202_v19 = vpop.f32.mrf.mxu1  ;;  %v10482_v10 = vld [vmem:[%s14825_s0 + $0x50] ss:$188 sps:$4 sm:$0xff]  }
 0x153   :  { %5519 = vmatpush1.bf16.msra.mxu0 %v10410_v36  ;;  %v10479_v36 = vld [vmem:[%s14824_s1 + $0xb80] ss:$8 sps:$4 sm:$0xff]   ;;  %v12686_v14 = vld [vmem:[%s14825_s0 + $0x1d0] sm:$0x33] }
 0x154   :  { %5520 = vmatprep.subr.bf16.mxu0 %v10418_v13  ;;  %v10493_v13 = vld [vmem:[%s14824_s1 + $0xd74] ss:$8 sps:$4 sm:$0xff]   ;;  %v10491_v19 = vld [vmem:[%s14824_s1 + $0xd70] ss:$8 sps:$4 sm:$0xff]  }
 0x155   :  { %5570 = vmatpush1.bf16.msra.mxu1 %v10413_v41  ;;  %v5041_v41 = vadd.f32 %v12295_v16, %v12233_v47  ;;  %v10488_v47 = vld [vmem:[%s14825_s0 + $0x58] ss:$188 sps:$4 sm:$0xff]   ;;  %v8520_v16 = vcombine.high %v103_v11, %v103_v11 }
 0x156   :  { %5571 = vmatprep.subr.bf16.mxu1 %v10421_v18 }
 0x157   :  { %5521 = vmatpush1.bf16.msra.mxu0 %v10416_v17  ;;  %v10496_v17 = vld [vmem:[%s14824_s1 + $0xc64] ss:$8 sps:$4 sm:$0xff]   ;;  %v5092_v18 = vadd.f32 %v12313_v25, %v5041_v41  ;;  %v10494_v25 = vld [vmem:[%s14824_s1 + $0xc60] ss:$8 sps:$4 sm:$0xff]  }
 0x158   :  { %5522 = vmatprep.subr.bf16.mxu0 %v10424_v21 }
 0x159   :  { %5572 = vmatpush1.bf16.msra.mxu1 %v10419_v20  ;;  %v8522_v20 = vcombine.high %v12686_v14, %v12686_v14 }
 0x15a   :  { %5573 = vmatprep.subr.bf16.mxu1 %v10427_v23  ;;  %v5143_v23 = vadd.f32 %v12495_v53, %v5092_v18  ;;  %v10534_v18 = vld [vmem:[%s14824_s1 + $0xc00] ss:$8 sps:$4 sm:$0xff]  }
 0x15b   :  { %5523 = vmatpush1.bf16.msra.mxu0 %v10422_v22  ;;  %v10499_v22 = vld [vmem:[%s14824_s1 + $0xd64] ss:$8 sps:$4 sm:$0xff]  }
 0x15c   :  { %5524 = vmatprep.subr.bf16.mxu0 %v10430_v26 }
 0x15d   :  { %5574 = vmatpush1.bf16.msra.mxu1 %v10425_v24 }
 0x15e   :  { %5575 = vmatprep.subr.bf16.mxu1 %v10433_v29  ;;  %v10504_v29 = vld [vmem:[%s14824_s1 + $0xc54] ss:$8 sps:$4 sm:$0xff]  }
 0x15f   :  { %5525 = vmatpush1.bf16.msra.mxu0 %v10428_v27 }
 0x160   :  { %5526 = vmatprep.subr.bf16.mxu0 %v10436_v31 }
 0x161   :  { %5576 = vmatpush1.bf16.msra.mxu1 %v10431_v30 }
 0x162   :  { %5577 = vmatprep.subr.bf16.mxu1 %v10439_v33  ;;  %v8519_v33 = vcombine.low %v103_v11, %v103_v11  ;;  %v10527_v11 = vld [vmem:[%s14824_s1 + $0xd24] ss:$8 sps:$4 sm:$0xff]  }
 0x163   :  { %5527 = vmatpush2.bf16.msra.mxu0 %v10434_v32 }
 0x164   :  { %5528 = vmatprep.subr.bf16.mxu0 %v10442_v37  ;;  %v5194_v37 = vadd.f32 %v12511_v62, %v5143_v23  ;;  %v10545_v23 = vld [vmem:[%s14824_s1 + $0xdf4] ss:$8 sps:$4 sm:$0xff]  }
 0x165   :  { %5578 = vmatpush2.bf16.msra.mxu1 %v10437_v34  ;;  %v10502_v34 = vld [vmem:[%s14824_s1 + $0xc50] ss:$8 sps:$4 sm:$0xff]  }
 0x166   :  { %5579 = vmatprep.subr.bf16.mxu1 %v10445_v40 }
 0x167   :  { %5529 = vmatpush2.bf16.msra.mxu0 %v10440_v38 }
 0x168   :  { %5530 = vmatprep.subr.bf16.mxu0 %v10448_v43 }
 0x169   :  { %5580 = vmatpush2.bf16.msra.mxu1 %v10443_v42  ;;  %v10590_v42 = vld [vmem:[%s14825_s0 + $0x64] ss:$188 sps:$4 sm:$0xff]  }
 0x16a   :  { %5581 = vmatprep.subr.bf16.mxu1 %v10451_v45  ;;  %v8521_v45 = vcombine.low %v12686_v14, %v12686_v14  ;;  %v10530_v14 = vld [vmem:[%s14824_s1 + $0xc14] ss:$8 sps:$4 sm:$0xff]  }
 0x16b   :  { %5531 = vmatpush2.bf16.msra.mxu0 %v10446_v58 }
 0x16c   :  { %5532 = vmatprep.subr.bf16.mxu0 %v10454_v48 }
 0x16d   :  { %5582 = vmatpush2.bf16.msra.mxu1 %v10449_v46  ;;  %v10507_v46 = vld [vmem:[%s14824_s1 + $0xd50] ss:$8 sps:$4 sm:$0xff]  }
 0x16e   :  { %5583 = vmatprep.subr.bf16.mxu1 %v10457_v1  ;;  %v10596_v1 = vld [vmem:[%s14825_s0 + $0x6c] ss:$188 sps:$4 sm:$0xff]  }
 0x16f   :  { %5533 = vmatpush2.bf16.msra.mxu0 %v10452_v49  ;;  %v10510_v49 = vld [vmem:[%s14824_s1 + $0xc40] ss:$8 sps:$4 sm:$0xff]  }
 0x170   :  { %5534 = vmatprep.subr.bf16.mxu0 %v10460_v52 }
 0x171   :  { %5584 = vmatpush2.bf16.msra.mxu1 %v10455_v50 }
 0x172   :  { %5585 = vmatprep.subr.bf16.mxu1 %v10463_v55 }
 0x173   :  { %5535 = vmatpush2.bf16.msra.mxu0 %v10458_v54  ;;  %v10515_v54 = vld [vmem:[%s14824_s1 + $0xd44] ss:$8 sps:$4 sm:$0xff]  }
 0x174   :  { %5536 = vmatprep.subr.bf16.mxu0 %v10466_v8  ;;  %v10513_v8 = vld [vmem:[%s14824_s1 + $0xd40] ss:$8 sps:$4 sm:$0xff]  }
 0x175   :  { %5586 = vmatpush2.bf16.msra.mxu1 %v10461_v56 }
 0x176   :  { %5587 = vmatprep.subr.bf16.mxu1 %v10469_v60 }
 0x177   :  { %5537 = vmatpush2.bf16.msra.mxu0 %v10464_v59 }
 0x178   :  { %5538 = vmatprep.subr.bf16.mxu0 %v10472_v63 }
 0x179   :  { %5588 = vmatpush2.bf16.msra.mxu1 %v10467_v61  ;;  %v10518_v61 = vld [vmem:[%s14824_s1 + $0xc34] ss:$8 sps:$4 sm:$0xff]  }
 0x17a   :  { %5589 = vmatprep.subr.bf16.mxu1 %v10475_v2 }
 0x17b   :  { %5539 = vmatpush2.bf16.msra.mxu0 %v10470_v0 }
 0x17c   :  { %5540 = vmatprep.subr.bf16.mxu0 %v10478_v4 }
 0x17d   :  { %5590 = vmatpush2.bf16.msra.mxu1 %v10473_v3  ;;  %v10521_v3 = vld [vmem:[%s14824_s1 + $0xd34] ss:$8 sps:$4 sm:$0xff]  }
 0x17e   :  { %5591 = vmatprep.subr.bf16.mxu1 %v10481_v6  ;;  %v10524_v6 = vld [vmem:[%s14824_s1 + $0xc24] ss:$8 sps:$4 sm:$0xff]  }
 0x17f   :  { %5541 = vmatpush2.bf16.msra.mxu0 %v10476_v5 }
 0x180   :  { %5612 = vmatprep.subr.bf16.mxu0 %v10487_v9 }
 0x181   :  { %5592 = vmatpush2.bf16.msra.mxu1 %v10479_v36 }
 0x182   :  { %v5238_v21 = vpop.f32.mrf.mxu0  ;;  %5543 = vmatmul.mubr.bf16.vlgmr.msra.gmra.mxu0 %v10482_v10  ;;  %5663 = vmatprep.subr.bf16.mxu1 %v10493_v13  ;;  %v10522_v10 = vld [vmem:[%s14824_s1 + $0xc20] ss:$8 sps:$4 sm:$0xff]  }
 0x183   :  { %v5239_v24 = vadd.f32 %v5238_v21, %v12478_v44  ;;  %5613 = vmatpush1.bf16.msra.mxu0 %v10485_v15  ;;  %5552 = vmatprep.mubr.bf16.mxu0 %v8520_v16  ;;  %v10497_v44 = vld [vmem:[%s14824_s1 + $0xd60] ss:$8 sps:$4 sm:$0xff]   ;;  %v10528_v15 = vld [vmem:[%s14824_s1 + $0xc10] ss:$8 sps:$4 sm:$0xff]   ;;  %v10542_v21 = vld [vmem:[%s14824_s1 + $0xcf4] ss:$8 sps:$4 sm:$0xff]  }
 0x184   :  { %v5240_v26 = vpop.f32.mrf.mxu0  ;;  %v5289_v27 = vpop.f32.mrf.mxu1  ;;  %5594 = vmatmul.mubr.bf16.vlgmr.msra.gmra.mxu1 %v10488_v47  ;;  %5614 = vmatprep.subr.bf16.mxu0 %v10496_v17  ;;  %v10525_v13 = vld [vmem:[%s14824_s1 + $0xd20] ss:$8 sps:$4 sm:$0xff]   ;;  %v10533_v47 = vld [vmem:[%s14824_s1 + $0xd14] ss:$8 sps:$4 sm:$0xff]   ;;  %v10531_v16 = vld [vmem:[%s14824_s1 + $0xd10] ss:$8 sps:$4 sm:$0xff]  }
 0x185   :  { %v5241_v30 = vadd.f32 %v5240_v26, %v12490_v51  ;;  %v12715_v31 = vadd.f32 %v5289_v27, %v5239_v24  ;;  %5664 = vmatpush1.bf16.msra.mxu1 %v10491_v19  ;;  %5603 = vmatprep.mubr.bf16.mxu1 %v8522_v20  ;;  %v10509_v51 = vld [vmem:[%s14824_s1 + $0xd54] ss:$8 sps:$4 sm:$0xff]   ;;  %v10536_v17 = vld [vmem:[%s14824_s1 + $0xc04] ss:$8 sps:$4 sm:$0xff]   ;;  %v10537_v20 = vld [vmem:[%s14824_s1 + $0xd00] ss:$8 sps:$4 sm:$0xff]  }
 0x186   :  { %v5242_v53 = vpop.f32.mrf.mxu0  ;;  %v5291_v32 = vpop.f32.mrf.mxu1  ;;  %5665 = vmatprep.subr.bf16.mxu1 %v10499_v22  ;;  %v10539_v19 = vld [vmem:[%s14824_s1 + $0xd04] ss:$8 sps:$4 sm:$0xff]   ;;  %v10540_v22 = vld [vmem:[%s14824_s1 + $0xcf0] ss:$8 sps:$4 sm:$0xff]   ;;  %v10546_v26 = vld [vmem:[%s14824_s1 + $0xce0] ss:$8 sps:$4 sm:$0xff]  }
 0x187   :  { %v5243_v38 = vadd.f32 %v5242_v53, %v12503_v57  ;;  %v12728_v40 = vadd.f32 %v5291_v32, %v5241_v30  ;;  %5615 = vmatpush1.bf16.msra.mxu0 %v10494_v25  ;;  %v10512_v57 = vld [vmem:[%s14824_s1 + $0xc44] ss:$8 sps:$4 sm:$0xff]   ;;  %v10543_v24 = vld [vmem:[%s14824_s1 + $0xdf0] ss:$8 sps:$4 sm:$0xff]   ;;  %v10554_v30 = vld [vmem:[%s14824_s1 + $0xcd4] ss:$8 sps:$4 sm:$0xff]  }
 0x188   :  { %v5244_v43 = vpop.f32.mrf.mxu0  ;;  %v5293_v58 = vpop.f32.mrf.mxu1  ;;  %5616 = vmatprep.subr.bf16.mxu0 %v10504_v29  ;;  %v10548_v25 = vld [vmem:[%s14824_s1 + $0xce4] ss:$8 sps:$4 sm:$0xff]   ;;  %v10549_v29 = vld [vmem:[%s14824_s1 + $0xde0] ss:$8 sps:$4 sm:$0xff]   ;;  %v10557_v53 = vld [vmem:[%s14824_s1 + $0xdd4] ss:$8 sps:$4 sm:$0xff]  }
 0x189   :  { %v5245_v62 = vadd.f32 %v5244_v43, %v5194_v37  ;;  %v12741_v48 = vadd.f32 %v5293_v58, %v5243_v38  ;;  %5666 = vmatpush1.bf16.msra.mxu1 %v10497_v44  ;;  %v10551_v27 = vld [vmem:[%s14824_s1 + $0xde4] ss:$8 sps:$4 sm:$0xff]   ;;  %v10552_v44 = vld [vmem:[%s14824_s1 + $0xcd0] ss:$8 sps:$4 sm:$0xff]   ;;  %v10561_v37 = vld [vmem:[%s14824_s1 + $0xdc0] ss:$8 sps:$4 sm:$0xff]  }
 0x18a   :  { %v5248_v50 = vpop.f32.mrf.mxu0  ;;  %v5295_v52 = vpop.f32.mrf.mxu1  ;;  %5553 = vmatmul.mubr.bf16.gmra.mxu0 %v8519_v33  ;;  %5667 = vmatprep.subr.bf16.mxu1 %v10509_v51  ;;  %v10555_v32 = vld [vmem:[%s14824_s1 + $0xdd0] ss:$8 sps:$4 sm:$0xff]   ;;  %v10560_v33 = vld [vmem:[%s14824_s1 + $0xcc4] ss:$8 sps:$4 sm:$0xff]   ;;  %v10566_v38 = vld [vmem:[%s14824_s1 + $0xcb4] ss:$8 sps:$4 sm:$0xff]  }
 0x18b   :  { %v5249_v55 = vadd.f32 %v5248_v50, %v12524_v7  ;;  %v12753_v56 = vadd.f32 %v5295_v52, %v5245_v62  ;;  %5617 = vmatpush1.bf16.msra.mxu0 %v10502_v34  ;;  %5644 = vmatprep.mubr.bf16.mxu0 %v10590_v42  ;;  %v10516_v7 = vld [vmem:[%s14824_s1 + $0xc30] ss:$8 sps:$4 sm:$0xff]   ;;  %v10558_v34 = vld [vmem:[%s14824_s1 + $0xcc0] ss:$8 sps:$4 sm:$0xff]   ;;  %v10563_v51 = vld [vmem:[%s14824_s1 + $0xdc4] ss:$8 sps:$4 sm:$0xff]  }
 0x18c   :  { %v5250_v59 = vpop.f32.mrf.mxu0  ;;  %v5299_v60 = vpop.f32.mrf.mxu1  ;;  %5604 = vmatmul.mubr.bf16.gmra.mxu1 %v8521_v45  ;;  %5618 = vmatprep.subr.bf16.mxu0 %v10512_v57  ;;  %v10564_v42 = vld [vmem:[%s14824_s1 + $0xcb0] ss:$8 sps:$4 sm:$0xff]   ;;  %v10569_v43 = vld [vmem:[%s14824_s1 + $0xdb4] ss:$8 sps:$4 sm:$0xff]   ;;  %v10572_v45 = vld [vmem:[%s14824_s1 + $0xca4] ss:$8 sps:$4 sm:$0xff]  }
 0x18d   :  { %v5251_v63 = vadd.f32 %v5250_v59, %v12532_v12  ;;  %v12762_v0 = vadd.f32 %v5299_v60, %v5249_v55  ;;  %5668 = vmatpush1.bf16.msra.mxu1 %v10507_v46  ;;  %5695 = vmatprep.mubr.bf16.mxu1 %v10596_v1  ;;  %v10519_v12 = vld [vmem:[%s14824_s1 + $0xd30] ss:$8 sps:$4 sm:$0xff]   ;;  %v10570_v46 = vld [vmem:[%s14824_s1 + $0xca0] ss:$8 sps:$4 sm:$0xff]   ;;  %v10575_v57 = vld [vmem:[%s14824_s1 + $0xda4] ss:$8 sps:$4 sm:$0xff]  }
 0x18e   :  { %v5301_v2 = vpop.f32.mrf.mxu1  ;;  %5669 = vmatprep.subr.bf16.mxu1 %v10515_v54  ;;  %v5252_v4 = vpop.f32.mrf.mxu0  ;;  %v10567_v58 = vld [vmem:[%s14824_s1 + $0xdb0] ss:$8 sps:$4 sm:$0xff]   ;;  %v10573_v62 = vld [vmem:[%s14824_s1 + $0xda0] ss:$8 sps:$4 sm:$0xff]   ;;  %v10581_v50 = vld [vmem:[%s14824_s1 + $0xd94] ss:$8 sps:$4 sm:$0xff]  }
 0x18f   :  { %v12770_v5 = vadd.f32 %v5301_v2, %v5251_v63  ;;  %5619 = vmatpush1.bf16.msra.mxu0 %v10510_v49  ;;  %v10578_v49 = vld [vmem:[%s14824_s1 + $0xc94] ss:$8 sps:$4 sm:$0xff]   ;;  %v10576_v1 = vld [vmem:[%s14824_s1 + $0xc90] ss:$8 sps:$4 sm:$0xff]   ;;  %v10584_v54 = vld [vmem:[%s14824_s1 + $0xc84] ss:$8 sps:$4 sm:$0xff]  }
 0x190   :  { %5620 = vmatprep.subr.bf16.mxu0 %v10518_v61  ;;  %v5253_v36 = vpop.f32.mrf.mxu0  ;;  %v5303_v9 = vpop.f32.mrf.mxu1  ;;  %v10579_v52 = vld [vmem:[%s14824_s1 + $0xd90] ss:$8 sps:$4 sm:$0xff]   ;;  %v10582_v55 = vld [vmem:[%s14824_s1 + $0xc80] ss:$8 sps:$4 sm:$0xff]   ;;  %v10593_v60 = vld [vmem:[%s14824_s1 + $0xe74] ss:$8 sps:$4 sm:$0xff]  }
 0x191   :  { %5670 = vmatpush1.bf16.msra.mxu1 %v10513_v8  ;;  %v10587_v8 = vld [vmem:[%s14824_s1 + $0xd84] ss:$8 sps:$4 sm:$0xff]   ;;  %v10585_v59 = vld [vmem:[%s14824_s1 + $0xd80] ss:$8 sps:$4 sm:$0xff]   ;;  %v105_v63 = vld [vmem:[%s14825_s0 + $0x1d8] sm:$0x33] }
 0x192   :  { %5671 = vmatprep.subr.bf16.mxu1 %v10521_v3  ;;  %v5304_v41 = vpop.f32.mrf.mxu1  ;;  %v10588_v61 = vld [vmem:[%s14825_s0 + $0x60] ss:$188 sps:$4 sm:$0xff]   ;;  %v10591_v3 = vld [vmem:[%s14824_s1 + $0xe70] ss:$8 sps:$4 sm:$0xff]   ;;  %v10594_v4 = vld [vmem:[%s14825_s0 + $0x68] ss:$188 sps:$4 sm:$0xff]  }
 0x193   :  { %5621 = vmatpush1.bf16.msra.mxu0 %v10516_v7  ;;  %v10599_v7 = vld [vmem:[%s14824_s1 + $0xf74] ss:$8 sps:$4 sm:$0xff]   ;;  %v106_v2 = vld [vmem:[%s14825_s0 + $0x1e0] sm:$0x33]  ;;  %v10597_v36 = vld [vmem:[%s14824_s1 + $0xf70] ss:$8 sps:$4 sm:$0xff]  }
 0x194   :  { %5622 = vmatprep.subr.bf16.mxu0 %v10524_v6  ;;  %v10602_v6 = vld [vmem:[%s14824_s1 + $0xe64] ss:$8 sps:$4 sm:$0xff]   ;;  %v8526_v9 = vcombine.high %v106_v2, %v106_v2 }
 0x195   :  { %5672 = vmatpush1.bf16.msra.mxu1 %v10519_v12  ;;  %v8524_v12 = vcombine.high %v105_v63, %v105_v63 }
 0x196   :  { %5673 = vmatprep.subr.bf16.mxu1 %v10527_v11  ;;  %v10605_v11 = vld [vmem:[%s14824_s1 + $0xf64] ss:$8 sps:$4 sm:$0xff]  }
 0x197   :  { %5623 = vmatpush1.bf16.msra.mxu0 %v10522_v10 }
 0x198   :  { %5624 = vmatprep.subr.bf16.mxu0 %v10530_v14 }
 0x199   :  { %5674 = vmatpush1.bf16.msra.mxu1 %v10525_v13  ;;  %v10600_v13 = vld [vmem:[%s14824_s1 + $0xe60] ss:$8 sps:$4 sm:$0xff]  }
 0x19a   :  { %5675 = vmatprep.subr.bf16.mxu1 %v10533_v47  ;;  %v10610_v47 = vld [vmem:[%s14824_s1 + $0xe54] ss:$8 sps:$4 sm:$0xff]  }
 0x19b   :  { %5625 = vmatpush1.bf16.msra.mxu0 %v10528_v15 }
 0x19c   :  { %5626 = vmatprep.subr.bf16.mxu0 %v10536_v17 }
 0x19d   :  { %5676 = vmatpush1.bf16.msra.mxu1 %v10531_v16 }
 0x19e   :  { %5677 = vmatprep.subr.bf16.mxu1 %v10539_v19 }
 0x19f   :  { %5627 = vmatpush1.bf16.msra.mxu0 %v10534_v18 }
 0x1a0   :  { %5628 = vmatprep.subr.bf16.mxu0 %v10542_v21  ;;  %v10608_v21 = vld [vmem:[%s14824_s1 + $0xe50] ss:$8 sps:$4 sm:$0xff]  }
 0x1a1   :  { %5678 = vmatpush1.bf16.msra.mxu1 %v10537_v20  ;;  %v8523_v20 = vcombine.low %v105_v63, %v105_v63  ;;  %v10639_v63 = vld [vmem:[%s14824_s1 + $0xf14] ss:$8 sps:$4 sm:$0xff]  }
 0x1a2   :  { %5679 = vmatprep.subr.bf16.mxu1 %v10545_v23 }
 0x1a3   :  { %5629 = vmatpush2.bf16.msra.mxu0 %v10540_v22 }
 0x1a4   :  { %5630 = vmatprep.subr.bf16.mxu0 %v10548_v25 }
 0x1a5   :  { %5680 = vmatpush2.bf16.msra.mxu1 %v10543_v24  ;;  %v10696_v24 = vld [vmem:[%s14825_s0 + $0x74] ss:$188 sps:$4 sm:$0xff]  }
 0x1a6   :  { %5681 = vmatprep.subr.bf16.mxu1 %v10551_v27  ;;  %v8525_v27 = vcombine.low %v106_v2, %v106_v2  ;;  %v10642_v2 = vld [vmem:[%s14824_s1 + $0xe04] ss:$8 sps:$4 sm:$0xff]  }
 0x1a7   :  { %5631 = vmatpush2.bf16.msra.mxu0 %v10546_v26 }
 0x1a8   :  { %5632 = vmatprep.subr.bf16.mxu0 %v10554_v30  ;;  %v10618_v30 = vld [vmem:[%s14824_s1 + $0xe44] ss:$8 sps:$4 sm:$0xff]  }
 0x1a9   :  { %5682 = vmatpush2.bf16.msra.mxu1 %v10549_v29  ;;  %v10613_v29 = vld [vmem:[%s14824_s1 + $0xf50] ss:$8 sps:$4 sm:$0xff]  }
 0x1aa   :  { %5683 = vmatprep.subr.bf16.mxu1 %v10557_v53  ;;  %v10702_v53 = vld [vmem:[%s14825_s0 + $0x7c] ss:$188 sps:$4 sm:$0xff]  }
 0x1ab   :  { %5633 = vmatpush2.bf16.msra.mxu0 %v10552_v44 }
 0x1ac   :  { %5634 = vmatprep.subr.bf16.mxu0 %v10560_v33 }
 0x1ad   :  { %5684 = vmatpush2.bf16.msra.mxu1 %v10555_v32 }
 0x1ae   :  { %5685 = vmatprep.subr.bf16.mxu1 %v10563_v51 }
 0x1af   :  { %5635 = vmatpush2.bf16.msra.mxu0 %v10558_v34  ;;  %v10621_v34 = vld [vmem:[%s14824_s1 + $0xf44] ss:$8 sps:$4 sm:$0xff]  }
 0x1b0   :  { %5636 = vmatprep.subr.bf16.mxu0 %v10566_v38 }
 0x1b1   :  { %5686 = vmatpush2.bf16.msra.mxu1 %v10561_v37 }
 0x1b2   :  { %5687 = vmatprep.subr.bf16.mxu1 %v10569_v43  ;;  %v10624_v43 = vld [vmem:[%s14824_s1 + $0xe34] ss:$8 sps:$4 sm:$0xff]  }
 0x1b3   :  { %5637 = vmatpush2.bf16.msra.mxu0 %v10564_v42 }
 0x1b4   :  { %5638 = vmatprep.subr.bf16.mxu0 %v10572_v45 }
 0x1b5   :  { %5688 = vmatpush2.bf16.msra.mxu1 %v10567_v58 }
 0x1b6   :  { %5689 = vmatprep.subr.bf16.mxu1 %v10575_v57  ;;  %v10627_v57 = vld [vmem:[%s14824_s1 + $0xf34] ss:$8 sps:$4 sm:$0xff]  }
 0x1b7   :  { %5639 = vmatpush2.bf16.msra.mxu0 %v10570_v46 }
 0x1b8   :  { %5640 = vmatprep.subr.bf16.mxu0 %v10578_v49 }
 0x1b9   :  { %5690 = vmatpush2.bf16.msra.mxu1 %v10573_v62 }
 0x1ba   :  { %5691 = vmatprep.subr.bf16.mxu1 %v10581_v50 }
 0x1bb   :  { %5641 = vmatpush2.bf16.msra.mxu0 %v10576_v1  ;;  %v10630_v1 = vld [vmem:[%s14824_s1 + $0xe24] ss:$8 sps:$4 sm:$0xff]  }
 0x1bc   :  { %5642 = vmatprep.subr.bf16.mxu0 %v10584_v54  ;;  %v10625_v54 = vld [vmem:[%s14824_s1 + $0xf30] ss:$8 sps:$4 sm:$0xff]  }
 0x1bd   :  { %5692 = vmatpush2.bf16.msra.mxu1 %v10579_v52 }
 0x1be   :  { %5693 = vmatprep.subr.bf16.mxu1 %v10587_v8 }
 0x1bf   :  { %5643 = vmatpush2.bf16.msra.mxu0 %v10582_v55  ;;  %v10633_v55 = vld [vmem:[%s14824_s1 + $0xf24] ss:$8 sps:$4 sm:$0xff]  }
 0x1c0   :  { %5714 = vmatprep.subr.bf16.mxu0 %v10593_v60  ;;  %v10636_v60 = vld [vmem:[%s14824_s1 + $0xe14] ss:$8 sps:$4 sm:$0xff]  }
 0x1c1   :  { %5694 = vmatpush2.bf16.msra.mxu1 %v10585_v59  ;;  %v10628_v59 = vld [vmem:[%s14824_s1 + $0xe20] ss:$8 sps:$4 sm:$0xff]  }
 0x1c2   :  { %v5340_v10 = vpop.f32.mrf.mxu0  ;;  %5645 = vmatmul.mubr.bf16.vlgmr.msra.gmra.mxu0 %v10588_v61  ;;  %5765 = vmatprep.subr.bf16.mxu1 %v10599_v7  ;;  %v10631_v61 = vld [vmem:[%s14824_s1 + $0xf20] ss:$8 sps:$4 sm:$0xff]   ;;  %v10634_v7 = vld [vmem:[%s14824_s1 + $0xe10] ss:$8 sps:$4 sm:$0xff]  }
 0x1c3   :  { %v5341_v41 = vadd.f32 %v5340_v10, %v12715_v31  ;;  %5715 = vmatpush1.bf16.msra.mxu0 %v10591_v3  ;;  %5654 = vmatprep.mubr.bf16.mxu0 %v8524_v12  ;;  %v10603_v31 = vld [vmem:[%s14824_s1 + $0xf60] ss:$8 sps:$4 sm:$0xff]   ;;  %v10637_v3 = vld [vmem:[%s14824_s1 + $0xf10] ss:$8 sps:$4 sm:$0xff]  }
 0x1c4   :  { %v5342_v14 = vpop.f32.mrf.mxu0  ;;  %v5391_v15 = vpop.f32.mrf.mxu1  ;;  %5696 = vmatmul.mubr.bf16.vlgmr.msra.gmra.mxu1 %v10594_v4  ;;  %5716 = vmatprep.subr.bf16.mxu0 %v10602_v6  ;;  %v10645_v4 = vld [vmem:[%s14824_s1 + $0xf04] ss:$8 sps:$4 sm:$0xff]   ;;  %v10640_v12 = vld [vmem:[%s14824_s1 + $0xe00] ss:$8 sps:$4 sm:$0xff]   ;;  %v10648_v6 = vld [vmem:[%s14824_s1 + $0xef4] ss:$8 sps:$4 sm:$0xff]  }
 0x1c5   :  { %v5343_v16 = vadd.f32 %v5342_v14, %v12728_v40  ;;  %v12945_v17 = vadd.f32 %v5391_v15, %v5341_v41  ;;  %5766 = vmatpush1.bf16.msra.mxu1 %v10597_v36  ;;  %5705 = vmatprep.mubr.bf16.mxu1 %v8526_v9  ;;  %v10615_v40 = vld [vmem:[%s14824_s1 + $0xf54] ss:$8 sps:$4 sm:$0xff]   ;;  %v10643_v36 = vld [vmem:[%s14824_s1 + $0xf00] ss:$8 sps:$4 sm:$0xff]   ;;  %v10646_v10 = vld [vmem:[%s14824_s1 + $0xef0] ss:$8 sps:$4 sm:$0xff]  }
 0x1c6   :  { %v5344_v18 = vpop.f32.mrf.mxu0  ;;  %v5393_v19 = vpop.f32.mrf.mxu1  ;;  %5767 = vmatprep.subr.bf16.mxu1 %v10605_v11  ;;  %v10651_v9 = vld [vmem:[%s14824_s1 + $0xff4] ss:$8 sps:$4 sm:$0xff]   ;;  %v10654_v11 = vld [vmem:[%s14824_s1 + $0xee4] ss:$8 sps:$4 sm:$0xff]   ;;  %v10649_v41 = vld [vmem:[%s14824_s1 + $0xff0] ss:$8 sps:$4 sm:$0xff]  }
 0x1c7   :  { %v5345_v22 = vadd.f32 %v5344_v18, %v12741_v48  ;;  %v12957_v23 = vadd.f32 %v5393_v19, %v5343_v16  ;;  %5717 = vmatpush1.bf16.msra.mxu0 %v10600_v13  ;;  %v10657_v13 = vld [vmem:[%s14824_s1 + $0xfe4] ss:$8 sps:$4 sm:$0xff]   ;;  %v10652_v14 = vld [vmem:[%s14824_s1 + $0xee0] ss:$8 sps:$4 sm:$0xff]   ;;  %v10660_v15 = vld [vmem:[%s14824_s1 + $0xed4] ss:$8 sps:$4 sm:$0xff]  }
 0x1c8   :  { %v5346_v25 = vpop.f32.mrf.mxu0  ;;  %v5395_v26 = vpop.f32.mrf.mxu1  ;;  %5718 = vmatprep.subr.bf16.mxu0 %v10610_v47  ;;  %v10655_v47 = vld [vmem:[%s14824_s1 + $0xfe0] ss:$8 sps:$4 sm:$0xff]   ;;  %v10663_v16 = vld [vmem:[%s14824_s1 + $0xfd4] ss:$8 sps:$4 sm:$0xff]   ;;  %v10666_v18 = vld [vmem:[%s14824_s1 + $0xec4] ss:$8 sps:$4 sm:$0xff]  }
 0x1c9   :  { %v5347_v48 = vadd.f32 %v5346_v25, %v12753_v56  ;;  %v12969_v44 = vadd.f32 %v5395_v26, %v5345_v22  ;;  %5768 = vmatpush1.bf16.msra.mxu1 %v10603_v31  ;;  %v10616_v56 = vld [vmem:[%s14824_s1 + $0xe40] ss:$8 sps:$4 sm:$0xff]   ;;  %v10658_v31 = vld [vmem:[%s14824_s1 + $0xed0] ss:$8 sps:$4 sm:$0xff]   ;;  %v10678_v26 = vld [vmem:[%s14824_s1 + $0xea4] ss:$8 sps:$4 sm:$0xff]  }
 0x1ca   :  { %v5350_v32 = vpop.f32.mrf.mxu0  ;;  %v5397_v33 = vpop.f32.mrf.mxu1  ;;  %5655 = vmatmul.mubr.bf16.gmra.mxu0 %v8523_v20  ;;  %5769 = vmatprep.subr.bf16.mxu1 %v10615_v40  ;;  %v10661_v19 = vld [vmem:[%s14824_s1 + $0xfd0] ss:$8 sps:$4 sm:$0xff]   ;;  %v10669_v20 = vld [vmem:[%s14824_s1 + $0xfc4] ss:$8 sps:$4 sm:$0xff]   ;;  %v10672_v40 = vld [vmem:[%s14824_s1 + $0xeb4] ss:$8 sps:$4 sm:$0xff]  }
 0x1cb   :  { %v5351_v51 = vadd.f32 %v5350_v32, %v12762_v0  ;;  %v12978_v37 = vadd.f32 %v5397_v33, %v5347_v48  ;;  %5719 = vmatpush1.bf16.msra.mxu0 %v10608_v21  ;;  %5746 = vmatprep.mubr.bf16.mxu0 %v10696_v24  ;;  %v10619_v0 = vld [vmem:[%s14824_s1 + $0xf40] ss:$8 sps:$4 sm:$0xff]   ;;  %v10675_v24 = vld [vmem:[%s14824_s1 + $0xfb4] ss:$8 sps:$4 sm:$0xff]   ;;  %v10670_v25 = vld [vmem:[%s14824_s1 + $0xeb0] ss:$8 sps:$4 sm:$0xff]  }
 0x1cc   :  { %v5352_v38 = vpop.f32.mrf.mxu0  ;;  %v5401_v42 = vpop.f32.mrf.mxu1  ;;  %5706 = vmatmul.mubr.bf16.gmra.mxu1 %v8525_v27  ;;  %5720 = vmatprep.subr.bf16.mxu0 %v10618_v30  ;;  %v10664_v21 = vld [vmem:[%s14824_s1 + $0xec0] ss:$8 sps:$4 sm:$0xff]   ;;  %v10673_v27 = vld [vmem:[%s14824_s1 + $0xfb0] ss:$8 sps:$4 sm:$0xff]   ;;  %v10684_v48 = vld [vmem:[%s14824_s1 + $0xe94] ss:$8 sps:$4 sm:$0xff]  }
 0x1cd   :  { %v5353_v58 = vadd.f32 %v5352_v38, %v12770_v5  ;;  %v12987_v45 = vadd.f32 %v5401_v42, %v5351_v51  ;;  %5770 = vmatpush1.bf16.msra.mxu1 %v10613_v29  ;;  %5797 = vmatprep.mubr.bf16.mxu1 %v10702_v53  ;;  %v10622_v5 = vld [vmem:[%s14824_s1 + $0xe30] ss:$8 sps:$4 sm:$0xff]   ;;  %v10667_v22 = vld [vmem:[%s14824_s1 + $0xfc0] ss:$8 sps:$4 sm:$0xff]   ;;  %v10681_v29 = vld [vmem:[%s14824_s1 + $0xfa4] ss:$8 sps:$4 sm:$0xff]  }
 0x1ce   :  { %v5403_v46 = vpop.f32.mrf.mxu1  ;;  %5771 = vmatprep.subr.bf16.mxu1 %v10621_v34  ;;  %v5354_v62 = vpop.f32.mrf.mxu0  ;;  %v10676_v30 = vld [vmem:[%s14824_s1 + $0xea0] ss:$8 sps:$4 sm:$0xff]   ;;  %v10687_v32 = vld [vmem:[%s14824_s1 + $0xf94] ss:$8 sps:$4 sm:$0xff]   ;;  %v10682_v33 = vld [vmem:[%s14824_s1 + $0xe90] ss:$8 sps:$4 sm:$0xff]  }
 0x1cf   :  { %v12995_v49 = vadd.f32 %v5403_v46, %v5353_v58  ;;  %5721 = vmatpush1.bf16.msra.mxu0 %v10616_v56  ;;  %v10679_v53 = vld [vmem:[%s14824_s1 + $0xfa0] ss:$8 sps:$4 sm:$0xff]   ;;  %v10690_v34 = vld [vmem:[%s14824_s1 + $0xe84] ss:$8 sps:$4 sm:$0xff]   ;;  %v10685_v51 = vld [vmem:[%s14824_s1 + $0xf90] ss:$8 sps:$4 sm:$0xff]  }
 0x1d0   :  { %5722 = vmatprep.subr.bf16.mxu0 %v10624_v43  ;;  %v5355_v50 = vpop.f32.mrf.mxu0  ;;  %v5405_v52 = vpop.f32.mrf.mxu1  ;;  %v10693_v56 = vld [vmem:[%s14824_s1 + $0xf84] ss:$8 sps:$4 sm:$0xff]   ;;  %v10688_v38 = vld [vmem:[%s14824_s1 + $0xe80] ss:$8 sps:$4 sm:$0xff]   ;;  %v10699_v42 = vld [vmem:[%s14824_s1 + $0x1074] ss:$8 sps:$4 sm:$0xff]  }
 0x1d1   :  { %5772 = vmatpush1.bf16.msra.mxu1 %v10619_v0  ;;  %v107_v43 = vld [vmem:[%s14825_s0 + $0x1e8] sm:$0x33]  ;;  %v10705_v46 = vld [vmem:[%s14824_s1 + $0x1174] ss:$8 sps:$4 sm:$0xff]   ;;  %v10697_v62 = vld [vmem:[%s14824_s1 + $0x1070] ss:$8 sps:$4 sm:$0xff]  }
 0x1d2   :  { %5773 = vmatprep.subr.bf16.mxu1 %v10627_v57  ;;  %v5406_v8 = vpop.f32.mrf.mxu1  ;;  %v10691_v58 = vld [vmem:[%s14824_s1 + $0xf80] ss:$8 sps:$4 sm:$0xff]   ;;  %v10694_v0 = vld [vmem:[%s14825_s0 + $0x70] ss:$188 sps:$4 sm:$0xff]  }
 0x1d3   :  { %5723 = vmatpush1.bf16.msra.mxu0 %v10622_v5  ;;  %v108_v57 = vld [vmem:[%s14825_s0 + $0x1f0] sm:$0x33]  ;;  %v8528_v5 = vcombine.high %v107_v43, %v107_v43  ;;  %v10708_v50 = vld [vmem:[%s14824_s1 + $0x1064] ss:$8 sps:$4 sm:$0xff]  }
 0x1d4   :  { %5724 = vmatprep.subr.bf16.mxu0 %v10630_v1  ;;  %v10700_v1 = vld [vmem:[%s14825_s0 + $0x78] ss:$188 sps:$4 sm:$0xff]   ;;  %v10711_v8 = vld [vmem:[%s14824_s1 + $0x1164] ss:$8 sps:$4 sm:$0xff]  }
 0x1d5   :  { %5774 = vmatpush1.bf16.msra.mxu1 %v10625_v54  ;;  %v10703_v52 = vld [vmem:[%s14824_s1 + $0x1170] ss:$8 sps:$4 sm:$0xff]   ;;  %v8530_v54 = vcombine.high %v108_v57, %v108_v57 }
 0x1d6   :  { %5775 = vmatprep.subr.bf16.mxu1 %v10633_v55 }
 0x1d7   :  { %5725 = vmatpush1.bf16.msra.mxu0 %v10628_v59 }
 0x1d8   :  { %5726 = vmatprep.subr.bf16.mxu0 %v10636_v60  ;;  %v10706_v60 = vld [vmem:[%s14824_s1 + $0x1060] ss:$8 sps:$4 sm:$0xff]  }
 0x1d9   :  { %5776 = vmatpush1.bf16.msra.mxu1 %v10631_v61 }
 0x1da   :  { %5777 = vmatprep.subr.bf16.mxu1 %v10639_v63 }
 0x1db   :  { %5727 = vmatpush1.bf16.msra.mxu0 %v10634_v7  ;;  %v10716_v7 = vld [vmem:[%s14824_s1 + $0x1054] ss:$8 sps:$4 sm:$0xff]  }
 0x1dc   :  { %5728 = vmatprep.subr.bf16.mxu0 %v10642_v2 }
 0x1dd   :  { %5778 = vmatpush1.bf16.msra.mxu1 %v10637_v3 }
 0x1de   :  { %5779 = vmatprep.subr.bf16.mxu1 %v10645_v4 }
 0x1df   :  { %5729 = vmatpush1.bf16.msra.mxu0 %v10640_v12 }
 0x1e0   :  { %5730 = vmatprep.subr.bf16.mxu0 %v10648_v6  ;;  %v8527_v6 = vcombine.low %v107_v43, %v107_v43  ;;  %v10742_v43 = vld [vmem:[%s14824_s1 + $0x1014] ss:$8 sps:$4 sm:$0xff]  }
 0x1e1   :  { %5780 = vmatpush1.bf16.msra.mxu1 %v10643_v36  ;;  %v10721_v36 = vld [vmem:[%s14824_s1 + $0x1154] ss:$8 sps:$4 sm:$0xff]  }
 0x1e2   :  { %5781 = vmatprep.subr.bf16.mxu1 %v10651_v9 }
 0x1e3   :  { %5731 = vmatpush2.bf16.msra.mxu0 %v10646_v10 }
 0x1e4   :  { %5732 = vmatprep.subr.bf16.mxu0 %v10654_v11  ;;  %v10802_v11 = vld [vmem:[%s14825_s0 + $0x84] ss:$188 sps:$4 sm:$0xff]  }
 0x1e5   :  { %5782 = vmatpush2.bf16.msra.mxu1 %v10649_v41 }
 0x1e6   :  { %5783 = vmatprep.subr.bf16.mxu1 %v10657_v13 }
 0x1e7   :  { %5733 = vmatpush2.bf16.msra.mxu0 %v10652_v14  ;;  %v8529_v14 = vcombine.low %v108_v57, %v108_v57  ;;  %v10748_v57 = vld [vmem:[%s14824_s1 + $0x1004] ss:$8 sps:$4 sm:$0xff]  }
 0x1e8   :  { %5734 = vmatprep.subr.bf16.mxu0 %v10660_v15  ;;  %v10724_v15 = vld [vmem:[%s14824_s1 + $0x1044] ss:$8 sps:$4 sm:$0xff]  }
 0x1e9   :  { %5784 = vmatpush2.bf16.msra.mxu1 %v10655_v47 }
 0x1ea   :  { %5785 = vmatprep.subr.bf16.mxu1 %v10663_v16  ;;  %v10719_v16 = vld [vmem:[%s14824_s1 + $0x1150] ss:$8 sps:$4 sm:$0xff]  }
 0x1eb   :  { %5735 = vmatpush2.bf16.msra.mxu0 %v10658_v31  ;;  %v10808_v31 = vld [vmem:[%s14825_s0 + $0x8c] ss:$188 sps:$4 sm:$0xff]  }
 0x1ec   :  { %5736 = vmatprep.subr.bf16.mxu0 %v10666_v18 }
 0x1ed   :  { %5786 = vmatpush2.bf16.msra.mxu1 %v10661_v19 }
 0x1ee   :  { %5787 = vmatprep.subr.bf16.mxu1 %v10669_v20  ;;  %v10727_v20 = vld [vmem:[%s14824_s1 + $0x1144] ss:$8 sps:$4 sm:$0xff]  }
 0x1ef   :  { %5737 = vmatpush2.bf16.msra.mxu0 %v10664_v21 }
 0x1f0   :  { %5738 = vmatprep.subr.bf16.mxu0 %v10672_v40  ;;  %v10722_v40 = vld [vmem:[%s14824_s1 + $0x1040] ss:$8 sps:$4 sm:$0xff]  }
 0x1f1   :  { %5788 = vmatpush2.bf16.msra.mxu1 %v10667_v22 }
 0x1f2   :  { %5789 = vmatprep.subr.bf16.mxu1 %v10675_v24 }
 0x1f3   :  { %5739 = vmatpush2.bf16.msra.mxu0 %v10670_v25  ;;  %v10730_v25 = vld [vmem:[%s14824_s1 + $0x1034] ss:$8 sps:$4 sm:$0xff]  }
 0x1f4   :  { %5740 = vmatprep.subr.bf16.mxu0 %v10678_v26 }
 0x1f5   :  { %5790 = vmatpush2.bf16.msra.mxu1 %v10673_v27 }
 0x1f6   :  { %5791 = vmatprep.subr.bf16.mxu1 %v10681_v29 }
 0x1f7   :  { %5741 = vmatpush2.bf16.msra.mxu0 %v10676_v30  ;;  %v10733_v30 = vld [vmem:[%s14824_s1 + $0x1134] ss:$8 sps:$4 sm:$0xff]  }
 0x1f8   :  { %5742 = vmatprep.subr.bf16.mxu0 %v10684_v48 }
 0x1f9   :  { %5792 = vmatpush2.bf16.msra.mxu1 %v10679_v53 }
 0x1fa   :  { %5793 = vmatprep.subr.bf16.mxu1 %v10687_v32  ;;  %v10736_v32 = vld [vmem:[%s14824_s1 + $0x1024] ss:$8 sps:$4 sm:$0xff]  }
 0x1fb   :  { %5743 = vmatpush2.bf16.msra.mxu0 %v10682_v33 }
 0x1fc   :  { %5744 = vmatprep.subr.bf16.mxu0 %v10690_v34 }
 0x1fd   :  { %5794 = vmatpush2.bf16.msra.mxu1 %v10685_v51  ;;  %v10731_v51 = vld [vmem:[%s14824_s1 + $0x1130] ss:$8 sps:$4 sm:$0xff]  }
 0x1fe   :  { %5795 = vmatprep.subr.bf16.mxu1 %v10693_v56  ;;  %v10739_v56 = vld [vmem:[%s14824_s1 + $0x1124] ss:$8 sps:$4 sm:$0xff]  }
 0x1ff   :  { %5745 = vmatpush2.bf16.msra.mxu0 %v10688_v38 }
 0x200   :  { %5816 = vmatprep.subr.bf16.mxu0 %v10699_v42  ;;  %v10734_v42 = vld [vmem:[%s14824_s1 + $0x1020] ss:$8 sps:$4 sm:$0xff]  }
 0x201   :  { %5796 = vmatpush2.bf16.msra.mxu1 %v10691_v58  ;;  %v10737_v58 = vld [vmem:[%s14824_s1 + $0x1120] ss:$8 sps:$4 sm:$0xff]  }
 0x202   :  { %v5442_v55 = vpop.f32.mrf.mxu0  ;;  %5747 = vmatmul.mubr.bf16.vlgmr.msra.gmra.mxu0 %v10694_v0  ;;  %5867 = vmatprep.subr.bf16.mxu1 %v10705_v46  ;;  %v10745_v0 = vld [vmem:[%s14824_s1 + $0x1114] ss:$8 sps:$4 sm:$0xff]   ;;  %v10740_v46 = vld [vmem:[%s14824_s1 + $0x1010] ss:$8 sps:$4 sm:$0xff]  }
 0x203   :  { %v5443_v59 = vadd.f32 %v5442_v55, %v12945_v17  ;;  %5817 = vmatpush1.bf16.msra.mxu0 %v10697_v62  ;;  %5756 = vmatprep.mubr.bf16.mxu0 %v8528_v5  ;;  %v10709_v17 = vld [vmem:[%s14824_s1 + $0x1160] ss:$8 sps:$4 sm:$0xff]   ;;  %v10743_v62 = vld [vmem:[%s14824_s1 + $0x1110] ss:$8 sps:$4 sm:$0xff]   ;;  %v10751_v5 = vld [vmem:[%s14824_s1 + $0x1104] ss:$8 sps:$4 sm:$0xff]  }
 0x204   :  { %v5444_v61 = vpop.f32.mrf.mxu0  ;;  %v5493_v63 = vpop.f32.mrf.mxu1  ;;  %5798 = vmatmul.mubr.bf16.vlgmr.msra.gmra.mxu1 %v10700_v1  ;;  %5818 = vmatprep.subr.bf16.mxu0 %v10708_v50  ;;  %v10746_v1 = vld [vmem:[%s14824_s1 + $0x1000] ss:$8 sps:$4 sm:$0xff]   ;;  %v10754_v50 = vld [vmem:[%s14824_s1 + $0x10f4] ss:$8 sps:$4 sm:$0xff]   ;;  %v10752_v55 = vld [vmem:[%s14824_s1 + $0x10f0] ss:$8 sps:$4 sm:$0xff]  }
 0x205   :  { %v5445_v2 = vadd.f32 %v5444_v61, %v12957_v23  ;;  %v13173_v3 = vadd.f32 %v5493_v63, %v5443_v59  ;;  %5868 = vmatpush1.bf16.msra.mxu1 %v10703_v52  ;;  %5807 = vmatprep.mubr.bf16.mxu1 %v8530_v54  ;;  %v10714_v23 = vld [vmem:[%s14824_s1 + $0x1050] ss:$8 sps:$4 sm:$0xff]   ;;  %v10749_v52 = vld [vmem:[%s14824_s1 + $0x1100] ss:$8 sps:$4 sm:$0xff]   ;;  %v10757_v54 = vld [vmem:[%s14824_s1 + $0x11f4] ss:$8 sps:$4 sm:$0xff]  }
 0x206   :  { %v5446_v4 = vpop.f32.mrf.mxu0  ;;  %v5495_v12 = vpop.f32.mrf.mxu1  ;;  %5869 = vmatprep.subr.bf16.mxu1 %v10711_v8  ;;  %v10760_v8 = vld [vmem:[%s14824_s1 + $0x10e4] ss:$8 sps:$4 sm:$0xff]   ;;  %v10755_v59 = vld [vmem:[%s14824_s1 + $0x11f0] ss:$8 sps:$4 sm:$0xff]   ;;  %v10758_v61 = vld [vmem:[%s14824_s1 + $0x10e0] ss:$8 sps:$4 sm:$0xff]  }
 0x207   :  { %v5447_v9 = vadd.f32 %v5446_v4, %v12969_v44  ;;  %v13182_v10 = vadd.f32 %v5495_v12, %v5445_v2  ;;  %5819 = vmatpush1.bf16.msra.mxu0 %v10706_v60  ;;  %v10763_v60 = vld [vmem:[%s14824_s1 + $0x11e4] ss:$8 sps:$4 sm:$0xff]   ;;  %v10766_v63 = vld [vmem:[%s14824_s1 + $0x10d4] ss:$8 sps:$4 sm:$0xff]   ;;  %v10767_v12 = vld [vmem:[%s14824_s1 + $0x11d0] ss:$8 sps:$4 sm:$0xff]  }
 0x208   :  { %v5448_v41 = vpop.f32.mrf.mxu0  ;;  %v5497_v13 = vpop.f32.mrf.mxu1  ;;  %5820 = vmatprep.subr.bf16.mxu0 %v10716_v7  ;;  %v10761_v7 = vld [vmem:[%s14824_s1 + $0x11e0] ss:$8 sps:$4 sm:$0xff]   ;;  %v10769_v2 = vld [vmem:[%s14824_s1 + $0x11d4] ss:$8 sps:$4 sm:$0xff]   ;;  %v10772_v4 = vld [vmem:[%s14824_s1 + $0x10c4] ss:$8 sps:$4 sm:$0xff]  }
 0x209   :  { %v5449_v44 = vadd.f32 %v5448_v41, %v12978_v37  ;;  %v13194_v47 = vadd.f32 %v5497_v13, %v5447_v9  ;;  %5870 = vmatpush1.bf16.msra.mxu1 %v10709_v17  ;;  %v10764_v17 = vld [vmem:[%s14824_s1 + $0x10d0] ss:$8 sps:$4 sm:$0xff]   ;;  %v10778_v9 = vld [vmem:[%s14824_s1 + $0x10b4] ss:$8 sps:$4 sm:$0xff]   ;;  %v10784_v13 = vld [vmem:[%s14824_s1 + $0x10a4] ss:$8 sps:$4 sm:$0xff]  }
 0x20a   :  { %v5452_v18 = vpop.f32.mrf.mxu0  ;;  %v5499_v19 = vpop.f32.mrf.mxu1  ;;  %5757 = vmatmul.mubr.bf16.gmra.mxu0 %v8527_v6  ;;  %5871 = vmatprep.subr.bf16.mxu1 %v10721_v36  ;;  %v10775_v6 = vld [vmem:[%s14824_s1 + $0x11c4] ss:$8 sps:$4 sm:$0xff]   ;;  %v10770_v36 = vld [vmem:[%s14824_s1 + $0x10c0] ss:$8 sps:$4 sm:$0xff]   ;;  %v10776_v41 = vld [vmem:[%s14824_s1 + $0x10b0] ss:$8 sps:$4 sm:$0xff]  }
 0x20b   :  { %v5453_v37 = vadd.f32 %v5452_v18, %v12987_v45  ;;  %v13206_v21 = vadd.f32 %v5499_v19, %v5449_v44  ;;  %5821 = vmatpush1.bf16.msra.mxu0 %v10714_v23  ;;  %5848 = vmatprep.mubr.bf16.mxu0 %v10802_v11  ;;  %v10725_v45 = vld [vmem:[%s14824_s1 + $0x1140] ss:$8 sps:$4 sm:$0xff]   ;;  %v10781_v11 = vld [vmem:[%s14824_s1 + $0x11b4] ss:$8 sps:$4 sm:$0xff]   ;;  %v10788_v19 = vld [vmem:[%s14824_s1 + $0x1090] ss:$8 sps:$4 sm:$0xff]  }
 0x20c   :  { %v5454_v22 = vpop.f32.mrf.mxu0  ;;  %v5503_v24 = vpop.f32.mrf.mxu1  ;;  %5808 = vmatmul.mubr.bf16.gmra.mxu1 %v8529_v14  ;;  %5822 = vmatprep.subr.bf16.mxu0 %v10724_v15  ;;  %v10773_v23 = vld [vmem:[%s14824_s1 + $0x11c0] ss:$8 sps:$4 sm:$0xff]   ;;  %v10779_v14 = vld [vmem:[%s14824_s1 + $0x11b0] ss:$8 sps:$4 sm:$0xff]   ;;  %v10787_v15 = vld [vmem:[%s14824_s1 + $0x11a4] ss:$8 sps:$4 sm:$0xff]  }
 0x20d   :  { %v5455_v26 = vadd.f32 %v5454_v22, %v12995_v49  ;;  %v13215_v27 = vadd.f32 %v5503_v24, %v5453_v37  ;;  %5872 = vmatpush1.bf16.msra.mxu1 %v10719_v16  ;;  %5899 = vmatprep.mubr.bf16.mxu1 %v10808_v31  ;;  %v10728_v49 = vld [vmem:[%s14824_s1 + $0x1030] ss:$8 sps:$4 sm:$0xff]   ;;  %v10782_v44 = vld [vmem:[%s14824_s1 + $0x10a0] ss:$8 sps:$4 sm:$0xff]   ;;  %v10790_v16 = vld [vmem:[%s14824_s1 + $0x1094] ss:$8 sps:$4 sm:$0xff]  }
 0x20e   :  { %v5505_v29 = vpop.f32.mrf.mxu1  ;;  %5873 = vmatprep.subr.bf16.mxu1 %v10727_v20  ;;  %v5456_v48 = vpop.f32.mrf.mxu0  ;;  %v10785_v31 = vld [vmem:[%s14824_s1 + $0x11a0] ss:$8 sps:$4 sm:$0xff]   ;;  %v10793_v18 = vld [vmem:[%s14824_s1 + $0x1194] ss:$8 sps:$4 sm:$0xff]   ;;  %v10796_v20 = vld [vmem:[%s14824_s1 + $0x1084] ss:$8 sps:$4 sm:$0xff]  }
 0x20f   :  { %v13223_v53 = vadd.f32 %v5505_v29, %v5455_v26  ;;  %5823 = vmatpush1.bf16.msra.mxu0 %v10722_v40  ;;  %v10791_v37 = vld [vmem:[%s14824_s1 + $0x1190] ss:$8 sps:$4 sm:$0xff]   ;;  %v10799_v40 = vld [vmem:[%s14824_s1 + $0x1184] ss:$8 sps:$4 sm:$0xff]   ;;  %v10794_v22 = vld [vmem:[%s14824_s1 + $0x1080] ss:$8 sps:$4 sm:$0xff]  }
 0x210   :  { %5824 = vmatprep.subr.bf16.mxu0 %v10730_v25  ;;  %v5457_v33 = vpop.f32.mrf.mxu0  ;;  %v5507_v34 = vpop.f32.mrf.mxu1  ;;  %v10805_v24 = vld [vmem:[%s14824_s1 + $0x1274] ss:$8 sps:$4 sm:$0xff]   ;;  %v10797_v26 = vld [vmem:[%s14824_s1 + $0x1180] ss:$8 sps:$4 sm:$0xff]   ;;  %v10803_v48 = vld [vmem:[%s14824_s1 + $0x1270] ss:$8 sps:$4 sm:$0xff]  }
 0x211   :  { %5874 = vmatpush1.bf16.msra.mxu1 %v10725_v45  ;;  %v109_v25 = vld [vmem:[%s14825_s0 + $0x1f8] sm:$0x33]  ;;  %v10814_v33 = vld [vmem:[%s14824_s1 + $0x1264] ss:$8 sps:$4 sm:$0xff]  }
 0x212   :  { %5875 = vmatprep.subr.bf16.mxu1 %v10733_v30  ;;  %v5508_v38 = vpop.f32.mrf.mxu1  ;;  %v10800_v45 = vld [vmem:[%s14825_s0 + $0x80] ss:$188 sps:$4 sm:$0xff]   ;;  %v10809_v34 = vld [vmem:[%s14824_s1 + $0x1370] ss:$8 sps:$4 sm:$0xff]  }
 0x213   :  { %5825 = vmatpush1.bf16.msra.mxu0 %v10728_v49  ;;  %v10811_v29 = vld [vmem:[%s14824_s1 + $0x1374] ss:$8 sps:$4 sm:$0xff]   ;;  %v110_v30 = vld [vmem:[%s14825_s0 + $0x200] sm:$0x33]  ;;  %v8532_v49 = vcombine.high %v109_v25, %v109_v25 }
 0x214   :  { %5826 = vmatprep.subr.bf16.mxu0 %v10736_v32  ;;  %v10806_v32 = vld [vmem:[%s14825_s0 + $0x88] ss:$188 sps:$4 sm:$0xff]  }
 0x215   :  { %5876 = vmatpush1.bf16.msra.mxu1 %v10731_v51  ;;  %v8534_v51 = vcombine.high %v110_v30, %v110_v30  ;;  %v10817_v38 = vld [vmem:[%s14824_s1 + $0x1364] ss:$8 sps:$4 sm:$0xff]  }
 0x216   :  { %5877 = vmatprep.subr.bf16.mxu1 %v10739_v56 }
 0x217   :  { %5827 = vmatpush1.bf16.msra.mxu0 %v10734_v42 }
 0x218   :  { %5828 = vmatprep.subr.bf16.mxu0 %v10742_v43  ;;  %v10812_v43 = vld [vmem:[%s14824_s1 + $0x1260] ss:$8 sps:$4 sm:$0xff]  }
 0x219   :  { %5878 = vmatpush1.bf16.msra.mxu1 %v10737_v58 }
 0x21a   :  { %5879 = vmatprep.subr.bf16.mxu1 %v10745_v0 }
 0x21b   :  { %5829 = vmatpush1.bf16.msra.mxu0 %v10740_v46  ;;  %v10822_v46 = vld [vmem:[%s14824_s1 + $0x1254] ss:$8 sps:$4 sm:$0xff]  }
 0x21c   :  { %5830 = vmatprep.subr.bf16.mxu0 %v10748_v57 }
 0x21d   :  { %5880 = vmatpush1.bf16.msra.mxu1 %v10743_v62 }
 0x21e   :  { %5881 = vmatprep.subr.bf16.mxu1 %v10751_v5 }
 0x21f   :  { %5831 = vmatpush1.bf16.msra.mxu0 %v10746_v1 }
 0x220   :  { %5832 = vmatprep.subr.bf16.mxu0 %v10754_v50  ;;  %v8531_v50 = vcombine.low %v109_v25, %v109_v25  ;;  %v10848_v25 = vld [vmem:[%s14824_s1 + $0x1214] ss:$8 sps:$4 sm:$0xff]  }
 0x221   :  { %5882 = vmatpush1.bf16.msra.mxu1 %v10749_v52  ;;  %v10827_v52 = vld [vmem:[%s14824_s1 + $0x1354] ss:$8 sps:$4 sm:$0xff]  }
 0x222   :  { %5883 = vmatprep.subr.bf16.mxu1 %v10757_v54 }
 0x223   :  { %5833 = vmatpush2.bf16.msra.mxu0 %v10752_v55 }
 0x224   :  { %5834 = vmatprep.subr.bf16.mxu0 %v10760_v8  ;;  %v10908_v8 = vld [vmem:[%s14825_s0 + $0x94] ss:$188 sps:$4 sm:$0xff]  }
 0x225   :  { %5884 = vmatpush2.bf16.msra.mxu1 %v10755_v59 }
 0x226   :  { %5885 = vmatprep.subr.bf16.mxu1 %v10763_v60 }
 0x227   :  { %5835 = vmatpush2.bf16.msra.mxu0 %v10758_v61  ;;  %v8533_v61 = vcombine.low %v110_v30, %v110_v30  ;;  %v10854_v30 = vld [vmem:[%s14824_s1 + $0x1204] ss:$8 sps:$4 sm:$0xff]  }
 0x228   :  { %5836 = vmatprep.subr.bf16.mxu0 %v10766_v63  ;;  %v10830_v63 = vld [vmem:[%s14824_s1 + $0x1244] ss:$8 sps:$4 sm:$0xff]  }
 0x229   :  { %5886 = vmatpush2.bf16.msra.mxu1 %v10761_v7 }
 0x22a   :  { %5887 = vmatprep.subr.bf16.mxu1 %v10769_v2  ;;  %v10825_v2 = vld [vmem:[%s14824_s1 + $0x1350] ss:$8 sps:$4 sm:$0xff]  }
 0x22b   :  { %5837 = vmatpush2.bf16.msra.mxu0 %v10764_v17  ;;  %v10914_v17 = vld [vmem:[%s14825_s0 + $0x9c] ss:$188 sps:$4 sm:$0xff]  }
 0x22c   :  { %5838 = vmatprep.subr.bf16.mxu0 %v10772_v4 }
 0x22d   :  { %5888 = vmatpush2.bf16.msra.mxu1 %v10767_v12 }
 0x22e   :  { %5889 = vmatprep.subr.bf16.mxu1 %v10775_v6  ;;  %v10833_v6 = vld [vmem:[%s14824_s1 + $0x1344] ss:$8 sps:$4 sm:$0xff]  }
 0x22f   :  { %5839 = vmatpush2.bf16.msra.mxu0 %v10770_v36 }
 0x230   :  { %5840 = vmatprep.subr.bf16.mxu0 %v10778_v9  ;;  %v10828_v9 = vld [vmem:[%s14824_s1 + $0x1240] ss:$8 sps:$4 sm:$0xff]  }
 0x231   :  { %5890 = vmatpush2.bf16.msra.mxu1 %v10773_v23 }
 0x232   :  { %5891 = vmatprep.subr.bf16.mxu1 %v10781_v11 }
 0x233   :  { %5841 = vmatpush2.bf16.msra.mxu0 %v10776_v41  ;;  %v10836_v41 = vld [vmem:[%s14824_s1 + $0x1234] ss:$8 sps:$4 sm:$0xff]  }
 0x234   :  { %5842 = vmatprep.subr.bf16.mxu0 %v10784_v13 }
 0x235   :  { %5892 = vmatpush2.bf16.msra.mxu1 %v10779_v14 }
 0x236   :  { %5893 = vmatprep.subr.bf16.mxu1 %v10787_v15 }
 0x237   :  { %5843 = vmatpush2.bf16.msra.mxu0 %v10782_v44  ;;  %v10839_v44 = vld [vmem:[%s14824_s1 + $0x1334] ss:$8 sps:$4 sm:$0xff]  }
 0x238   :  { %5844 = vmatprep.subr.bf16.mxu0 %v10790_v16 }
 0x239   :  { %5894 = vmatpush2.bf16.msra.mxu1 %v10785_v31 }
 0x23a   :  { %5895 = vmatprep.subr.bf16.mxu1 %v10793_v18  ;;  %v10842_v18 = vld [vmem:[%s14824_s1 + $0x1224] ss:$8 sps:$4 sm:$0xff]  }
 0x23b   :  { %5845 = vmatpush2.bf16.msra.mxu0 %v10788_v19 }
 0x23c   :  { %5846 = vmatprep.subr.bf16.mxu0 %v10796_v20 }
 0x23d   :  { %5896 = vmatpush2.bf16.msra.mxu1 %v10791_v37  ;;  %v10837_v37 = vld [vmem:[%s14824_s1 + $0x1330] ss:$8 sps:$4 sm:$0xff]  }
 0x23e   :  { %5897 = vmatprep.subr.bf16.mxu1 %v10799_v40  ;;  %v10845_v40 = vld [vmem:[%s14824_s1 + $0x1324] ss:$8 sps:$4 sm:$0xff]  }
 0x23f   :  { %5847 = vmatpush2.bf16.msra.mxu0 %v10794_v22 }
 0x240   :  { %5918 = vmatprep.subr.bf16.mxu0 %v10805_v24  ;;  %v10840_v24 = vld [vmem:[%s14824_s1 + $0x1220] ss:$8 sps:$4 sm:$0xff]  }
 0x241   :  { %5898 = vmatpush2.bf16.msra.mxu1 %v10797_v26  ;;  %v10843_v26 = vld [vmem:[%s14824_s1 + $0x1320] ss:$8 sps:$4 sm:$0xff]  }
 0x242   :  { %v5544_v56 = vpop.f32.mrf.mxu0  ;;  %5849 = vmatmul.mubr.bf16.vlgmr.msra.gmra.mxu0 %v10800_v45  ;;  %5969 = vmatprep.subr.bf16.mxu1 %v10811_v29  ;;  %v10851_v45 = vld [vmem:[%s14824_s1 + $0x1314] ss:$8 sps:$4 sm:$0xff]   ;;  %v10846_v29 = vld [vmem:[%s14824_s1 + $0x1210] ss:$8 sps:$4 sm:$0xff]  }
 0x243   :  { %v5545_v42 = vadd.f32 %v5544_v56, %v13173_v3  ;;  %5919 = vmatpush1.bf16.msra.mxu0 %v10803_v48  ;;  %5858 = vmatprep.mubr.bf16.mxu0 %v8532_v49  ;;  %v10815_v3 = vld [vmem:[%s14824_s1 + $0x1360] ss:$8 sps:$4 sm:$0xff]   ;;  %v10849_v48 = vld [vmem:[%s14824_s1 + $0x1310] ss:$8 sps:$4 sm:$0xff]   ;;  %v10857_v49 = vld [vmem:[%s14824_s1 + $0x1304] ss:$8 sps:$4 sm:$0xff]  }
 0x244   :  { %v5546_v58 = vpop.f32.mrf.mxu0  ;;  %v5595_v0 = vpop.f32.mrf.mxu1  ;;  %5900 = vmatmul.mubr.bf16.vlgmr.msra.gmra.mxu1 %v10806_v32  ;;  %5920 = vmatprep.subr.bf16.mxu0 %v10814_v33  ;;  %v10852_v32 = vld [vmem:[%s14824_s1 + $0x1200] ss:$8 sps:$4 sm:$0xff]   ;;  %v10860_v33 = vld [vmem:[%s14824_s1 + $0x12f4] ss:$8 sps:$4 sm:$0xff]   ;;  %v10858_v56 = vld [vmem:[%s14824_s1 + $0x12f0] ss:$8 sps:$4 sm:$0xff]  }
 0x245   :  { %v5547_v57 = vadd.f32 %v5546_v58, %v13182_v10  ;;  %v13401_v62 = vadd.f32 %v5595_v0, %v5545_v42  ;;  %5970 = vmatpush1.bf16.msra.mxu1 %v10809_v34  ;;  %5909 = vmatprep.mubr.bf16.mxu1 %v8534_v51  ;;  %v10820_v10 = vld [vmem:[%s14824_s1 + $0x1250] ss:$8 sps:$4 sm:$0xff]   ;;  %v10855_v34 = vld [vmem:[%s14824_s1 + $0x1300] ss:$8 sps:$4 sm:$0xff]   ;;  %v10863_v51 = vld [vmem:[%s14824_s1 + $0x13f4] ss:$8 sps:$4 sm:$0xff]  }
 0x246   :  { %v5548_v5 = vpop.f32.mrf.mxu0  ;;  %v5597_v1 = vpop.f32.mrf.mxu1  ;;  %5971 = vmatprep.subr.bf16.mxu1 %v10817_v38  ;;  %v10866_v38 = vld [vmem:[%s14824_s1 + $0x12e4] ss:$8 sps:$4 sm:$0xff]   ;;  %v10861_v42 = vld [vmem:[%s14824_s1 + $0x13f0] ss:$8 sps:$4 sm:$0xff]   ;;  %v10864_v58 = vld [vmem:[%s14824_s1 + $0x12e0] ss:$8 sps:$4 sm:$0xff]  }
 0x247   :  { %v5549_v54 = vadd.f32 %v5548_v5, %v13194_v47  ;;  %v13410_v55 = vadd.f32 %v5597_v1, %v5547_v57  ;;  %5921 = vmatpush1.bf16.msra.mxu0 %v10812_v43  ;;  %v10869_v43 = vld [vmem:[%s14824_s1 + $0x13e4] ss:$8 sps:$4 sm:$0xff]   ;;  %v10872_v0 = vld [vmem:[%s14824_s1 + $0x12d4] ss:$8 sps:$4 sm:$0xff]   ;;  %v10873_v1 = vld [vmem:[%s14824_s1 + $0x13d0] ss:$8 sps:$4 sm:$0xff]  }
 0x248   :  { %v5550_v59 = vpop.f32.mrf.mxu0  ;;  %v5599_v60 = vpop.f32.mrf.mxu1  ;;  %5922 = vmatprep.subr.bf16.mxu0 %v10822_v46  ;;  %v10867_v46 = vld [vmem:[%s14824_s1 + $0x13e0] ss:$8 sps:$4 sm:$0xff]   ;;  %v10875_v57 = vld [vmem:[%s14824_s1 + $0x13d4] ss:$8 sps:$4 sm:$0xff]   ;;  %v10878_v5 = vld [vmem:[%s14824_s1 + $0x12c4] ss:$8 sps:$4 sm:$0xff]  }
 0x249   :  { %v5551_v47 = vadd.f32 %v5550_v59, %v13206_v21  ;;  %v13422_v7 = vadd.f32 %v5599_v60, %v5549_v54  ;;  %5972 = vmatpush1.bf16.msra.mxu1 %v10815_v3  ;;  %v10870_v3 = vld [vmem:[%s14824_s1 + $0x12d0] ss:$8 sps:$4 sm:$0xff]   ;;  %v10884_v54 = vld [vmem:[%s14824_s1 + $0x12b4] ss:$8 sps:$4 sm:$0xff]   ;;  %v10890_v60 = vld [vmem:[%s14824_s1 + $0x12a4] ss:$8 sps:$4 sm:$0xff]  }
 0x24a   :  { %v5554_v4 = vpop.f32.mrf.mxu0  ;;  %v5601_v12 = vpop.f32.mrf.mxu1  ;;  %5859 = vmatmul.mubr.bf16.gmra.mxu0 %v8531_v50  ;;  %5973 = vmatprep.subr.bf16.mxu1 %v10827_v52  ;;  %v10881_v50 = vld [vmem:[%s14824_s1 + $0x13c4] ss:$8 sps:$4 sm:$0xff]   ;;  %v10876_v52 = vld [vmem:[%s14824_s1 + $0x12c0] ss:$8 sps:$4 sm:$0xff]   ;;  %v10882_v59 = vld [vmem:[%s14824_s1 + $0x12b0] ss:$8 sps:$4 sm:$0xff]  }
 0x24b   :  { %v5555_v21 = vadd.f32 %v5554_v4, %v13215_v27  ;;  %v13434_v36 = vadd.f32 %v5601_v12, %v5551_v47  ;;  %5923 = vmatpush1.bf16.msra.mxu0 %v10820_v10  ;;  %5950 = vmatprep.mubr.bf16.mxu0 %v10908_v8  ;;  %v10831_v27 = vld [vmem:[%s14824_s1 + $0x1340] ss:$8 sps:$4 sm:$0xff]   ;;  %v10887_v8 = vld [vmem:[%s14824_s1 + $0x13b4] ss:$8 sps:$4 sm:$0xff]   ;;  %v10894_v12 = vld [vmem:[%s14824_s1 + $0x1290] ss:$8 sps:$4 sm:$0xff]  }
 0x24c   :  { %v5556_v23 = vpop.f32.mrf.mxu0  ;;  %v5605_v11 = vpop.f32.mrf.mxu1  ;;  %5910 = vmatmul.mubr.bf16.gmra.mxu1 %v8533_v61  ;;  %5924 = vmatprep.subr.bf16.mxu0 %v10830_v63  ;;  %v10879_v10 = vld [vmem:[%s14824_s1 + $0x13c0] ss:$8 sps:$4 sm:$0xff]   ;;  %v10885_v61 = vld [vmem:[%s14824_s1 + $0x13b0] ss:$8 sps:$4 sm:$0xff]   ;;  %v10893_v63 = vld [vmem:[%s14824_s1 + $0x13a4] ss:$8 sps:$4 sm:$0xff]  }
 0x24d   :  { %v5557_v13 = vadd.f32 %v5556_v23, %v13223_v53  ;;  %v13443_v14 = vadd.f32 %v5605_v11, %v5555_v21  ;;  %5974 = vmatpush1.bf16.msra.mxu1 %v10825_v2  ;;  %6001 = vmatprep.mubr.bf16.mxu1 %v10914_v17  ;;  %v10834_v53 = vld [vmem:[%s14824_s1 + $0x1230] ss:$8 sps:$4 sm:$0xff]   ;;  %v10888_v47 = vld [vmem:[%s14824_s1 + $0x12a0] ss:$8 sps:$4 sm:$0xff]   ;;  %v10896_v2 = vld [vmem:[%s14824_s1 + $0x1294] ss:$8 sps:$4 sm:$0xff]  }
 0x24e   :  { %v5607_v15 = vpop.f32.mrf.mxu1  ;;  %5975 = vmatprep.subr.bf16.mxu1 %v10833_v6  ;;  %v5558_v16 = vpop.f32.mrf.mxu0  ;;  %v10891_v17 = vld [vmem:[%s14824_s1 + $0x13a0] ss:$8 sps:$4 sm:$0xff]   ;;  %v10899_v4 = vld [vmem:[%s14824_s1 + $0x1394] ss:$8 sps:$4 sm:$0xff]   ;;  %v10902_v6 = vld [vmem:[%s14824_s1 + $0x1284] ss:$8 sps:$4 sm:$0xff]  }
 0x24f   :  { %v13451_v31 = vadd.f32 %v5607_v15, %v5557_v13  ;;  %5925 = vmatpush1.bf16.msra.mxu0 %v10828_v9  ;;  %v10897_v21 = vld [vmem:[%s14824_s1 + $0x1390] ss:$8 sps:$4 sm:$0xff]   ;;  %v10905_v9 = vld [vmem:[%s14824_s1 + $0x1384] ss:$8 sps:$4 sm:$0xff]   ;;  %v10900_v23 = vld [vmem:[%s14824_s1 + $0x1280] ss:$8 sps:$4 sm:$0xff]  }
 0x250   :  { %5926 = vmatprep.subr.bf16.mxu0 %v10836_v41  ;;  %v5559_v19 = vpop.f32.mrf.mxu0  ;;  %v5609_v20 = vpop.f32.mrf.mxu1  ;;  %v10911_v11 = vld [vmem:[%s14824_s1 + $0x1474] ss:$8 sps:$4 sm:$0xff]   ;;  %v111_v41 = vld [vmem:[%s14825_s0 + $0x208] sm:$0x33]  ;;  %v10909_v16 = vld [vmem:[%s14824_s1 + $0x1470] ss:$8 sps:$4 sm:$0xff]  }
 0x251   :  { %5976 = vmatpush1.bf16.msra.mxu1 %v10831_v27  ;;  %v10903_v13 = vld [vmem:[%s14824_s1 + $0x1380] ss:$8 sps:$4 sm:$0xff]   ;;  %v10906_v27 = vld [vmem:[%s14825_s0 + $0x90] ss:$188 sps:$4 sm:$0xff]   ;;  %v10917_v15 = vld [vmem:[%s14824_s1 + $0x1574] ss:$8 sps:$4 sm:$0xff]  }
 0x252   :  { %5977 = vmatprep.subr.bf16.mxu1 %v10839_v44  ;;  %v5610_v22 = vpop.f32.mrf.mxu1  ;;  %v112_v44 = vld [vmem:[%s14825_s0 + $0x210] sm:$0x33]  ;;  %v10920_v19 = vld [vmem:[%s14824_s1 + $0x1464] ss:$8 sps:$4 sm:$0xff]  }
 0x253   :  { %5927 = vmatpush1.bf16.msra.mxu0 %v10834_v53  ;;  %v8536_v53 = vcombine.high %v111_v41, %v111_v41  ;;  %v10915_v20 = vld [vmem:[%s14824_s1 + $0x1570] ss:$8 sps:$4 sm:$0xff]   ;;  %v10923_v22 = vld [vmem:[%s14824_s1 + $0x1564] ss:$8 sps:$4 sm:$0xff]  }
 0x254   :  { %5928 = vmatprep.subr.bf16.mxu0 %v10842_v18  ;;  %v10912_v18 = vld [vmem:[%s14825_s0 + $0x98] ss:$188 sps:$4 sm:$0xff]  }
 0x255   :  { %5978 = vmatpush1.bf16.msra.mxu1 %v10837_v37  ;;  %v8538_v37 = vcombine.high %v112_v44, %v112_v44 }
 0x256   :  { %5979 = vmatprep.subr.bf16.mxu1 %v10845_v40 }
 0x257   :  { %5929 = vmatpush1.bf16.msra.mxu0 %v10840_v24 }
 0x258   :  { %5930 = vmatprep.subr.bf16.mxu0 %v10848_v25  ;;  %v10918_v25 = vld [vmem:[%s14824_s1 + $0x1460] ss:$8 sps:$4 sm:$0xff]  }
 0x259   :  { %5980 = vmatpush1.bf16.msra.mxu1 %v10843_v26 }
 0x25a   :  { %5981 = vmatprep.subr.bf16.mxu1 %v10851_v45 }
 0x25b   :  { %5931 = vmatpush1.bf16.msra.mxu0 %v10846_v29  ;;  %v10928_v29 = vld [vmem:[%s14824_s1 + $0x1454] ss:$8 sps:$4 sm:$0xff]  }
 0x25c   :  { %5932 = vmatprep.subr.bf16.mxu0 %v10854_v30 }
 0x25d   :  { %5982 = vmatpush1.bf16.msra.mxu1 %v10849_v48 }
 0x25e   :  { %5983 = vmatprep.subr.bf16.mxu1 %v10857_v49 }
 0x25f   :  { %5933 = vmatpush1.bf16.msra.mxu0 %v10852_v32 }
 0x260   :  { %5934 = vmatprep.subr.bf16.mxu0 %v10860_v33  ;;  %v8535_v33 = vcombine.low %v111_v41, %v111_v41  ;;  %v10954_v41 = vld [vmem:[%s14824_s1 + $0x1414] ss:$8 sps:$4 sm:$0xff]  }
 0x261   :  { %5984 = vmatpush1.bf16.msra.mxu1 %v10855_v34  ;;  %v10933_v34 = vld [vmem:[%s14824_s1 + $0x1554] ss:$8 sps:$4 sm:$0xff]  }
 0x262   :  { %5985 = vmatprep.subr.bf16.mxu1 %v10863_v51 }
 0x263   :  { %5935 = vmatpush2.bf16.msra.mxu0 %v10858_v56 }
 0x264   :  { %5936 = vmatprep.subr.bf16.mxu0 %v10866_v38  ;;  %v11014_v38 = vld [vmem:[%s14825_s0 + $0xa4] ss:$188 sps:$4 sm:$0xff]  }
 0x265   :  { %5986 = vmatpush2.bf16.msra.mxu1 %v10861_v42 }
 0x266   :  { %5987 = vmatprep.subr.bf16.mxu1 %v10869_v43 }
 0x267   :  { %5937 = vmatpush2.bf16.msra.mxu0 %v10864_v58  ;;  %v8537_v58 = vcombine.low %v112_v44, %v112_v44  ;;  %v10960_v44 = vld [vmem:[%s14824_s1 + $0x1404] ss:$8 sps:$4 sm:$0xff]  }
 0x268   :  { %5938 = vmatprep.subr.bf16.mxu0 %v10872_v0  ;;  %v10936_v0 = vld [vmem:[%s14824_s1 + $0x1444] ss:$8 sps:$4 sm:$0xff]  }
 0x269   :  { %5988 = vmatpush2.bf16.msra.mxu1 %v10867_v46 }
 0x26a   :  { %5989 = vmatprep.subr.bf16.mxu1 %v10875_v57  ;;  %v10931_v57 = vld [vmem:[%s14824_s1 + $0x1550] ss:$8 sps:$4 sm:$0xff]  }
 0x26b   :  { %5939 = vmatpush2.bf16.msra.mxu0 %v10870_v3  ;;  %v11020_v3 = vld [vmem:[%s14825_s0 + $0xac] ss:$188 sps:$4 sm:$0xff]  }
 0x26c   :  { %5940 = vmatprep.subr.bf16.mxu0 %v10878_v5 }
 0x26d   :  { %5990 = vmatpush2.bf16.msra.mxu1 %v10873_v1 }
 0x26e   :  { %5991 = vmatprep.subr.bf16.mxu1 %v10881_v50  ;;  %v10939_v50 = vld [vmem:[%s14824_s1 + $0x1544] ss:$8 sps:$4 sm:$0xff]  }
 0x26f   :  { %5941 = vmatpush2.bf16.msra.mxu0 %v10876_v52 }
 0x270   :  { %5942 = vmatprep.subr.bf16.mxu0 %v10884_v54  ;;  %v10934_v54 = vld [vmem:[%s14824_s1 + $0x1440] ss:$8 sps:$4 sm:$0xff]  }
 0x271   :  { %5992 = vmatpush2.bf16.msra.mxu1 %v10879_v10 }
 0x272   :  { %5993 = vmatprep.subr.bf16.mxu1 %v10887_v8 }
 0x273   :  { %5943 = vmatpush2.bf16.msra.mxu0 %v10882_v59  ;;  %v10942_v59 = vld [vmem:[%s14824_s1 + $0x1434] ss:$8 sps:$4 sm:$0xff]  }
 0x274   :  { %5944 = vmatprep.subr.bf16.mxu0 %v10890_v60 }
 0x275   :  { %5994 = vmatpush2.bf16.msra.mxu1 %v10885_v61 }
 0x276   :  { %5995 = vmatprep.subr.bf16.mxu1 %v10893_v63 }
 0x277   :  { %5945 = vmatpush2.bf16.msra.mxu0 %v10888_v47  ;;  %v10945_v47 = vld [vmem:[%s14824_s1 + $0x1534] ss:$8 sps:$4 sm:$0xff]  }
 0x278   :  { %5946 = vmatprep.subr.bf16.mxu0 %v10896_v2 }
 0x279   :  { %5996 = vmatpush2.bf16.msra.mxu1 %v10891_v17 }
 0x27a   :  { %5997 = vmatprep.subr.bf16.mxu1 %v10899_v4  ;;  %v10948_v4 = vld [vmem:[%s14824_s1 + $0x1424] ss:$8 sps:$4 sm:$0xff]  }
 0x27b   :  { %5947 = vmatpush2.bf16.msra.mxu0 %v10894_v12 }
 0x27c   :  { %5948 = vmatprep.subr.bf16.mxu0 %v10902_v6 }
 0x27d   :  { %5998 = vmatpush2.bf16.msra.mxu1 %v10897_v21  ;;  %v10943_v21 = vld [vmem:[%s14824_s1 + $0x1530] ss:$8 sps:$4 sm:$0xff]  }
 0x27e   :  { %5999 = vmatprep.subr.bf16.mxu1 %v10905_v9  ;;  %v10951_v9 = vld [vmem:[%s14824_s1 + $0x1524] ss:$8 sps:$4 sm:$0xff]  }
 0x27f   :  { %5949 = vmatpush2.bf16.msra.mxu0 %v10900_v23 }
 0x280   :  { %6020 = vmatprep.subr.bf16.mxu0 %v10911_v11  ;;  %v10946_v11 = vld [vmem:[%s14824_s1 + $0x1420] ss:$8 sps:$4 sm:$0xff]  }
 0x281   :  { %6000 = vmatpush2.bf16.msra.mxu1 %v10903_v13  ;;  %v10949_v13 = vld [vmem:[%s14824_s1 + $0x1520] ss:$8 sps:$4 sm:$0xff]  }
 0x282   :  { %v5646_v40 = vpop.f32.mrf.mxu0  ;;  %5951 = vmatmul.mubr.bf16.vlgmr.msra.gmra.mxu0 %v10906_v27  ;;  %6071 = vmatprep.subr.bf16.mxu1 %v10917_v15  ;;  %v10957_v27 = vld [vmem:[%s14824_s1 + $0x1514] ss:$8 sps:$4 sm:$0xff]   ;;  %v10952_v15 = vld [vmem:[%s14824_s1 + $0x1410] ss:$8 sps:$4 sm:$0xff]  }
 0x283   :  { %v5647_v24 = vadd.f32 %v5646_v40, %v13401_v62  ;;  %6021 = vmatpush1.bf16.msra.mxu0 %v10909_v16  ;;  %5960 = vmatprep.mubr.bf16.mxu0 %v8536_v53  ;;  %v10921_v62 = vld [vmem:[%s14824_s1 + $0x1560] ss:$8 sps:$4 sm:$0xff]   ;;  %v10955_v16 = vld [vmem:[%s14824_s1 + $0x1510] ss:$8 sps:$4 sm:$0xff]   ;;  %v10963_v53 = vld [vmem:[%s14824_s1 + $0x1504] ss:$8 sps:$4 sm:$0xff]  }
 0x284   :  { %v5648_v26 = vpop.f32.mrf.mxu0  ;;  %v5697_v45 = vpop.f32.mrf.mxu1  ;;  %6002 = vmatmul.mubr.bf16.vlgmr.msra.gmra.mxu1 %v10912_v18  ;;  %6022 = vmatprep.subr.bf16.mxu0 %v10920_v19  ;;  %v10958_v18 = vld [vmem:[%s14824_s1 + $0x1400] ss:$8 sps:$4 sm:$0xff]   ;;  %v10966_v19 = vld [vmem:[%s14824_s1 + $0x14f4] ss:$8 sps:$4 sm:$0xff]   ;;  %v10964_v40 = vld [vmem:[%s14824_s1 + $0x14f0] ss:$8 sps:$4 sm:$0xff]  }
 0x285   :  { %v5649_v30 = vadd.f32 %v5648_v26, %v13410_v55  ;;  %v13629_v48 = vadd.f32 %v5697_v45, %v5647_v24  ;;  %6072 = vmatpush1.bf16.msra.mxu1 %v10915_v20  ;;  %6011 = vmatprep.mubr.bf16.mxu1 %v8538_v37  ;;  %v10926_v55 = vld [vmem:[%s14824_s1 + $0x1450] ss:$8 sps:$4 sm:$0xff]   ;;  %v10961_v20 = vld [vmem:[%s14824_s1 + $0x1500] ss:$8 sps:$4 sm:$0xff]   ;;  %v10969_v37 = vld [vmem:[%s14824_s1 + $0x15f4] ss:$8 sps:$4 sm:$0xff]  }
 0x286   :  { %v5650_v49 = vpop.f32.mrf.mxu0  ;;  %v5699_v32 = vpop.f32.mrf.mxu1  ;;  %6073 = vmatprep.subr.bf16.mxu1 %v10923_v22  ;;  %v10972_v22 = vld [vmem:[%s14824_s1 + $0x14e4] ss:$8 sps:$4 sm:$0xff]   ;;  %v10967_v24 = vld [vmem:[%s14824_s1 + $0x15f0] ss:$8 sps:$4 sm:$0xff]   ;;  %v10970_v26 = vld [vmem:[%s14824_s1 + $0x14e0] ss:$8 sps:$4 sm:$0xff]  }
 0x287   :  { %v5651_v51 = vadd.f32 %v5650_v49, %v13422_v7  ;;  %v13638_v56 = vadd.f32 %v5699_v32, %v5649_v30  ;;  %6023 = vmatpush1.bf16.msra.mxu0 %v10918_v25  ;;  %v10975_v25 = vld [vmem:[%s14824_s1 + $0x15e4] ss:$8 sps:$4 sm:$0xff]   ;;  %v10978_v45 = vld [vmem:[%s14824_s1 + $0x14d4] ss:$8 sps:$4 sm:$0xff]   ;;  %v10979_v32 = vld [vmem:[%s14824_s1 + $0x15d0] ss:$8 sps:$4 sm:$0xff]  }
 0x288   :  { %v5652_v42 = vpop.f32.mrf.mxu0  ;;  %v5701_v43 = vpop.f32.mrf.mxu1  ;;  %6024 = vmatprep.subr.bf16.mxu0 %v10928_v29  ;;  %v10973_v29 = vld [vmem:[%s14824_s1 + $0x15e0] ss:$8 sps:$4 sm:$0xff]   ;;  %v10981_v30 = vld [vmem:[%s14824_s1 + $0x15d4] ss:$8 sps:$4 sm:$0xff]   ;;  %v10984_v49 = vld [vmem:[%s14824_s1 + $0x14c4] ss:$8 sps:$4 sm:$0xff]  }
 0x289   :  { %v5653_v7 = vadd.f32 %v5652_v42, %v13434_v36  ;;  %v13650_v46 = vadd.f32 %v5701_v43, %v5651_v51  ;;  %6074 = vmatpush1.bf16.msra.mxu1 %v10921_v62  ;;  %v10976_v62 = vld [vmem:[%s14824_s1 + $0x14d0] ss:$8 sps:$4 sm:$0xff]   ;;  %v10990_v51 = vld [vmem:[%s14824_s1 + $0x14b4] ss:$8 sps:$4 sm:$0xff]   ;;  %v10996_v43 = vld [vmem:[%s14824_s1 + $0x14a4] ss:$8 sps:$4 sm:$0xff]  }
 0x28a   :  { %v5656_v5 = vpop.f32.mrf.mxu0  ;;  %v5703_v1 = vpop.f32.mrf.mxu1  ;;  %5961 = vmatmul.mubr.bf16.gmra.mxu0 %v8535_v33  ;;  %6075 = vmatprep.subr.bf16.mxu1 %v10933_v34  ;;  %v10987_v33 = vld [vmem:[%s14824_s1 + $0x15c4] ss:$8 sps:$4 sm:$0xff]   ;;  %v10982_v34 = vld [vmem:[%s14824_s1 + $0x14c0] ss:$8 sps:$4 sm:$0xff]   ;;  %v10988_v42 = vld [vmem:[%s14824_s1 + $0x14b0] ss:$8 sps:$4 sm:$0xff]  }
 0x28b   :  { %v5657_v36 = vadd.f32 %v5656_v5, %v13443_v14  ;;  %v13662_v52 = vadd.f32 %v5703_v1, %v5653_v7  ;;  %6025 = vmatpush1.bf16.msra.mxu0 %v10926_v55  ;;  %6052 = vmatprep.mubr.bf16.mxu0 %v11014_v38  ;;  %v10937_v14 = vld [vmem:[%s14824_s1 + $0x1540] ss:$8 sps:$4 sm:$0xff]   ;;  %v10993_v38 = vld [vmem:[%s14824_s1 + $0x15b4] ss:$8 sps:$4 sm:$0xff]   ;;  %v11000_v1 = vld [vmem:[%s14824_s1 + $0x1490] ss:$8 sps:$4 sm:$0xff]  }
 0x28c   :  { %v5658_v10 = vpop.f32.mrf.mxu0  ;;  %v5707_v8 = vpop.f32.mrf.mxu1  ;;  %6012 = vmatmul.mubr.bf16.gmra.mxu1 %v8537_v58  ;;  %6026 = vmatprep.subr.bf16.mxu0 %v10936_v0  ;;  %v10985_v55 = vld [vmem:[%s14824_s1 + $0x15c0] ss:$8 sps:$4 sm:$0xff]   ;;  %v10991_v58 = vld [vmem:[%s14824_s1 + $0x15b0] ss:$8 sps:$4 sm:$0xff]   ;;  %v10999_v0 = vld [vmem:[%s14824_s1 + $0x15a4] ss:$8 sps:$4 sm:$0xff]  }
 0x28d   :  { %v5659_v60 = vadd.f32 %v5658_v10, %v13451_v31  ;;  %v13671_v61 = vadd.f32 %v5707_v8, %v5657_v36  ;;  %6076 = vmatpush1.bf16.msra.mxu1 %v10931_v57  ;;  %6103 = vmatprep.mubr.bf16.mxu1 %v11020_v3  ;;  %v10940_v31 = vld [vmem:[%s14824_s1 + $0x1430] ss:$8 sps:$4 sm:$0xff]   ;;  %v10994_v7 = vld [vmem:[%s14824_s1 + $0x14a0] ss:$8 sps:$4 sm:$0xff]   ;;  %v11002_v57 = vld [vmem:[%s14824_s1 + $0x1494] ss:$8 sps:$4 sm:$0xff]  }
 0x28e   :  { %v5709_v63 = vpop.f32.mrf.mxu1  ;;  %6077 = vmatprep.subr.bf16.mxu1 %v10939_v50  ;;  %v5660_v2 = vpop.f32.mrf.mxu0  ;;  %v10997_v3 = vld [vmem:[%s14824_s1 + $0x15a0] ss:$8 sps:$4 sm:$0xff]   ;;  %v11005_v5 = vld [vmem:[%s14824_s1 + $0x1594] ss:$8 sps:$4 sm:$0xff]   ;;  %v11008_v50 = vld [vmem:[%s14824_s1 + $0x1484] ss:$8 sps:$4 sm:$0xff]  }
 0x28f   :  { %v13679_v17 = vadd.f32 %v5709_v63, %v5659_v60  ;;  %6027 = vmatpush1.bf16.msra.mxu0 %v10934_v54  ;;  %v11003_v36 = vld [vmem:[%s14824_s1 + $0x1590] ss:$8 sps:$4 sm:$0xff]   ;;  %v11011_v54 = vld [vmem:[%s14824_s1 + $0x1584] ss:$8 sps:$4 sm:$0xff]   ;;  %v11006_v10 = vld [vmem:[%s14824_s1 + $0x1480] ss:$8 sps:$4 sm:$0xff]  }
 0x290   :  { %6028 = vmatprep.subr.bf16.mxu0 %v10942_v59  ;;  %v5661_v12 = vpop.f32.mrf.mxu0  ;;  %v5711_v6 = vpop.f32.mrf.mxu1  ;;  %v859_v8 = vld [vmem:[%s14824_s1 + $0x1730] sm:$0x33]  ;;  %v113_v60 = vld [vmem:[%s14825_s0 + $0x218] sm:$0x33] }
 0x291   :  { %6078 = vmatpush1.bf16.msra.mxu1 %v10937_v14  ;;  %v11017_v59 = vld [vmem:[%s14824_s1 + $0x1674] ss:$8 sps:$4 sm:$0xff]   ;;  %v11009_v14 = vld [vmem:[%s14824_s1 + $0x1580] ss:$8 sps:$4 sm:$0xff]   ;;  %v9289_v2 = vcombine.high %v859_v8, %v859_v8  ;;  %v8540_v12 = vcombine.high %v113_v60, %v113_v60 }
 0x292   :  { %6079 = vmatprep.subr.bf16.mxu1 %v10945_v47  ;;  %v5712_v23 = vpop.f32.mrf.mxu1  ;;  %v11012_v63 = vld [vmem:[%s14825_s0 + $0xa0] ss:$188 sps:$4 sm:$0xff]   ;;  %v11018_v6 = vld [vmem:[%s14825_s0 + $0xa8] ss:$188 sps:$4 sm:$0xff]  }
 0x293   :  { %6029 = vmatpush1.bf16.msra.mxu0 %v10940_v31  ;;  %v114_v47 = vld [vmem:[%s14825_s0 + $0x220] sm:$0x33]  ;;  %v9288_v31 = vcombine.low %v859_v8, %v859_v8 }
 0x294   :  { %6030 = vmatprep.subr.bf16.mxu0 %v10948_v4  ;;  %v11015_v4 = vld [vmem:[%s14824_s1 + $0x1670] ss:$8 sps:$4 sm:$0xff]   ;;  %v11037_v8 = vld [vmem:[%s14824_s1 + $0x1620] ss:$8 sps:$4 sm:$0xff]  }
 0x295   :  { %6080 = vmatpush1.bf16.msra.mxu1 %v10943_v21  ;;  %v11023_v21 = vld [vmem:[%s14824_s1 + $0x1664] ss:$8 sps:$4 sm:$0xff]  }
 0x296   :  { %6081 = vmatprep.subr.bf16.mxu1 %v10951_v9  ;;  %v8542_v9 = vcombine.high %v114_v47, %v114_v47 }
 0x297   :  { %6031 = vmatpush1.bf16.msra.mxu0 %v10946_v11  ;;  %v4995_v11 = vsel %vm4993_vm0, %v9288_v31, 0  ;;  %v11046_v31 = vld [vmem:[%s14824_s1 + $0x16f0] ss:$8 sps:$4 sm:$0xff]  }
 0x298   :  { %6032 = vmatprep.subr.bf16.mxu0 %v10954_v41  ;;  %v11065_v41 = vld [vmem:[%s14824_s1 + $0x1724] ss:$8 sps:$4 sm:$0xff]  }
 0x299   :  { %6082 = vmatpush1.bf16.msra.mxu1 %v10949_v13 }
 0x29a   :  { %6083 = vmatprep.subr.bf16.mxu1 %v10957_v27  ;;  %v11021_v27 = vld [vmem:[%s14824_s1 + $0x1660] ss:$8 sps:$4 sm:$0xff]  }
 0x29b   :  { %6033 = vmatpush1.bf16.msra.mxu0 %v10952_v15 }
 0x29c   :  { %6034 = vmatprep.subr.bf16.mxu0 %v10960_v44 }
 0x29d   :  { %6084 = vmatpush1.bf16.msra.mxu1 %v10955_v16  ;;  %v11028_v16 = vld [vmem:[%s14824_s1 + $0x1654] ss:$8 sps:$4 sm:$0xff]  }
 0x29e   :  { %6085 = vmatprep.subr.bf16.mxu1 %v10963_v53 }
 0x29f   :  { %6035 = vmatpush1.bf16.msra.mxu0 %v10958_v18 }
 0x2a0   :  { %6036 = vmatprep.subr.bf16.mxu0 %v10966_v19 }
 0x2a1   :  { %6086 = vmatpush1.bf16.msra.mxu1 %v10961_v20 }
 0x2a2   :  { %6087 = vmatprep.subr.bf16.mxu1 %v10969_v37  ;;  %v8539_v37 = vcombine.low %v113_v60, %v113_v60  ;;  %v11040_v60 = vld [vmem:[%s14824_s1 + $0x1610] ss:$8 sps:$4 sm:$0xff]  }
 0x2a3   :  { %6037 = vmatpush2.bf16.msra.mxu0 %v10964_v40  ;;  %v11071_v40 = vld [vmem:[%s14824_s1 + $0x1714] ss:$8 sps:$4 sm:$0xff]  }
 0x2a4   :  { %6038 = vmatprep.subr.bf16.mxu0 %v10972_v22 }
 0x2a5   :  { %6088 = vmatpush2.bf16.msra.mxu1 %v10967_v24 }
 0x2a6   :  { %6089 = vmatprep.subr.bf16.mxu1 %v10975_v25  ;;  %v11084_v25 = vld [vmem:[%s14825_s0 + $0xb4] ss:$188 sps:$4 sm:$0xff]  }
 0x2a7   :  { %6039 = vmatpush2.bf16.msra.mxu0 %v10970_v26 }
 0x2a8   :  { %6040 = vmatprep.subr.bf16.mxu0 %v10978_v45 }
 0x2a9   :  { %6090 = vmatpush2.bf16.msra.mxu1 %v10973_v29  ;;  %v8541_v29 = vcombine.low %v114_v47, %v114_v47  ;;  %v11043_v47 = vld [vmem:[%s14824_s1 + $0x1600] ss:$8 sps:$4 sm:$0xff]  }
 0x2aa   :  { %6091 = vmatprep.subr.bf16.mxu1 %v10981_v30  ;;  %v11033_v30 = vld [vmem:[%s14824_s1 + $0x1644] ss:$8 sps:$4 sm:$0xff]  }
 0x2ab   :  { %6041 = vmatpush2.bf16.msra.mxu0 %v10976_v62 }
 0x2ac   :  { %6042 = vmatprep.subr.bf16.mxu0 %v10984_v49  ;;  %v11069_v49 = vld [vmem:[%s14824_s1 + $0x1710] ss:$8 sps:$4 sm:$0xff]  }
 0x2ad   :  { %6092 = vmatpush2.bf16.msra.mxu1 %v10979_v32 }
 0x2ae   :  { %6093 = vmatprep.subr.bf16.mxu1 %v10987_v33 }
 0x2af   :  { %6043 = vmatpush2.bf16.msra.mxu0 %v10982_v34  ;;  %v11077_v34 = vld [vmem:[%s14824_s1 + $0x1704] ss:$8 sps:$4 sm:$0xff]  }
 0x2b0   :  { %6044 = vmatprep.subr.bf16.mxu0 %v10990_v51 }
 0x2b1   :  { %6094 = vmatpush2.bf16.msra.mxu1 %v10985_v55 }
 0x2b2   :  { %6095 = vmatprep.subr.bf16.mxu1 %v10993_v38 }
 0x2b3   :  { %6045 = vmatpush2.bf16.msra.mxu0 %v10988_v42 }
 0x2b4   :  { %6046 = vmatprep.subr.bf16.mxu0 %v10996_v43  ;;  %v11036_v43 = vld [vmem:[%s14824_s1 + $0x1634] ss:$8 sps:$4 sm:$0xff]  }
 0x2b5   :  { %6096 = vmatpush2.bf16.msra.mxu1 %v10991_v58 }
 0x2b6   :  { %6097 = vmatprep.subr.bf16.mxu1 %v10999_v0 }
 0x2b7   :  { %6047 = vmatpush2.bf16.msra.mxu0 %v10994_v7  ;;  %v11294_v7 = vmov 0  }
 0x2b8   :  { %6048 = vmatprep.subr.bf16.mxu0 %v11002_v57 }
 0x2b9   :  { %6098 = vmatpush2.bf16.msra.mxu1 %v10997_v3 }
 0x2ba   :  { %6099 = vmatprep.subr.bf16.mxu1 %v11005_v5 }
 0x2bb   :  { %6049 = vmatpush2.bf16.msra.mxu0 %v11000_v1  ;;  %v11039_v1 = vld [vmem:[%s14824_s1 + $0x1624] ss:$8 sps:$4 sm:$0xff]  }
 0x2bc   :  { %6050 = vmatprep.subr.bf16.mxu0 %v11008_v50 }
 0x2bd   :  { %6100 = vmatpush2.bf16.msra.mxu1 %v11003_v36  ;;  %v11081_v36 = vld [vmem:[%s14825_s0 + $0xb8] ss:$188 sps:$4 sm:$0xff]  }
 0x2be   :  { %6101 = vmatprep.subr.bf16.mxu1 %v11011_v54 }
 0x2bf   :  { %6051 = vmatpush2.bf16.msra.mxu0 %v11006_v10 }
 0x2c0   :  { %6122 = vmatprep.subr.bf16.mxu0 %v11017_v59  ;;  %v11042_v59 = vld [vmem:[%s14824_s1 + $0x1614] ss:$8 sps:$4 sm:$0xff]  }
 0x2c1   :  { %6102 = vmatpush2.bf16.msra.mxu1 %v11009_v14  ;;  %v11045_v14 = vld [vmem:[%s14824_s1 + $0x1604] ss:$8 sps:$4 sm:$0xff]  }
 0x2c2   :  { %v5748_v23 = vpop.f32.mrf.mxu0  ;;  %6053 = vmatmul.mubr.bf16.vlgmr.msra.gmra.mxu0 %v11012_v63  ;;  %9290 = vmatprep.subr.msk.bf16.mxu1 %vm4993_vm0, %v9289_v2  ;;  %v11087_v63 = vld [vmem:[%s14825_s0 + $0x230] ss:$0 sps:$4 sm:$0x33]   ;;  %v11048_v2 = vld [vmem:[%s14824_s1 + $0x16f4] ss:$8 sps:$4 sm:$0xff]  }
 0x2c3   :  { %v5749_v13 = vadd.f32 %v5748_v23, %v13629_v48  ;;  %6123 = vmatpush1.bf16.msra.mxu0 %v11015_v4  ;;  %6062 = vmatprep.mubr.bf16.mxu0 %v8540_v12  ;;  %v11063_v48 = vld [vmem:[%s14824_s1 + $0x1720] ss:$8 sps:$4 sm:$0xff]   ;;  %v11051_v4 = vld [vmem:[%s14824_s1 + $0x16e4] ss:$8 sps:$4 sm:$0xff]  }
 0x2c4   :  { %v5750_v15 = vpop.f32.mrf.mxu0  ;;  %v5799_v44 = vpop.f32.mrf.mxu1  ;;  %6104 = vmatmul.mubr.bf16.vlgmr.msra.gmra.mxu1 %v11018_v6  ;;  %6124 = vmatprep.subr.bf16.mxu0 %v11023_v21  ;;  %v11049_v12 = vld [vmem:[%s14824_s1 + $0x16e0] ss:$8 sps:$4 sm:$0xff]   ;;  %v11054_v6 = vld [vmem:[%s14824_s1 + $0x16d4] ss:$8 sps:$4 sm:$0xff]   ;;  %v11052_v21 = vld [vmem:[%s14824_s1 + $0x16d0] ss:$8 sps:$4 sm:$0xff]  }
 0x2c5   :  { %v5751_v53 = vadd.f32 %v5750_v15, %v13638_v56  ;;  %v13856_v18 = vadd.f32 %v5799_v44, %v5749_v13  ;;  %6113 = vmatprep.mubr.bf16.mxu1 %v8542_v9  ;;  %6182 = vmatpush1.bf16.msra.mxu1 %v4995_v11  ;;  %v11026_v56 = vld [vmem:[%s14824_s1 + $0x1650] ss:$8 sps:$4 sm:$0xff]   ;;  %v11057_v9 = vld [vmem:[%s14824_s1 + $0x16c4] ss:$8 sps:$4 sm:$0xff]   ;;  %v11055_v23 = vld [vmem:[%s14824_s1 + $0x16c0] ss:$8 sps:$4 sm:$0xff]  }
 0x2c6   :  { %v5752_v19 = vpop.f32.mrf.mxu0  ;;  %v5801_v20 = vpop.f32.mrf.mxu1  ;;  %6183 = vmatprep.subr.bf16.mxu1 %v11065_v41  ;;  %v11062_v11 = vld [vmem:[%s14824_s1 + $0x16b4] ss:$8 sps:$4 sm:$0xff]   ;;  %v11060_v41 = vld [vmem:[%s14824_s1 + $0x16b0] ss:$8 sps:$4 sm:$0xff]   ;;  %v11068_v13 = vld [vmem:[%s14824_s1 + $0x16a4] ss:$8 sps:$4 sm:$0xff]  }
 0x2c7   :  { %v5753_v22 = vadd.f32 %v5752_v19, %v13650_v46  ;;  %v13865_v24 = vadd.f32 %v5801_v20, %v5751_v53  ;;  %6125 = vmatpush1.bf16.msra.mxu0 %v11021_v27  ;;  %v11066_v27 = vld [vmem:[%s14824_s1 + $0x16a0] ss:$8 sps:$4 sm:$0xff]   ;;  %v11074_v15 = vld [vmem:[%s14824_s1 + $0x1694] ss:$8 sps:$4 sm:$0xff]   ;;  %v11072_v44 = vld [vmem:[%s14824_s1 + $0x1690] ss:$8 sps:$4 sm:$0xff]  }
 0x2c8   :  { %v5754_v26 = vpop.f32.mrf.mxu0  ;;  %v5803_v45 = vpop.f32.mrf.mxu1  ;;  %6126 = vmatprep.subr.bf16.mxu0 %v11028_v16  ;;  %v11080_v16 = vld [vmem:[%s14824_s1 + $0x1684] ss:$8 sps:$4 sm:$0xff]   ;;  %v11078_v53 = vld [vmem:[%s14824_s1 + $0x1680] ss:$8 sps:$4 sm:$0xff]  }
 0x2c9   :  { %v5755_v46 = vadd.f32 %v5754_v26, %v13662_v52  ;;  %v13877_v62 = vadd.f32 %v5803_v45, %v5753_v22  ;;  %6184 = vmatpush1.bf16.msra.mxu1 %v11063_v48  ;;  %v11031_v52 = vld [vmem:[%s14824_s1 + $0x1640] ss:$8 sps:$4 sm:$0xff]   ;;  %v11082_v19 = vld [vmem:[%s14825_s0 + $0xb0] ss:$188 sps:$4 sm:$0xff]  }
 0x2ca   :  { %v5758_v32 = vpop.f32.mrf.mxu0  ;;  %v5805_v33 = vpop.f32.mrf.mxu1  ;;  %6063 = vmatmul.mubr.bf16.gmra.mxu0 %v8539_v37  ;;  %6185 = vmatprep.subr.bf16.mxu1 %v11071_v40  ;;  %v115_v48 = vld [vmem:[%s14825_s0 + $0x228] sm:$0x33] }
 0x2cb   :  { %v5759_v51 = vadd.f32 %v5758_v32, %v13671_v61  ;;  %v13886_v55 = vadd.f32 %v5805_v33, %v5755_v46  ;;  %6127 = vmatpush1.bf16.msra.mxu0 %v11026_v56  ;;  %6154 = vmatprep.mubr.bf16.mxu0 %v11084_v25  ;;  %v11075_v61 = vld [vmem:[%s14824_s1 + $0x1700] ss:$8 sps:$4 sm:$0xff]   ;;  %v8544_v20 = vcombine.high %v115_v48, %v115_v48 }
 0x2cc   :  { %v5760_v38 = vpop.f32.mrf.mxu0  ;;  %v5809_v42 = vpop.f32.mrf.mxu1  ;;  %6114 = vmatmul.mubr.bf16.gmra.mxu1 %v8541_v29  ;;  %6128 = vmatprep.subr.bf16.mxu0 %v11033_v30  ;;  %v8543_v30 = vcombine.low %v115_v48, %v115_v48 }
 0x2cd   :  { %v5761_v58 = vadd.f32 %v5760_v38, %v13679_v17  ;;  %v13895_v0 = vadd.f32 %v5809_v42, %v5759_v51  ;;  %6186 = vmatpush1.bf16.msra.mxu1 %v11069_v49  ;;  %6205 = vmatprep.mubr.bf16.mxu1 %v11294_v7  ;;  %v11034_v17 = vld [vmem:[%s14824_s1 + $0x1630] ss:$8 sps:$4 sm:$0xff]  }
 0x2ce   :  { %v5811_v57 = vpop.f32.mrf.mxu1  ;;  %v5762_v3 = vpop.f32.mrf.mxu0  ;;  %6187 = vmatprep.subr.bf16.mxu1 %v11077_v34 }
 0x2cf   :  { %v13901_v5 = vadd.f32 %v5811_v57, %v5761_v58  ;;  %6129 = vmatpush1.bf16.msra.mxu0 %v11031_v52 }
 0x2d0   :  { %6130 = vmatprep.subr.bf16.mxu0 %v11036_v43  ;;  %v5763_v50 = vpop.f32.mrf.mxu0  ;;  %v5813_v54 = vpop.f32.mrf.mxu1 }
 0x2d1   :  { %6188 = vmatpush1.bf16.msra.mxu1 %v11075_v61  ;;  %v11092_v54 = vld [vmem:[%s14827_s3 + $0x28] sm:$0xff]  }
 0x2d2   :  { %v5814_v10 = vpop.f32.mrf.mxu1  ;;  %6374 = vmatprep.subr.bf16.mxu1 %v11294_v7 }
 0x2d3   :  { %6131 = vmatpush1.bf16.msra.mxu0 %v11034_v17  ;;  %v11093_v10 = vld [vmem:[%s14827_s3 + $0x8c] sm:$0xff]  }
 0x2d4   :  { %6132 = vmatprep.subr.bf16.mxu0 %v11039_v1  ;;  %9291 = vmatmul.mubr.msk.bf16.vlgmr.msra.gmra.mxu1 %vm4986_vm1, %v11081_v36  ;;  %v11088_v1 = vld [vmem:[%s14827_s3 + $0x38] sm:$0xff]  }
 0x2d5   :  { %6215 = vmatprep.mubr.bf16.mxu1 %v11294_v7  ;;  %6375 = vmatpush1.bf16.msra.mxu1 %v11088_v1  ;;  %v11091_v36 = vld [vmem:[%s14827_s3 + $0x94] sm:$0xff]  }
 0x2d6   :  { %6376 = vmatprep.subr.bf16.mxu1 %v11294_v7 }
 0x2d7   :  { %6133 = vmatpush1.bf16.msra.mxu0 %v11037_v8  ;;  %v11094_v8 = vld [vmem:[%s14827_s3 + $0x20] sm:$0xff]  }
 0x2d8   :  { %6134 = vmatprep.subr.bf16.mxu0 %v11042_v59  ;;  %v11095_v59 = vld [vmem:[%s14827_s3 + $0x84] sm:$0xff]  }
 0x2db   :  { %6135 = vmatpush1.bf16.msra.mxu0 %v11040_v60  ;;  %v11096_v60 = vld [vmem:[%s14827_s3 + $0x18] sm:$0xff]  }
 0x2dc   :  { %6136 = vmatprep.subr.bf16.mxu0 %v11045_v14  ;;  %9292 = vmatmul.mubr.msk.bf16.gmra.mxu1 %vm4986_vm1, %v11087_v63  ;;  %v11097_v14 = vld [vmem:[%s14827_s3 + $0x7c] sm:$0xff]   ;;  %v11098_v63 = vld [vmem:[%s14827_s3 + $0x10] sm:$0xff]  }
 0x2df   :  { %6137 = vmatpush1.bf16.msra.mxu0 %v11043_v47  ;;  %v11099_v47 = vld [vmem:[%s14827_s3 + $0x74] sm:$0xff]  }
 0x2e0   :  { %6138 = vmatprep.subr.bf16.mxu0 %v11048_v2  ;;  %v11100_v2 = vld [vmem:[%s14827_s3 + $0x8] sm:$0xff]  }
 0x2e3   :  { %6139 = vmatpush2.bf16.msra.mxu0 %v11046_v31  ;;  %v11101_v31 = vld [vmem:[%s14827_s3 + $0x6c] sm:$0xff]  }
 0x2e4   :  { %6140 = vmatprep.subr.bf16.mxu0 %v11051_v4  ;;  %v11102_v4 = vld [vmem:[%s14827_s3] sm:$0xff]  }
 0x2e7   :  { %6141 = vmatpush2.bf16.msra.mxu0 %v11049_v12  ;;  %v11103_v12 = vld [vmem:[%s14827_s3 + $0x64] sm:$0xff]  }
 0x2e8   :  { %6142 = vmatprep.subr.bf16.mxu0 %v11054_v6  ;;  %v11104_v6 = vld [vmem:[%s14827_s3 + $0x60] ss:$0 sps:$4 sm:$0x77]  }
 0x2eb   :  { %6143 = vmatpush2.bf16.msra.mxu0 %v11052_v21  ;;  %v6372_v21 = vsel %vm6370_vm2, %v11104_v6, 0 }
 0x2ec   :  { %6144 = vmatprep.subr.bf16.mxu0 %v11057_v9  ;;  %v11105_v9 = vld [vmem:[%s14827_s3 + $0xc4] ss:$0 sps:$4 sm:$0x77]  }
 0x2ef   :  { %6145 = vmatpush2.bf16.msra.mxu0 %v11055_v23 }
 0x2f0   :  { %6146 = vmatprep.subr.bf16.mxu0 %v11062_v11 }
 0x2f3   :  { %6147 = vmatpush2.bf16.msra.mxu0 %v11060_v41  ;;  %v6529_v41 = vsel %vm6370_vm2, %v11105_v9, 0 }
 0x2f4   :  { %6148 = vmatprep.subr.bf16.mxu0 %v11068_v13 }
 0x2f7   :  { %6149 = vmatpush2.bf16.msra.mxu0 %v11066_v27 }
 0x2f8   :  { %6150 = vmatprep.subr.bf16.mxu0 %v11074_v15  ;;  %v11106_v15 = vld [vmem:[%s14827_s3 + $0x58] sm:$0xff]  }
 0x2fb   :  { %6151 = vmatpush2.bf16.msra.mxu0 %v11072_v44 }
 0x2fc   :  { %6152 = vmatprep.subr.bf16.mxu0 %v11080_v16 }
 0x2ff   :  { %6153 = vmatpush2.bf16.msra.mxu0 %v11078_v53 }
 0x300   :  { %6531 = vmatprep.subr.bf16.mxu0 %v11294_v7 }
 0x302   :  { %v5850_v37 = vpop.f32.mrf.mxu0  ;;  %6155 = vmatmul.mubr.bf16.vlgmr.msra.gmra.mxu0 %v11082_v19  ;;  %v11107_v19 = vld [vmem:[%s14827_s3 + $0xbc] sm:$0xff]  }
 0x303   :  { %v5851_v40 = vadd.f32 %v5850_v37, %v13856_v18  ;;  %6164 = vmatprep.mubr.bf16.mxu0 %v8544_v20 }
 0x304   :  { %v5852_v22 = vpop.f32.mrf.mxu0  ;;  %v5901_v56 = vpop.f32.mrf.mxu1 }
 0x305   :  { %v5853_v25 = vadd.f32 %v5852_v22, %v13865_v24  ;;  %v13991_v26 = vadd.f32 %v5901_v56, %v5851_v40  ;;  %v11108_v56 = vld [vmem:[%s14827_s3 + $0x50] sm:$0xff]  }
 0x306   :  { %v5854_v45 = vpop.f32.mrf.mxu0  ;;  %v5903_v29 = vpop.f32.mrf.mxu1 }
 0x307   :  { %v5855_v46 = vadd.f32 %v5854_v45, %v13877_v62  ;;  %v13994_v49 = vadd.f32 %v5903_v29, %v5853_v25 }
 0x308   :  { %v5856_v32 = vpop.f32.mrf.mxu0  ;;  %v5905_v33 = vpop.f32.mrf.mxu1 }
 0x309   :  { %v5857_v34 = vadd.f32 %v5856_v32, %v13886_v55  ;;  %v13997_v51 = vadd.f32 %v5905_v33, %v5855_v46 }
 0x30a   :  { %v5860_v18 = vpop.f32.mrf.mxu0  ;;  %v5907_v52 = vpop.f32.mrf.mxu1  ;;  %6165 = vmatmul.mubr.bf16.gmra.mxu0 %v8543_v30  ;;  %v11109_v30 = vld [vmem:[%s14827_s3 + $0xb4] sm:$0xff]  }
 0x30b   :  { %v5861_v24 = vadd.f32 %v5860_v18, %v13895_v0  ;;  %v14000_v38 = vadd.f32 %v5907_v52, %v5857_v34  ;;  %v11089_v0 = vld [vmem:[%s14827_s3 + $0x9c] sm:$0xff]   ;;  %v11110_v34 = vld [vmem:[%s14827_s3 + $0x48] sm:$0xff]  }
 0x30c   :  { %v5862_v42 = vpop.f32.mrf.mxu0  ;;  %v5911_v43 = vpop.f32.mrf.mxu1  ;;  %6532 = vmatpush1.bf16.msra.mxu0 %v11089_v0 }
 0x30d   :  { %v5863_v58 = vadd.f32 %v5862_v42, %v13901_v5  ;;  %v14003_v62 = vadd.f32 %v5911_v43, %v5861_v24  ;;  %v11090_v5 = vld [vmem:[%s14827_s3 + $0x30] sm:$0xff]   ;;  %6533 = vmatprep.subr.bf16.mxu0 %v11294_v7 }
 0x30e   :  { %v5913_v61 = vpop.f32.mrf.mxu1  ;;  %v5864_v57 = vpop.f32.mrf.mxu0  ;;  %6377 = vmatpush1.bf16.msra.mxu1 %v11090_v5 }
 0x30f   :  { %v14005_v3 = vadd.f32 %v5913_v61, %v5863_v58  ;;  %6378 = vmatprep.subr.bf16.mxu1 %v11294_v7  ;;  %v11113_v57 = vld [vmem:[%s14827_s3 + $0xa4] sm:$0xff]  }
 0x310   :  { %v5865_v55 = vpop.f32.mrf.mxu0  ;;  %v5915_v17 = vpop.f32.mrf.mxu1  ;;  %6534 = vmatpush1.bf16.msra.mxu0 %v11091_v36 }
 0x311   :  { %6535 = vmatprep.subr.bf16.mxu0 %v11294_v7 }
 0x312   :  { %v5916_v50 = vpop.f32.mrf.mxu1  ;;  %6379 = vmatpush1.bf16.msra.mxu1 %v11092_v54 }
 0x313   :  { %6380 = vmatprep.subr.bf16.mxu1 %v11294_v7 }
 0x314   :  { %6536 = vmatpush1.bf16.msra.mxu0 %v11093_v10 }
 0x315   :  { %6537 = vmatprep.subr.bf16.mxu0 %v11294_v7 }
 0x316   :  { %6381 = vmatpush1.bf16.msra.mxu1 %v11094_v8 }
 0x317   :  { %6382 = vmatprep.subr.bf16.mxu1 %v11294_v7 }
 0x318   :  { %6538 = vmatpush1.bf16.msra.mxu0 %v11095_v59 }
 0x319   :  { %6539 = vmatprep.subr.bf16.mxu0 %v11294_v7 }
 0x31a   :  { %6383 = vmatpush1.bf16.msra.mxu1 %v11096_v60 }
 0x31b   :  { %6384 = vmatprep.subr.bf16.mxu1 %v11294_v7 }
 0x31c   :  { %6540 = vmatpush1.bf16.msra.mxu0 %v11097_v14 }
 0x31d   :  { %6541 = vmatprep.subr.bf16.mxu0 %v11294_v7 }
 0x31e   :  { %6385 = vmatpush1.bf16.msra.mxu1 %v11098_v63 }
 0x31f   :  { %6386 = vmatprep.subr.bf16.mxu1 %v11294_v7 }
 0x320   :  { %6542 = vmatpush1.bf16.msra.mxu0 %v11099_v47 }
 0x321   :  { %6543 = vmatprep.subr.bf16.mxu0 %v11294_v7 }
 0x322   :  { %6387 = vmatpush1.bf16.msra.mxu1 %v11100_v2 }
 0x323   :  { %6388 = vmatprep.subr.bf16.mxu1 %v11294_v7 }
 0x324   :  { %6544 = vmatpush1.bf16.msra.mxu0 %v11101_v31 }
 0x325   :  { %6545 = vmatprep.subr.bf16.mxu0 %v11294_v7 }
 0x326   :  { %6389 = vmatpush1.bf16.msra.mxu1 %v11102_v4 }
 0x327   :  { %6396 = vmatprep.subr.bf16.mxu1 %v11294_v7 }
 0x328   :  { %6546 = vmatpush1.bf16.msra.mxu0 %v11103_v12 }
 0x329   :  { %6553 = vmatprep.subr.bf16.mxu0 %v11294_v7 }
 0x32a   :  { %6397 = vmatpush2.bf16.msra.mxu1 %v6372_v21 }
 0x32b   :  { %6398 = vmatprep.subr.bf16.mxu1 %v11294_v7 }
 0x32c   :  { %6554 = vmatpush2.bf16.msra.mxu0 %v6529_v41 }
 0x32d   :  { %6555 = vmatprep.subr.bf16.mxu0 %v11294_v7 }
 0x32e   :  { %6399 = vmatpush2.bf16.msra.mxu1 %v11106_v15 }
 0x32f   :  { %6400 = vmatprep.subr.bf16.mxu1 %v11294_v7 }
 0x330   :  { %6556 = vmatpush2.bf16.msra.mxu0 %v11107_v19 }
 0x331   :  { %6557 = vmatprep.subr.bf16.mxu0 %v11294_v7 }
 0x332   :  { %6401 = vmatpush2.bf16.msra.mxu1 %v11108_v56 }
 0x333   :  { %6402 = vmatprep.subr.bf16.mxu1 %v11294_v7 }
 0x334   :  { %6558 = vmatpush2.bf16.msra.mxu0 %v11109_v30 }
 0x335   :  { %6559 = vmatprep.subr.bf16.mxu0 %v11294_v7 }
 0x336   :  { %6403 = vmatpush2.bf16.msra.mxu1 %v11110_v34 }
 0x337   :  { %6404 = vmatprep.subr.bf16.mxu1 %v11294_v7 }
 0x342   :  { %v5952_v23 = vpop.f32.mrf.mxu0 }
 0x343   :  { %v5953_v11 = vadd.f32 %v5952_v23, %v13991_v26 }
 0x344   :  { %v5954_v13 = vpop.f32.mrf.mxu0  ;;  %v6003_v27 = vpop.f32.mrf.mxu1 }
 0x345   :  { %v5955_v44 = vadd.f32 %v5954_v13, %v13994_v49  ;;  %v14085_v16 = vadd.f32 %v6003_v27, %v5953_v11 }
 0x346   :  { %v5956_v53 = vpop.f32.mrf.mxu0  ;;  %v6005_v48 = vpop.f32.mrf.mxu1 }
 0x347   :  { %v5957_v20 = vadd.f32 %v5956_v53, %v13997_v51  ;;  %v14092_v37 = vadd.f32 %v6005_v48, %v5955_v44 }
 0x348   :  { %v5958_v40 = vpop.f32.mrf.mxu0  ;;  %v6007_v22 = vpop.f32.mrf.mxu1 }
 0x349   :  { %v5959_v25 = vadd.f32 %v5958_v40, %v14000_v38  ;;  %v6008_v26 = vadd.f32 %v6007_v22, %v5957_v20  ;;  %v11111_v38 = vld [vmem:[%s14827_s3 + $0xac] sm:$0xff]  }
 0x34a   :  { %v5962_v45 = vpop.f32.mrf.mxu0  ;;  %v6009_v29 = vpop.f32.mrf.mxu1  ;;  %6560 = vmatpush2.bf16.msra.mxu0 %v11111_v38 }
 0x34b   :  { %v5963_v46 = vadd.f32 %v5962_v45, %v14003_v62  ;;  %v6010_v49 = vadd.f32 %v6009_v29, %v5959_v25  ;;  %v11112_v62 = vld [vmem:[%s14827_s3 + $0x40] sm:$0xff]   ;;  %6561 = vmatprep.subr.bf16.mxu0 %v11294_v7 }
 0x34c   :  { %v5964_v32 = vpop.f32.mrf.mxu0  ;;  %v6013_v33 = vpop.f32.mrf.mxu1  ;;  %6405 = vmatpush2.bf16.msra.mxu1 %v11112_v62 }
 0x34d   :  { %v5965_v51 = vadd.f32 %v5964_v32, %v14005_v3  ;;  %v6014_v18 = vadd.f32 %v6013_v33, %v5963_v46  ;;  %6688 = vmatprep.subr.bf16.mxu1 %v11294_v7 }
 0x34e   :  { %v6015_v52 = vpop.f32.mrf.mxu1  ;;  %v5966_v24 = vpop.f32.mrf.mxu0  ;;  %6562 = vmatpush2.bf16.msra.mxu0 %v11113_v57 }
 0x34f   :  { %v6016_v42 = vadd.f32 %v6015_v52, %v5965_v51  ;;  %6845 = vmatprep.subr.bf16.mxu0 %v11294_v7 }
 0x350   :  { %v5967_v43 = vpop.f32.mrf.mxu0  ;;  %v6017_v58 = vpop.f32.mrf.mxu1 }
 0x352   :  { %v6018_v61 = vpop.f32.mrf.mxu1 }
 0x382   :  { %v6054_v3 = vpop.f32.mrf.mxu0 }
 0x383   :  { %v6055_v11 = vadd.f32 %v6054_v3, %v14085_v16 }
 0x384   :  { %v6056_v55 = vpop.f32.mrf.mxu0  ;;  %v6105_v17 = vpop.f32.mrf.mxu1 }
 0x385   :  { %v6057_v41 = vadd.f32 %v6056_v55, %v14092_v37  ;;  %v6106_v13 = vadd.f32 %v6105_v17, %v6055_v11  ;;  %v11130_v11 = vld [vmem:[%s14827_s3 + $0xd8] sm:$0xff]  }
 0x386   :  { %v6058_v1 = vpop.f32.mrf.mxu0  ;;  %v6107_v0 = vpop.f32.mrf.mxu1 }
 0x387   :  { %v6059_v27 = vadd.f32 %v6058_v1, %v6008_v26  ;;  %v6108_v53 = vadd.f32 %v6107_v0, %v6057_v41  ;;  %v11131_v41 = vld [vmem:[%s14827_s3 + $0x13c] sm:$0xff]  }
 0x388   :  { %v6060_v50 = vpop.f32.mrf.mxu0  ;;  %v6109_v5 = vpop.f32.mrf.mxu1 }
 0x389   :  { %v6061_v15 = vadd.f32 %v6060_v50, %v6010_v49  ;;  %v6110_v20 = vadd.f32 %v6109_v5, %v6059_v27  ;;  %v11116_v50 = vld [vmem:[%s14827_s3 + $0x100] sm:$0xff]   ;;  %v11133_v27 = vld [vmem:[%s14827_s3 + $0x134] sm:$0xff]  }
 0x38a   :  { %v6064_v36 = vpop.f32.mrf.mxu0  ;;  %v6111_v54 = vpop.f32.mrf.mxu1 }
 0x38b   :  { %v6065_v40 = vadd.f32 %v6064_v36, %v6014_v18  ;;  %v6112_v56 = vadd.f32 %v6111_v54, %v6061_v15  ;;  %v11134_v15 = vld [vmem:[%s14827_s3 + $0xc8] sm:$0xff]  }
 0x38c   :  { %v6066_v10 = vpop.f32.mrf.mxu0  ;;  %v6115_v8 = vpop.f32.mrf.mxu1 }
 0x38d   :  { %v6067_v45 = vadd.f32 %v6066_v10, %v6016_v42  ;;  %v6116_v46 = vadd.f32 %v6115_v8, %v6065_v40  ;;  %v11138_v40 = vld [vmem:[%s14827_s3 + $0x120] sm:$0xff]  }
 0x38e   :  { %v6117_v59 = vpop.f32.mrf.mxu1  ;;  %v6068_v60 = vpop.f32.mrf.mxu0 }
 0x38f   :  { %v6118_v34 = vadd.f32 %v6117_v59, %v6067_v45  ;;  %v11142_v45 = vld [vmem:[%s14827_s3 + $0x110] sm:$0xff]  }
 0x390   :  { %v6069_v14 = vpop.f32.mrf.mxu0  ;;  %v6119_v63 = vpop.f32.mrf.mxu1 }
 0x391   :  { %v11120_v14 = vld [vmem:[%s14827_s3 + $0x164] sm:$0xff]  }
 0x392   :  { %v6120_v47 = vpop.f32.mrf.mxu1 }
 0x393   :  { %v11122_v47 = vld [vmem:[%s14827_s3 + $0xf8] sm:$0xff]  }
 0x394   :  { %v6207_v2 = vpop.f32.mrf.mxu1 }
 0x396   :  { %v6209_v31 = vpop.f32.mrf.mxu1 }
 0x398   :  { %v6211_v4 = vpop.f32.mrf.mxu1 }
 0x39a   :  { %v6213_v12 = vpop.f32.mrf.mxu1 }
 0x39c   :  { %v6217_v6 = vpop.f32.mrf.mxu1 }
 0x39e   :  { %v6219_v21 = vpop.f32.mrf.mxu1 }
 0x3a0   :  { %v6221_v9 = vpop.f32.mrf.mxu1 }
 0x3a1   :  { %v11128_v9 = vld [vmem:[%s14827_s3 + $0xe0] sm:$0xff]  }
 0x3a2   :  { %v6222_v23 = vpop.f32.mrf.mxu1 }
 0x3a3   :  { %v11129_v23 = vld [vmem:[%s14827_s3 + $0x144] sm:$0xff]  }
 0x3c2   :  { %v6156_v44 = vpop.f32.mrf.mxu0 }
 0x3c3   :  { %v6157_v48 = vadd.f32 %v6156_v44, %v6106_v13  ;;  %v11132_v13 = vld [vmem:[%s14827_s3 + $0xd0] sm:$0xff]   ;;  %v11136_v44 = vld [vmem:[%s14827_s3 + $0x128] ss:$0 sps:$4 sm:$0x77]  }
 0x3c4   :  { %v6158_v19 = vpop.f32.mrf.mxu0 }
 0x3c5   :  { %v6159_v22 = vadd.f32 %v6158_v19, %v6108_v53  ;;  %v6208_v29 = vadd.f32 %v6207_v2, %v6157_v48  ;;  %v11135_v53 = vld [vmem:[%s14827_s3 + $0x12c] sm:$0xff]   ;;  %v6686_v19 = vsel %vm6370_vm2, %v11136_v44, 0 }
 0x3c6   :  { %v6160_v25 = vpop.f32.mrf.mxu0  ;;  %v11137_v48 = vld [vmem:[%s14827_s3 + $0x18c] ss:$0 sps:$4 sm:$0x77]  }
 0x3c7   :  { %v6210_v30 = vadd.f32 %v6209_v31, %v6159_v22  ;;  %v6161_v16 = vadd.f32 %v6160_v25, %v6110_v20  ;;  %v11123_v31 = vld [vmem:[%s14827_s3 + $0x15c] sm:$0xff]   ;;  %v6843_v20 = vsel %vm6370_vm2, %v11137_v48, 0  ;;  %v11139_v22 = vld [vmem:[%s14827_s3 + $0x184] sm:$0xff]   ;;  %v11183_v48 = vld [vmem:[%s14827_s3 + $0x2ec] sm:$0xff]  }
 0x3c8   :  { %v6162_v26 = vpop.f32.mrf.mxu0  ;;  %v11141_v25 = vld [vmem:[%s14827_s3 + $0x17c] sm:$0xff]  }
 0x3c9   :  { %v9733_v49 = vpack.c.bf16 %v6210_v30, %v6208_v29  ;;  %v6163_v32 = vadd.f32 %v6162_v26, %v6112_v56  ;;  %v6212_v51 = vadd.f32 %v6211_v4, %v6161_v16  ;;  %v11124_v4 = vld [vmem:[%s14827_s3 + $0xf0] sm:$0xff]   ;;  %v11140_v56 = vld [vmem:[%s14827_s3 + $0x118] sm:$0xff]   ;;  %v11144_v30 = vld [vmem:[%s14827_s3 + $0x108] sm:$0xff]  }
 0x3ca   :  { %v6166_v33 = vpop.f32.mrf.mxu0  ;;  %v11143_v29 = vld [vmem:[%s14827_s3 + $0x174] sm:$0xff]   ;;  %v11145_v26 = vld [vmem:[%s14827_s3 + $0x16c] sm:$0xff]  }
 0x3cb   :  { %6247 = vst.msk [vmem:[#allocation2] sm:$0xff] %vm14125_vm5, %v9733_v49  ;;  %v6214_v18 = vadd.f32 %v6213_v12, %v6163_v32  ;;  %v6167_v52 = vadd.f32 %v6166_v33, %v6116_v46  ;;  %v11125_v12 = vld [vmem:[%s14827_s3 + $0x154] sm:$0xff]   ;;  %v11147_v32 = vld [vmem:[%s14827_s3 + $0x1c8] sm:$0xff]  }
 0x3cc   :  { %v6168_v24 = vpop.f32.mrf.mxu0 }
 0x3cd   :  { %v9734_v38 = vpack.c.bf16 %v6214_v18, %v6212_v51  ;;  %v6169_v42 = vadd.f32 %v6168_v24, %v6118_v34  ;;  %v6218_v58 = vadd.f32 %v6217_v6, %v6167_v52  ;;  %v11126_v6 = vld [vmem:[%s14827_s3 + $0xe8] sm:$0xff]  }
 0x3ce   :  { %v6170_v43 = vpop.f32.mrf.mxu0  ;;  %v11150_v18 = vld [vmem:[%s14827_s3 + $0x22c] sm:$0xff]  }
 0x3cf   :  { %6248 = vst.msk [vmem:[#allocation2 + $0x8] sm:$0xff] %vm14125_vm5, %v9734_v38  ;;  %v6220_v62 = vadd.f32 %v6219_v21, %v6169_v42  ;;  %v11127_v21 = vld [vmem:[%s14827_s3 + $0x14c] sm:$0xff]   ;;  %v11152_v38 = vld [vmem:[%s14827_s3 + $0x1c0] sm:$0xff]   ;;  %v11154_v43 = vld [vmem:[%s14827_s3 + $0x1b8] sm:$0xff]  }
 0x3d0   :  { %v6171_v61 = vpop.f32.mrf.mxu0  ;;  %v11153_v42 = vld [vmem:[%s14827_s3 + $0x224] sm:$0xff]  }
 0x3d1   :  { %v9735_v57 = vpack.c.bf16 %v6220_v62, %v6218_v58  ;;  %v11155_v58 = vld [vmem:[%s14827_s3 + $0x21c] sm:$0xff]   ;;  %v11156_v62 = vld [vmem:[%s14827_s3 + $0x1b0] sm:$0xff]  }
 0x3d2   :  { %v6259_v3 = vld [vmem:[#allocation2] sm:$0x11]  ;;  %v6415_v55 = vld [vmem:[#allocation2] sm:$0x22]  ;;  %v14134_v17 = vld [vmem:[#allocation2] sm:$0x44] }
 0x3d3   :  { %6251 = vst.msk [vmem:[#allocation2 + $0x10] sm:$0x33] %vm6250_vm7, %v9735_v57  ;;  %v9297_v1 = vcombine.low %v6259_v3, %v6259_v3  ;;  %v9298_v0 = vcombine.high %v6259_v3, %v6259_v3  ;;  %v9338_v5 = vcombine.low %v6415_v55, %v6415_v55  ;;  %v9339_v36 = vcombine.high %v6415_v55, %v6415_v55  ;;  %v14139_v54 = vld [vmem:[#allocation2] sm:$0x88]  ;;  %v11157_v61 = vld [vmem:[%s14827_s3 + $0x214] sm:$0xff]   ;;  %v11158_v57 = vld [vmem:[%s14827_s3 + $0x1a8] sm:$0xff]  }
 0x3d4   :  { %v9380_v10 = vcombine.high %v14134_v17, %v14134_v17  ;;  %v9421_v8 = vcombine.high %v14139_v54, %v14139_v54  ;;  %v9379_v16 = vcombine.low %v14134_v17, %v14134_v17  ;;  %v9420_v49 = vcombine.low %v14139_v54, %v14139_v54  ;;  %v11159_v3 = vld [vmem:[%s14827_s3 + $0x20c] sm:$0xff]   ;;  %v11160_v55 = vld [vmem:[%s14827_s3 + $0x1a0] sm:$0xff]   ;;  %v11167_v54 = vld [vmem:[%s14827_s3 + $0x254] ss:$0 sps:$4 sm:$0x77]  }
 0x3d5   :  { %9312 = vmatprep.mubr.msk.bf16.mxu1 %vm6366_vm8, %v9298_v0  ;;  %v6447_v59 = vrot.slane %v9338_v5, 1  ;;  %v6448_v60 = vrot.slane %v9339_v36, 1  ;;  %v11161_v17 = vld [vmem:[%s14827_s3 + $0x204] sm:$0xff]   ;;  %v11163_v0 = vld [vmem:[%s14827_s3 + $0x1fc] sm:$0xff]   ;;  %v11165_v36 = vld [vmem:[%s14827_s3 + $0x1f4] sm:$0xff]  }
 0x3d6   :  { %6407 = vmatmul.mubr.bf16.vlgmr.msra.gmra.mxu1 %v9297_v1  ;;  %v6605_v63 = vrot.slane %v9380_v10, 2  ;;  %v6762_v2 = vrot.slane %v9421_v8, 3  ;;  %v14248_v37 = vld [vmem:[#allocation2 + $0x8] sm:$0x22]  ;;  %v14254_v46 = vld [vmem:[#allocation2 + $0x8] sm:$0x11] }
 0x3d7   :  { %6689 = vmatpush1.bf16.msra.mxu1 %v11116_v50  ;;  %9353 = vmatprep.mubr.msk.bf16.mxu0 %vm6366_vm8, %v6448_v60  ;;  %v9503_v33 = vcombine.high %v14248_v37, %v14248_v37  ;;  %v6604_v34 = vrot.slane %v9379_v16, 2  ;;  %v9462_v51 = vcombine.high %v14254_v46, %v14254_v46  ;;  %v6761_v52 = vrot.slane %v9420_v49, 3  ;;  %v11162_v1 = vld [vmem:[%s14827_s3 + $0x198] sm:$0xff]   ;;  %v11164_v50 = vld [vmem:[%s14827_s3 + $0x190] sm:$0xff]   ;;  %v11193_v16 = vld [vmem:[%s14827_s3 + $0x2c4] sm:$0xff]  }
 0x3d8   :  { %9394 = vmatprep.mubr.msk.bf16.mxu1 %vm6366_vm8, %v6605_v63  ;;  %6564 = vmatmul.mubr.bf16.vlgmr.msra.gmra.mxu0 %v6447_v59  ;;  %v11166_v5 = vld [vmem:[%s14827_s3 + $0x1f0] ss:$0 sps:$4 sm:$0x77]   ;;  %v7155_v8 = vsel %vm6370_vm2, %v11167_v54, 0  ;;  %v11168_v59 = vld [vmem:[%s14827_s3 + $0x1e8] sm:$0xff]   ;;  %v11215_v54 = vld [vmem:[%s14827_s3 + $0x3b4] sm:$0xff]  }
 0x3d9   :  { %6846 = vmatpush1.bf16.msra.mxu0 %v11120_v14  ;;  %6690 = vmatprep.subr.bf16.mxu1 %v11294_v7  ;;  %v7074_v24 = vrot.slane %v9503_v33, 1  ;;  %v6998_v10 = vsel %vm6370_vm2, %v11166_v5, 0  ;;  %v11169_v60 = vld [vmem:[%s14827_s3 + $0x24c] sm:$0xff]   ;;  %v11170_v14 = vld [vmem:[%s14827_s3 + $0x1e0] sm:$0xff]  }
 0x3da   :  { %9435 = vmatprep.mubr.msk.bf16.mxu0 %vm6366_vm8, %v6762_v2  ;;  %6847 = vmatprep.subr.bf16.mxu0 %v11294_v7  ;;  %v11171_v63 = vld [vmem:[%s14827_s3 + $0x244] sm:$0xff]   ;;  %v11173_v2 = vld [vmem:[%s14827_s3 + $0x23c] sm:$0xff]  }
 0x3db   :  { %6691 = vmatpush1.bf16.msra.mxu1 %v11122_v47  ;;  %v11172_v47 = vld [vmem:[%s14827_s3 + $0x1d8] sm:$0xff]  }
 0x3dc   :  { %6692 = vmatprep.subr.bf16.mxu1 %v11294_v7  ;;  %v11197_v49 = vld [vmem:[%s14827_s3 + $0x31c] ss:$0 sps:$4 sm:$0x77]  }
 0x3dd   :  { %6848 = vmatpush1.bf16.msra.mxu0 %v11123_v31  ;;  %v14362_v31 = vld [vmem:[#allocation2 + $0x8] sm:$0x44]  ;;  %v7469_v33 = vsel %vm6370_vm2, %v11197_v49, 0 }
 0x3de   :  { %6849 = vmatprep.subr.bf16.mxu0 %v11294_v7 }
 0x3df   :  { %6693 = vmatpush1.bf16.msra.mxu1 %v11124_v4  ;;  %v11174_v4 = vld [vmem:[%s14827_s3 + $0x1d0] sm:$0xff]  }
 0x3e0   :  { %6694 = vmatprep.subr.bf16.mxu1 %v11294_v7 }
 0x3e1   :  { %6850 = vmatpush1.bf16.msra.mxu0 %v11125_v12  ;;  %v14368_v12 = vld [vmem:[#allocation2 + $0x8] sm:$0x88] }
 0x3e2   :  { %6851 = vmatprep.subr.bf16.mxu0 %v11294_v7 }
 0x3e3   :  { %6695 = vmatpush1.bf16.msra.mxu1 %v11126_v6  ;;  %v11175_v6 = vld [vmem:[%s14827_s3 + $0x234] sm:$0xff]  }
 0x3e4   :  { %6696 = vmatprep.subr.bf16.mxu1 %v11294_v7 }
 0x3e5   :  { %6852 = vmatpush1.bf16.msra.mxu0 %v11127_v21  ;;  %v9544_v21 = vcombine.high %v14362_v31, %v14362_v31 }
 0x3e6   :  { %6853 = vmatprep.subr.bf16.mxu0 %v11294_v7 }
 0x3e7   :  { %6697 = vmatpush1.bf16.msra.mxu1 %v11128_v9  ;;  %v9502_v9 = vcombine.low %v14248_v37, %v14248_v37  ;;  %v11194_v37 = vld [vmem:[%s14827_s3 + $0x258] sm:$0xff]  }
 0x3e8   :  { %6698 = vmatprep.subr.bf16.mxu1 %v11294_v7 }
 0x3e9   :  { %6854 = vmatpush1.bf16.msra.mxu0 %v11129_v23  ;;  %v11177_v23 = vld [vmem:[%s14827_s3 + $0x290] sm:$0xff]  }
 0x3ea   :  { %6855 = vmatprep.subr.bf16.mxu0 %v11294_v7 }
 0x3eb   :  { %6699 = vmatpush1.bf16.msra.mxu1 %v11130_v11  ;;  %v9585_v11 = vcombine.high %v14368_v12, %v14368_v12 }
 0x3ec   :  { %6700 = vmatprep.subr.bf16.mxu1 %v11294_v7 }
 0x3ed   :  { %6856 = vmatpush1.bf16.msra.mxu0 %v11131_v41  ;;  %v9461_v41 = vcombine.low %v14254_v46, %v14254_v46  ;;  %v7388_v44 = vrot.slane %v9585_v11, 3  ;;  %v11195_v46 = vld [vmem:[%s14827_s3 + $0x2bc] sm:$0xff]  }
 0x3ee   :  { %6857 = vmatprep.subr.bf16.mxu0 %v11294_v7 }
 0x3ef   :  { %6701 = vmatpush1.bf16.msra.mxu1 %v11132_v13  ;;  %v7231_v13 = vrot.slane %v9544_v21, 2  ;;  %v11227_v21 = vld [vmem:[%s14827_s3 + $0x384] sm:$0xff]  }
 0x3f0   :  { %6702 = vmatprep.subr.bf16.mxu1 %v11294_v7 }
 0x3f1   :  { %6858 = vmatpush1.bf16.msra.mxu0 %v11133_v27  ;;  %v11180_v27 = vld [vmem:[%s14827_s3 + $0x2f4] sm:$0xff]  }
 0x3f2   :  { %6859 = vmatprep.subr.bf16.mxu0 %v11294_v7 }
 0x3f3   :  { %6703 = vmatpush1.bf16.msra.mxu1 %v11134_v15  ;;  %v7073_v15 = vrot.slane %v9502_v9, 1  ;;  %v11229_v9 = vld [vmem:[%s14827_s3 + $0x3e4] ss:$0 sps:$4 sm:$0x77]  }
 0x3f4   :  { %6710 = vmatprep.subr.bf16.mxu1 %v11294_v7  ;;  %v7781_v11 = vsel %vm6370_vm2, %v11229_v9, 0 }
 0x3f5   :  { %6860 = vmatpush1.bf16.msra.mxu0 %v11135_v53  ;;  %v11182_v53 = vld [vmem:[%s14827_s3 + $0x288] sm:$0xff]  }
 0x3f6   :  { %6867 = vmatprep.subr.bf16.mxu0 %v11294_v7 }
 0x3f7   :  { %6711 = vmatpush2.bf16.msra.mxu1 %v6686_v19  ;;  %v11184_v19 = vld [vmem:[%s14827_s3 + $0x280] sm:$0xff]  }
 0x3f8   :  { %6712 = vmatprep.subr.bf16.mxu1 %v11294_v7 }
 0x3f9   :  { %6868 = vmatpush2.bf16.msra.mxu0 %v6843_v20  ;;  %v11185_v20 = vld [vmem:[%s14827_s3 + $0x2e4] sm:$0xff]  }
 0x3fa   :  { %6869 = vmatprep.subr.bf16.mxu0 %v11294_v7 }
 0x3fb   :  { %6713 = vmatpush2.bf16.msra.mxu1 %v11138_v40  ;;  %v11186_v40 = vld [vmem:[%s14827_s3 + $0x278] sm:$0xff]  }
 0x3fc   :  { %6714 = vmatprep.subr.bf16.mxu1 %v11294_v7 }
 0x3fd   :  { %6870 = vmatpush2.bf16.msra.mxu0 %v11139_v22  ;;  %v11187_v22 = vld [vmem:[%s14827_s3 + $0x2dc] sm:$0xff]  }
 0x3fe   :  { %6871 = vmatprep.subr.bf16.mxu0 %v11294_v7 }
 0x3ff   :  { %6715 = vmatpush2.bf16.msra.mxu1 %v11140_v56  ;;  %v11188_v56 = vld [vmem:[%s14827_s3 + $0x270] sm:$0xff]  }
 0x400   :  { %6716 = vmatprep.subr.bf16.mxu1 %v11294_v7 }
 0x401   :  { %6872 = vmatpush2.bf16.msra.mxu0 %v11141_v25  ;;  %v11189_v25 = vld [vmem:[%s14827_s3 + $0x2d4] sm:$0xff]  }
 0x402   :  { %6873 = vmatprep.subr.bf16.mxu0 %v11294_v7 }
 0x403   :  { %6717 = vmatpush2.bf16.msra.mxu1 %v11142_v45  ;;  %v11190_v45 = vld [vmem:[%s14827_s3 + $0x268] sm:$0xff]  }
 0x404   :  { %6718 = vmatprep.subr.bf16.mxu1 %v11294_v7 }
 0x405   :  { %6874 = vmatpush2.bf16.msra.mxu0 %v11143_v29  ;;  %v11191_v29 = vld [vmem:[%s14827_s3 + $0x2cc] sm:$0xff]  }
 0x406   :  { %6875 = vmatprep.subr.bf16.mxu0 %v11294_v7 }
 0x407   :  { %6719 = vmatpush2.bf16.msra.mxu1 %v11144_v30  ;;  %v11192_v30 = vld [vmem:[%s14827_s3 + $0x260] sm:$0xff]  }
 0x408   :  { %7000 = vmatprep.subr.bf16.mxu1 %v11294_v7 }
 0x409   :  { %6876 = vmatpush2.bf16.msra.mxu0 %v11145_v26  ;;  %v11196_v26 = vld [vmem:[%s14827_s3 + $0x2b8] ss:$0 sps:$4 sm:$0x77]  }
 0x40a   :  { %6721 = vmatmul.mubr.bf16.vlgmr.msra.gmra.mxu1 %v6604_v34  ;;  %7157 = vmatprep.subr.bf16.mxu0 %v11294_v7  ;;  %v11198_v34 = vld [vmem:[%s14827_s3 + $0x2b0] sm:$0xff]  }
 0x40b   :  { %7001 = vmatpush1.bf16.msra.mxu1 %v11147_v32  ;;  %9476 = vmatprep.mubr.msk.bf16.mxu1 %vm6366_vm8, %v9462_v51  ;;  %v7312_v32 = vsel %vm6370_vm2, %v11196_v26, 0  ;;  %v11199_v51 = vld [vmem:[%s14827_s3 + $0x314] sm:$0xff]   ;;  %v11237_v26 = vld [vmem:[%s14827_s3 + $0x3c4] sm:$0xff]  }
 0x40c   :  { %6878 = vmatmul.mubr.bf16.vlgmr.msra.gmra.mxu0 %v6761_v52  ;;  %7002 = vmatprep.subr.bf16.mxu1 %v11294_v7  ;;  %v11201_v52 = vld [vmem:[%s14827_s3 + $0x30c] sm:$0xff]  }
 0x40d   :  { %7158 = vmatpush1.bf16.msra.mxu0 %v11150_v18  ;;  %9517 = vmatprep.mubr.msk.bf16.mxu0 %vm6366_vm8, %v7074_v24  ;;  %v11200_v18 = vld [vmem:[%s14827_s3 + $0x2a8] sm:$0xff]   ;;  %v11202_v24 = vld [vmem:[%s14827_s3 + $0x2a0] sm:$0xff]  }
 0x40e   :  { %7159 = vmatprep.subr.bf16.mxu0 %v11294_v7 }
 0x40f   :  { %7003 = vmatpush1.bf16.msra.mxu1 %v11152_v38  ;;  %v11203_v38 = vld [vmem:[%s14827_s3 + $0x304] sm:$0xff]  }
 0x410   :  { %7004 = vmatprep.subr.bf16.mxu1 %v11294_v7 }
 0x411   :  { %7160 = vmatpush1.bf16.msra.mxu0 %v11153_v42  ;;  %v11204_v42 = vld [vmem:[%s14827_s3 + $0x298] sm:$0xff]  }
 0x412   :  { %7161 = vmatprep.subr.bf16.mxu0 %v11294_v7 }
 0x413   :  { %7005 = vmatpush1.bf16.msra.mxu1 %v11154_v43  ;;  %v9543_v43 = vcombine.low %v14362_v31, %v14362_v31  ;;  %v11224_v31 = vld [vmem:[%s14827_s3 + $0x328] sm:$0xff]  }
 0x414   :  { %7006 = vmatprep.subr.bf16.mxu1 %v11294_v7 }
 0x415   :  { %7162 = vmatpush1.bf16.msra.mxu0 %v11155_v58  ;;  %v14488_v58 = vld [vmem:[#allocation2 + $0x10] sm:$0x22] }
 0x416   :  { %7163 = vmatprep.subr.bf16.mxu0 %v11294_v7 }
 0x417   :  { %7007 = vmatpush1.bf16.msra.mxu1 %v11156_v62  ;;  %v11205_v62 = vld [vmem:[%s14827_s3 + $0x2fc] sm:$0xff]  }
 0x418   :  { %7008 = vmatprep.subr.bf16.mxu1 %v11294_v7 }
 0x419   :  { %7164 = vmatpush1.bf16.msra.mxu0 %v11157_v61  ;;  %v14494_v61 = vld [vmem:[#allocation2 + $0x10] sm:$0x11] }
 0x41a   :  { %7165 = vmatprep.subr.bf16.mxu0 %v11294_v7  ;;  %v9625_v49 = vcombine.low %v14494_v61, %v14494_v61 }
 0x41b   :  { %7009 = vmatpush1.bf16.msra.mxu1 %v11158_v57  ;;  %v9584_v57 = vcombine.low %v14368_v12, %v14368_v12  ;;  %v11226_v12 = vld [vmem:[%s14827_s3 + $0x320] sm:$0xff]  }
 0x41c   :  { %7010 = vmatprep.subr.bf16.mxu1 %v11294_v7 }
 0x41d   :  { %7166 = vmatpush1.bf16.msra.mxu0 %v11159_v3  ;;  %v11207_v3 = vld [vmem:[%s14827_s3 + $0x358] sm:$0xff]  }
 0x41e   :  { %7167 = vmatprep.subr.bf16.mxu0 %v11294_v7 }
 0x41f   :  { %7011 = vmatpush1.bf16.msra.mxu1 %v11160_v55  ;;  %v9667_v55 = vcombine.high %v14488_v58, %v14488_v58 }
 0x420   :  { %7012 = vmatprep.subr.bf16.mxu1 %v11294_v7 }
 0x421   :  { %7168 = vmatpush1.bf16.msra.mxu0 %v11161_v17  ;;  %v7230_v17 = vrot.slane %v9543_v43, 2  ;;  %v7700_v5 = vrot.slane %v9667_v55, 1 }
 0x422   :  { %7169 = vmatprep.subr.bf16.mxu0 %v11294_v7 }
 0x423   :  { %7013 = vmatpush1.bf16.msra.mxu1 %v11162_v1  ;;  %v9626_v1 = vcombine.high %v14494_v61, %v14494_v61  ;;  %v11243_v61 = vld [vmem:[%s14829_s5 + $0x10] sm:$0xff]  }
 0x424   :  { %7014 = vmatprep.subr.bf16.mxu1 %v11294_v7 }
 0x425   :  { %7170 = vmatpush1.bf16.msra.mxu0 %v11163_v0  ;;  %v11211_v0 = vld [vmem:[%s14827_s3 + $0x3bc] sm:$0xff]  }
 0x426   :  { %7171 = vmatprep.subr.bf16.mxu0 %v11294_v7 }
 0x427   :  { %7015 = vmatpush1.bf16.msra.mxu1 %v11164_v50  ;;  %v7387_v50 = vrot.slane %v9584_v57, 3 }
 0x428   :  { %7022 = vmatprep.subr.bf16.mxu1 %v11294_v7 }
 0x429   :  { %7172 = vmatpush1.bf16.msra.mxu0 %v11165_v36  ;;  %v11214_v36 = vld [vmem:[%s14827_s3 + $0x350] sm:$0xff]  }
 0x42a   :  { %7179 = vmatprep.subr.bf16.mxu0 %v11294_v7 }
 0x42b   :  { %7023 = vmatpush2.bf16.msra.mxu1 %v6998_v10  ;;  %v11216_v10 = vld [vmem:[%s14827_s3 + $0x348] sm:$0xff]  }
 0x42c   :  { %7024 = vmatprep.subr.bf16.mxu1 %v11294_v7 }
 0x42d   :  { %7180 = vmatpush2.bf16.msra.mxu0 %v7155_v8  ;;  %v11217_v8 = vld [vmem:[%s14827_s3 + $0x3ac] sm:$0xff]  }
 0x42e   :  { %7181 = vmatprep.subr.bf16.mxu0 %v11294_v7 }
 0x42f   :  { %7025 = vmatpush2.bf16.msra.mxu1 %v11168_v59  ;;  %v11218_v59 = vld [vmem:[%s14827_s3 + $0x340] sm:$0xff]  }
 0x430   :  { %7026 = vmatprep.subr.bf16.mxu1 %v11294_v7 }
 0x431   :  { %7182 = vmatpush2.bf16.msra.mxu0 %v11169_v60  ;;  %v11219_v60 = vld [vmem:[%s14827_s3 + $0x3a4] sm:$0xff]  }
 0x432   :  { %7183 = vmatprep.subr.bf16.mxu0 %v11294_v7 }
 0x433   :  { %7027 = vmatpush2.bf16.msra.mxu1 %v11170_v14  ;;  %v11220_v14 = vld [vmem:[%s14827_s3 + $0x338] sm:$0xff]  }
 0x434   :  { %7028 = vmatprep.subr.bf16.mxu1 %v11294_v7 }
 0x435   :  { %7184 = vmatpush2.bf16.msra.mxu0 %v11171_v63  ;;  %v11221_v63 = vld [vmem:[%s14827_s3 + $0x39c] sm:$0xff]  }
 0x436   :  { %7185 = vmatprep.subr.bf16.mxu0 %v11294_v7 }
 0x437   :  { %7029 = vmatpush2.bf16.msra.mxu1 %v11172_v47  ;;  %v11222_v47 = vld [vmem:[%s14827_s3 + $0x330] sm:$0xff]  }
 0x438   :  { %7030 = vmatprep.subr.bf16.mxu1 %v11294_v7 }
 0x439   :  { %7186 = vmatpush2.bf16.msra.mxu0 %v11173_v2  ;;  %v11223_v2 = vld [vmem:[%s14827_s3 + $0x394] sm:$0xff]  }
 0x43a   :  { %7187 = vmatprep.subr.bf16.mxu0 %v11294_v7 }
 0x43b   :  { %7031 = vmatpush2.bf16.msra.mxu1 %v11174_v4  ;;  %v11225_v4 = vld [vmem:[%s14827_s3 + $0x38c] sm:$0xff]  }
 0x43c   :  { %7314 = vmatprep.subr.bf16.mxu1 %v11294_v7 }
 0x43d   :  { %7188 = vmatpush2.bf16.msra.mxu0 %v11175_v6  ;;  %v11228_v6 = vld [vmem:[%s14827_s3 + $0x380] ss:$0 sps:$4 sm:$0x77]  }
 0x43e   :  { %7033 = vmatmul.mubr.bf16.vlgmr.msra.gmra.mxu1 %v9461_v41  ;;  %7471 = vmatprep.subr.bf16.mxu0 %v11294_v7  ;;  %v11230_v41 = vld [vmem:[%s14827_s3 + $0x378] sm:$0xff]  }
 0x43f   :  { %7315 = vmatpush1.bf16.msra.mxu1 %v11177_v23  ;;  %9558 = vmatprep.mubr.msk.bf16.mxu1 %vm6366_vm8, %v7231_v13  ;;  %v7624_v23 = vsel %vm6370_vm2, %v11228_v6, 0  ;;  %v9296_v13 = vld [vmem:[%s14828_s4] ss:$0 sm:$0xff] }
 0x440   :  { %7190 = vmatmul.mubr.bf16.vlgmr.msra.gmra.mxu0 %v7073_v15  ;;  %7316 = vmatprep.subr.bf16.mxu1 %v11294_v7 }
 0x441   :  { %7472 = vmatpush1.bf16.msra.mxu0 %v11180_v27  ;;  %9599 = vmatprep.mubr.msk.bf16.mxu0 %vm6366_vm8, %v7388_v44  ;;  %v11231_v27 = vld [vmem:[%s14827_s3 + $0x3dc] sm:$0xff]  }
 0x442   :  { %7473 = vmatprep.subr.bf16.mxu0 %v11294_v7 }
 0x443   :  { %7317 = vmatpush1.bf16.msra.mxu1 %v11182_v53  ;;  %v11232_v53 = vld [vmem:[%s14827_s3 + $0x370] sm:$0xff]  }
 0x444   :  { %7318 = vmatprep.subr.bf16.mxu1 %v11294_v7 }
 0x445   :  { %7474 = vmatpush1.bf16.msra.mxu0 %v11183_v48 }
 0x446   :  { %7475 = vmatprep.subr.bf16.mxu0 %v11294_v7 }
 0x447   :  { %7319 = vmatpush1.bf16.msra.mxu1 %v11184_v19 }
 0x448   :  { %7320 = vmatprep.subr.bf16.mxu1 %v11294_v7 }
 0x449   :  { %7476 = vmatpush1.bf16.msra.mxu0 %v11185_v20 }
 0x44a   :  { %7477 = vmatprep.subr.bf16.mxu0 %v11294_v7 }
 0x44b   :  { %7321 = vmatpush1.bf16.msra.mxu1 %v11186_v40  ;;  %v11233_v40 = vld [vmem:[%s14827_s3 + $0x3d4] sm:$0xff]  }
 0x44c   :  { %7322 = vmatprep.subr.bf16.mxu1 %v11294_v7 }
 0x44d   :  { %7478 = vmatpush1.bf16.msra.mxu0 %v11187_v22 }
 0x44e   :  { %7479 = vmatprep.subr.bf16.mxu0 %v11294_v7 }
 0x44f   :  { %7323 = vmatpush1.bf16.msra.mxu1 %v11188_v56 }
 0x450   :  { %7324 = vmatprep.subr.bf16.mxu1 %v11294_v7 }
 0x451   :  { %7480 = vmatpush1.bf16.msra.mxu0 %v11189_v25  ;;  %v11234_v25 = vld [vmem:[%s14827_s3 + $0x368] sm:$0xff]  }
 0x452   :  { %7481 = vmatprep.subr.bf16.mxu0 %v11294_v7 }
 0x453   :  { %7325 = vmatpush1.bf16.msra.mxu1 %v11190_v45 }
 0x454   :  { %7326 = vmatprep.subr.bf16.mxu1 %v11294_v7 }
 0x455   :  { %7482 = vmatpush1.bf16.msra.mxu0 %v11191_v29 }
 0x456   :  { %7483 = vmatprep.subr.bf16.mxu0 %v11294_v7 }
 0x457   :  { %7327 = vmatpush1.bf16.msra.mxu1 %v11192_v30  ;;  %v11235_v30 = vld [vmem:[%s14827_s3 + $0x3cc] sm:$0xff]  }
 0x458   :  { %7328 = vmatprep.subr.bf16.mxu1 %v11294_v7 }
 0x459   :  { %7484 = vmatpush1.bf16.msra.mxu0 %v11193_v16 }
 0x45a   :  { %7485 = vmatprep.subr.bf16.mxu0 %v11294_v7 }
 0x45b   :  { %7329 = vmatpush1.bf16.msra.mxu1 %v11194_v37  ;;  %v11236_v37 = vld [vmem:[%s14827_s3 + $0x360] sm:$0xff]  }
 0x45c   :  { %7336 = vmatprep.subr.bf16.mxu1 %v11294_v7 }
 0x45d   :  { %7486 = vmatpush1.bf16.msra.mxu0 %v11195_v46  ;;  %v9666_v46 = vcombine.low %v14488_v58, %v14488_v58 }
 0x45e   :  { %7493 = vmatprep.subr.bf16.mxu0 %v11294_v7 }
 0x45f   :  { %7337 = vmatpush2.bf16.msra.mxu1 %v7312_v32  ;;  %v7699_v32 = vrot.slane %v9666_v46, 1  ;;  %v11252_v46 = vld [vmem:[%s14830_s7 + $0x8] sm:$0xff]  }
 0x460   :  { %7338 = vmatprep.subr.bf16.mxu1 %v11294_v7 }
 0x461   :  { %7494 = vmatpush2.bf16.msra.mxu0 %v7469_v33  ;;  %v11295_v33 = vmov 0.0  }
 0x462   :  { %7495 = vmatprep.subr.bf16.mxu0 %v11294_v7 }
 0x463   :  { %7339 = vmatpush2.bf16.msra.mxu1 %v11198_v34  ;;  %v11238_v34 = vld [vmem:[%s14829_s5 + $0x38] sm:$0xff]  }
 0x464   :  { %7340 = vmatprep.subr.bf16.mxu1 %v11294_v7 }
 0x465   :  { %7496 = vmatpush2.bf16.msra.mxu0 %v11199_v51  ;;  %v11239_v51 = vld [vmem:[%s14829_s5 + $0x30] sm:$0xff]  }
 0x466   :  { %7497 = vmatprep.subr.bf16.mxu0 %v11294_v7 }
 0x467   :  { %7341 = vmatpush2.bf16.msra.mxu1 %v11200_v18  ;;  %v11240_v18 = vld [vmem:[%s14829_s5 + $0x28] sm:$0xff]  }
 0x468   :  { %7342 = vmatprep.subr.bf16.mxu1 %v11294_v7 }
 0x469   :  { %7498 = vmatpush2.bf16.msra.mxu0 %v11201_v52  ;;  %v11241_v52 = vld [vmem:[%s14829_s5 + $0x20] sm:$0xff]  }
 0x46a   :  { %7499 = vmatprep.subr.bf16.mxu0 %v11294_v7 }
 0x46b   :  { %7343 = vmatpush2.bf16.msra.mxu1 %v11202_v24  ;;  %v11242_v24 = vld [vmem:[%s14829_s5 + $0x18] sm:$0xff]  }
 0x46c   :  { %7344 = vmatprep.subr.bf16.mxu1 %v11294_v7 }
 0x46d   :  { %7500 = vmatpush2.bf16.msra.mxu0 %v11203_v38 }
 0x46e   :  { %7501 = vmatprep.subr.bf16.mxu0 %v11294_v7 }
 0x46f   :  { %7345 = vmatpush2.bf16.msra.mxu1 %v11204_v42 }
 0x470   :  { %7626 = vmatprep.subr.bf16.mxu1 %v11294_v7 }
 0x471   :  { %7502 = vmatpush2.bf16.msra.mxu0 %v11205_v62 }
 0x472   :  { %7347 = vmatmul.mubr.bf16.vlgmr.msra.gmra.mxu1 %v7230_v17  ;;  %7783 = vmatprep.subr.bf16.mxu0 %v11294_v7 }
 0x473   :  { %7627 = vmatpush1.bf16.msra.mxu1 %v11207_v3  ;;  %9640 = vmatprep.mubr.msk.bf16.mxu1 %vm6366_vm8, %v9626_v1 }
 0x474   :  { %7504 = vmatmul.mubr.bf16.vlgmr.msra.gmra.mxu0 %v7387_v50  ;;  %7628 = vmatprep.subr.bf16.mxu1 %v11294_v7  ;;  %v11245_v50 = vld [vmem:[%s14829_s5] sm:$0xff]  }
 0x475   :  { %7784 = vmatpush1.bf16.msra.mxu0 %v11211_v0  ;;  %9681 = vmatprep.mubr.msk.bf16.mxu0 %vm6366_vm8, %v7700_v5  ;;  %v11244_v0 = vld [vmem:[%s14829_s5 + $0x8] sm:$0xff]  }
 0x476   :  { %7785 = vmatprep.subr.bf16.mxu0 %v11294_v7 }
 0x477   :  { %7629 = vmatpush1.bf16.msra.mxu1 %v11214_v36 }
 0x478   :  { %7630 = vmatprep.subr.bf16.mxu1 %v11294_v7 }
 0x479   :  { %7786 = vmatpush1.bf16.msra.mxu0 %v11215_v54 }
 0x47a   :  { %7787 = vmatprep.subr.bf16.mxu0 %v11294_v7 }
 0x47b   :  { %7631 = vmatpush1.bf16.msra.mxu1 %v11216_v10 }
 0x47c   :  { %7632 = vmatprep.subr.bf16.mxu1 %v11294_v7 }
 0x47d   :  { %7788 = vmatpush1.bf16.msra.mxu0 %v11217_v8 }
 0x47e   :  { %7789 = vmatprep.subr.bf16.mxu0 %v11294_v7 }
 0x47f   :  { %7633 = vmatpush1.bf16.msra.mxu1 %v11218_v59 }
 0x480   :  { %7634 = vmatprep.subr.bf16.mxu1 %v11294_v7 }
 0x481   :  { %7790 = vmatpush1.bf16.msra.mxu0 %v11219_v60 }
 0x482   :  { %7791 = vmatprep.subr.bf16.mxu0 %v11294_v7 }
 0x483   :  { %7635 = vmatpush1.bf16.msra.mxu1 %v11220_v14 }
 0x484   :  { %7636 = vmatprep.subr.bf16.mxu1 %v11294_v7 }
 0x485   :  { %7792 = vmatpush1.bf16.msra.mxu0 %v11221_v63 }
 0x486   :  { %7793 = vmatprep.subr.bf16.mxu0 %v11294_v7 }
 0x487   :  { %7637 = vmatpush1.bf16.msra.mxu1 %v11222_v47 }
 0x488   :  { %7638 = vmatprep.subr.bf16.mxu1 %v11294_v7 }
 0x489   :  { %7794 = vmatpush1.bf16.msra.mxu0 %v11223_v2 }
 0x48a   :  { %7795 = vmatprep.subr.bf16.mxu0 %v11294_v7 }
 0x48b   :  { %7639 = vmatpush1.bf16.msra.mxu1 %v11224_v31 }
 0x48c   :  { %7640 = vmatprep.subr.bf16.mxu1 %v11294_v7 }
 0x48d   :  { %7796 = vmatpush1.bf16.msra.mxu0 %v11225_v4 }
 0x48e   :  { %7797 = vmatprep.subr.bf16.mxu0 %v11294_v7 }
 0x48f   :  { %7641 = vmatpush1.bf16.msra.mxu1 %v11226_v12 }
 0x490   :  { %7648 = vmatprep.subr.bf16.mxu1 %v11294_v7 }
 0x491   :  { %7798 = vmatpush1.bf16.msra.mxu0 %v11227_v21 }
 0x492   :  { %7805 = vmatprep.subr.bf16.mxu0 %v11294_v7 }
 0x493   :  { %7649 = vmatpush2.bf16.msra.mxu1 %v7624_v23 }
 0x494   :  { %7650 = vmatprep.subr.bf16.mxu1 %v11294_v7 }
 0x495   :  { %7806 = vmatpush2.bf16.msra.mxu0 %v7781_v11 }
 0x496   :  { %v6408_v15 = vpop.f32.mrf.mxu1  ;;  %7807 = vmatprep.subr.bf16.mxu0 %v11294_v7 }
 0x497   :  { %v6414_v44 = vadd.f32 %v9296_v13, %v6408_v15  ;;  %7651 = vmatpush2.bf16.msra.mxu1 %v11230_v41 }
 0x498   :  { %v6410_v48 = vpop.f32.mrf.mxu1  ;;  %v6565_v19 = vpop.f32.mrf.mxu0  ;;  %7652 = vmatprep.subr.bf16.mxu1 %v11294_v7 }
 0x499   :  { %v6571_v20 = vadd.f32 %v6565_v19, %v6414_v44  ;;  %7808 = vmatpush2.bf16.msra.mxu0 %v11231_v27 }
 0x49a   :  { %v6411_v22 = vpop.f32.mrf.mxu1  ;;  %v6567_v56 = vpop.f32.mrf.mxu0  ;;  %7809 = vmatprep.subr.bf16.mxu0 %v11294_v7 }
 0x49b   :  { %7653 = vmatpush2.bf16.msra.mxu1 %v11232_v53  ;;  %v11246_v56 = vld [vmem:[%s14830_s7 + $0x38] sm:$0xff]  }
 0x49c   :  { %v6412_v45 = vpop.f32.mrf.mxu1  ;;  %v6568_v29 = vpop.f32.mrf.mxu0  ;;  %7654 = vmatprep.subr.bf16.mxu1 %v11294_v7 }
 0x49d   :  { %7810 = vmatpush2.bf16.msra.mxu0 %v11233_v40  ;;  %v11247_v29 = vld [vmem:[%s14830_s7 + $0x30] sm:$0xff]  }
 0x49e   :  { %v6569_v16 = vpop.f32.mrf.mxu0  ;;  %7811 = vmatprep.subr.bf16.mxu0 %v11294_v7 }
 0x49f   :  { %7655 = vmatpush2.bf16.msra.mxu1 %v11234_v25  ;;  %v11249_v16 = vld [vmem:[%s14830_s7 + $0x20] sm:$0xff]  }
 0x4a0   :  { %7656 = vmatprep.subr.bf16.mxu1 %v11294_v7 }
 0x4a1   :  { %7812 = vmatpush2.bf16.msra.mxu0 %v11235_v30  ;;  %v11248_v30 = vld [vmem:[%s14830_s7 + $0x28] sm:$0xff]  }
 0x4a2   :  { %7813 = vmatprep.subr.bf16.mxu0 %v11294_v7 }
 0x4a3   :  { %7657 = vmatpush2.bf16.msra.mxu1 %v11236_v37  ;;  %v11250_v37 = vld [vmem:[%s14830_s7 + $0x18] sm:$0xff]  }
 0x4a4   :  { %9772 = vmatprep.subr.bf16.mxu1 %v11295_v33 }
 0x4a5   :  { %7814 = vmatpush2.bf16.msra.mxu0 %v11237_v26  ;;  %v11251_v26 = vld [vmem:[%s14830_s7 + $0x10] sm:$0xff]  }
 0x4a6   :  { %7659 = vmatmul.mubr.bf16.vlgmr.msra.gmra.mxu1 %v9625_v49  ;;  %9812 = vmatprep.subr.bf16.mxu0 %v11295_v33  ;;  %v11253_v49 = vld [vmem:[%s14830_s7] sm:$0xff]  }
 0x4a7   :  { %9773 = vmatpush3.bf16.msra.mxu1 %v11238_v34  ;;  %9788 = vmatprep.mubr.msk.bf16.mxu1 %vm11296_vm9, %v11295_v33  ;;  %v11255_v34 = vld [vmem:[%s14831_s9 + $0x30] sm:$0xff]  }
 0x4a8   :  { %7816 = vmatmul.mubr.bf16.vlgmr.msra.gmra.mxu0 %v7699_v32  ;;  %9774 = vmatprep.subr.bf16.mxu1 %v11295_v33  ;;  %v11254_v32 = vld [vmem:[%s14831_s9 + $0x38] sm:$0xff]  }
 0x4a9   :  { %9828 = vmatprep.mubr.msk.bf16.mxu0 %vm11296_vm9, %v11295_v33  ;;  %9813 = vmatpush3.bf16.msra.mxu0 %v11254_v32 }
 0x4aa   :  { %9814 = vmatprep.subr.bf16.mxu0 %v11295_v33 }
 0x4ab   :  { %9775 = vmatpush3.bf16.msra.mxu1 %v11239_v51  ;;  %v11256_v51 = vld [vmem:[%s14831_s9 + $0x28] sm:$0xff]  }
 0x4ac   :  { %9776 = vmatprep.subr.bf16.mxu1 %v11295_v33 }
 0x4ad   :  { %9815 = vmatpush3.bf16.msra.mxu0 %v11255_v34 }
 0x4ae   :  { %9816 = vmatprep.subr.bf16.mxu0 %v11295_v33 }
 0x4af   :  { %9777 = vmatpush3.bf16.msra.mxu1 %v11240_v18  ;;  %v11257_v18 = vld [vmem:[%s14831_s9 + $0x20] sm:$0xff]  }
 0x4b0   :  { %9778 = vmatprep.subr.bf16.mxu1 %v11295_v33 }
 0x4b1   :  { %9817 = vmatpush3.bf16.msra.mxu0 %v11256_v51 }
 0x4b2   :  { %9818 = vmatprep.subr.bf16.mxu0 %v11295_v33 }
 0x4b3   :  { %9779 = vmatpush3.bf16.msra.mxu1 %v11241_v52  ;;  %v11258_v52 = vld [vmem:[%s14831_s9 + $0x18] sm:$0xff]  }
 0x4b4   :  { %9780 = vmatprep.subr.bf16.mxu1 %v11295_v33 }
 0x4b5   :  { %9819 = vmatpush3.bf16.msra.mxu0 %v11257_v18 }
 0x4b6   :  { %9820 = vmatprep.subr.bf16.mxu0 %v11295_v33 }
 0x4b7   :  { %9781 = vmatpush3.bf16.msra.mxu1 %v11242_v24  ;;  %v11259_v24 = vld [vmem:[%s14831_s9 + $0x10] sm:$0xff]  }
 0x4b8   :  { %9782 = vmatprep.subr.bf16.mxu1 %v11295_v33 }
 0x4b9   :  { %9821 = vmatpush3.bf16.msra.mxu0 %v11258_v52 }
 0x4ba   :  { %9822 = vmatprep.subr.bf16.mxu0 %v11295_v33 }
 0x4bb   :  { %9783 = vmatpush3.bf16.msra.mxu1 %v11243_v61 }
 0x4bc   :  { %9784 = vmatprep.subr.bf16.mxu1 %v11295_v33 }
 0x4bd   :  { %9823 = vmatpush3.bf16.msra.mxu0 %v11259_v24 }
 0x4be   :  { %9824 = vmatprep.subr.bf16.mxu0 %v11295_v33 }
 0x4bf   :  { %9785 = vmatpush3.bf16.msra.mxu1 %v11244_v0  ;;  %v11268_v0 = vld [vmem:[%s14833_s11 + $0x94] ss:$12 sps:$4 sm:$0xff]  }
 0x4c0   :  { %9786 = vmatprep.subr.bf16.mxu1 %v11295_v33 }
 0x4c3   :  { %9787 = vmatpush3.bf16.msra.mxu1 %v11245_v50  ;;  %v11266_v50 = vld [vmem:[%s14833_s11 + $0x90] ss:$12 sps:$4 sm:$0xff]  }
 0x4c4   :  { %9792 = vmatprep.subr.bf16.mxu1 %v11295_v33 }
 0x4ca   :  { %v6722_v38 = vpop.f32.mrf.mxu1 }
 0x4cb   :  { %v6728_v42 = vadd.f32 %v6722_v38, %v6571_v20  ;;  %v9682_v38 = vld [vmem:[%s14832_s6] ss:$0 sm:$0xff] }
 0x4cc   :  { %v6724_v43 = vpop.f32.mrf.mxu1  ;;  %v6879_v58 = vpop.f32.mrf.mxu0 }
 0x4cd   :  { %v6885_v62 = vadd.f32 %v6879_v58, %v6728_v42 }
 0x4ce   :  { %v6725_v57 = vpop.f32.mrf.mxu1  ;;  %v6881_v3 = vpop.f32.mrf.mxu0 }
 0x4d0   :  { %v6726_v55 = vpop.f32.mrf.mxu1  ;;  %v6882_v17 = vpop.f32.mrf.mxu0 }
 0x4d1   :  { %v11260_v55 = vld [vmem:[%s14831_s9 + $0x8] sm:$0xff]   ;;  %v11261_v17 = vld [vmem:[%s14831_s9] sm:$0xff]  }
 0x4d2   :  { %v6883_v1 = vpop.f32.mrf.mxu0  ;;  %9825 = vmatpush3.bf16.msra.mxu0 %v11260_v55 }
 0x4d3   :  { %9826 = vmatprep.subr.bf16.mxu0 %v11295_v33  ;;  %v11262_v1 = vld [vmem:[%s14833_s11 + $0xa8] ss:$12 sps:$4 sm:$0xff]  }
 0x4d6   :  { %9827 = vmatpush3.bf16.msra.mxu0 %v11261_v17 }
 0x4d7   :  { %9832 = vmatprep.subr.bf16.mxu0 %v11295_v33 }
 0x4fe   :  { %v7034_v5 = vpop.f32.mrf.mxu1 }
 0x4ff   :  { %v7040_v36 = vadd.f32 %v7034_v5, %v6885_v62  ;;  %v11272_v5 = vld [vmem:[%s14833_s11 + $0x7c] ss:$12 sps:$4 sm:$0xff]  }
 0x500   :  { %v7036_v54 = vpop.f32.mrf.mxu1  ;;  %v7191_v10 = vpop.f32.mrf.mxu0 }
 0x501   :  { %v7197_v8 = vadd.f32 %v7191_v10, %v7040_v36  ;;  %v11270_v36 = vld [vmem:[%s14833_s11 + $0x78] ss:$12 sps:$4 sm:$0xff]   ;;  %v11274_v10 = vld [vmem:[%s14833_s11 + $0x60] ss:$12 sps:$4 sm:$0xff]  }
 0x502   :  { %v7037_v59 = vpop.f32.mrf.mxu1  ;;  %v7193_v60 = vpop.f32.mrf.mxu0  ;;  %v11276_v54 = vld [vmem:[%s14833_s11 + $0x64] ss:$12 sps:$4 sm:$0xff]  }
 0x503   :  { %v11278_v59 = vld [vmem:[%s14833_s11 + $0x48] ss:$12 sps:$4 sm:$0xff]  }
 0x504   :  { %v7038_v14 = vpop.f32.mrf.mxu1  ;;  %v7194_v63 = vpop.f32.mrf.mxu0  ;;  %v11284_v60 = vld [vmem:[%s14833_s11 + $0x34] ss:$12 sps:$4 sm:$0xff]  }
 0x505   :  { %v11282_v14 = vld [vmem:[%s14833_s11 + $0x30] ss:$12 sps:$4 sm:$0xff]  }
 0x506   :  { %v7195_v47 = vpop.f32.mrf.mxu0  ;;  %v11288_v63 = vld [vmem:[%s14833_s11 + $0x1c] ss:$12 sps:$4 sm:$0xff]  }
 0x507   :  { %v11286_v47 = vld [vmem:[%s14833_s11 + $0x18] ss:$12 sps:$4 sm:$0xff]  }
 0x532   :  { %v7348_v2 = vpop.f32.mrf.mxu1 }
 0x533   :  { %v7354_v11 = vadd.f32 %v7348_v2, %v7197_v8  ;;  %v11280_v8 = vld [vmem:[%s14833_s11 + $0x4c] ss:$12 sps:$4 sm:$0xff]   ;;  %v9691_v2 = vld [vmem:[%s14834_s8] ss:$0 sm:$0xff] }
 0x534   :  { %v7350_v31 = vpop.f32.mrf.mxu1  ;;  %v7505_v4 = vpop.f32.mrf.mxu0 }
 0x535   :  { %v7511_v41 = vadd.f32 %v7505_v4, %v7354_v11 }
 0x536   :  { %v7351_v12 = vpop.f32.mrf.mxu1  ;;  %v7507_v6 = vpop.f32.mrf.mxu0 }
 0x538   :  { %v7352_v21 = vpop.f32.mrf.mxu1  ;;  %v7508_v9 = vpop.f32.mrf.mxu0 }
 0x539   :  { %v11265_v9 = vld [vmem:[%s14833_s11 + $0xb0] ss:$12 sps:$4 sm:$0xff]  }
 0x53a   :  { %v7509_v23 = vpop.f32.mrf.mxu0 }
 0x566   :  { %v7660_v13 = vpop.f32.mrf.mxu1 }
 0x567   :  { %v7666_v27 = vadd.f32 %v7660_v13, %v7511_v41  ;;  %v11269_v41 = vld [vmem:[%s14833_s11 + $0x98] ss:$12 sps:$4 sm:$0xff]   ;;  %v11273_v13 = vld [vmem:[%s14833_s11 + $0x80] ss:$12 sps:$4 sm:$0xff]  }
 0x568   :  { %v7662_v15 = vpop.f32.mrf.mxu1  ;;  %v7817_v44 = vpop.f32.mrf.mxu0 }
 0x569   :  { %v7823_v53 = vadd.f32 %v7817_v44, %v7666_v27  ;;  %v11277_v27 = vld [vmem:[%s14833_s11 + $0x68] ss:$12 sps:$4 sm:$0xff]   ;;  %v11281_v15 = vld [vmem:[%s14833_s11 + $0x50] ss:$12 sps:$4 sm:$0xff]   ;;  %v11285_v44 = vld [vmem:[%s14833_s11 + $0x38] ss:$12 sps:$4 sm:$0xff]  }
 0x56a   :  { %v7663_v48 = vpop.f32.mrf.mxu1  ;;  %v7819_v19 = vpop.f32.mrf.mxu0 }
 0x56b   :  { %v7824_v20 = vmax.f32 %v7823_v53, 0.0  ;;  %v11289_v53 = vld [vmem:[%s14833_s11 + $0x20] ss:$12 sps:$4 sm:$0xff]   ;;  %v11292_v48 = vld [vmem:[%s14833_s11 + $0x4] ss:$12 sps:$4 sm:$0xff]  }
 0x56c   :  { %v7664_v40 = vpop.f32.mrf.mxu1  ;;  %v7820_v22 = vpop.f32.mrf.mxu0  ;;  %v11290_v19 = vld [vmem:[%s14833_s11] ss:$12 sps:$4 sm:$0xff]  }
 0x56d   :  { %v7825_v25 = vpack.c.bf16 %v7824_v20, %v7824_v20  ;;  %v11293_v20 = vld [vmem:[%s14833_s11 + $0x8] ss:$12 sps:$4 sm:$0xff]   ;;  %v9700_v40 = vld [vmem:[%s14835_s10] ss:$0 sm:$0xff] }
 0x56e   :  { %v7821_v45 = vpop.f32.mrf.mxu0 }
 0x56f   :  { %9789 = vmatmul.mubr.bf16.vlgmr.msra.gmra.mxu1 %v7825_v25 }
 0x570   :  { %9793 = vmatpush3.bf16.msra.mxu1 %v11246_v56  ;;  %9808 = vmatprep.mubr.msk.bf16.mxu1 %vm11296_vm9, %v11295_v33 }
 0x571   :  { %9794 = vmatprep.subr.bf16.mxu1 %v11295_v33 }
 0x574   :  { %9795 = vmatpush3.bf16.msra.mxu1 %v11247_v29 }
 0x575   :  { %9796 = vmatprep.subr.bf16.mxu1 %v11295_v33 }
 0x578   :  { %9797 = vmatpush3.bf16.msra.mxu1 %v11248_v30 }
 0x579   :  { %9798 = vmatprep.subr.bf16.mxu1 %v11295_v33 }
 0x57c   :  { %9799 = vmatpush3.bf16.msra.mxu1 %v11249_v16  ;;  %v8209_v16 = vsub.s32 2, %v12181_v28 }
 0x57d   :  { %9800 = vmatprep.subr.bf16.mxu1 %v11295_v33 }
 0x580   :  { %9801 = vmatpush3.bf16.msra.mxu1 %v11250_v37  ;;  %v11297_v37 = vmov 1983009808  }
 0x581   :  { %9802 = vmatprep.subr.bf16.mxu1 %v11295_v33 }
 0x584   :  { %9803 = vmatpush3.bf16.msra.mxu1 %v11251_v26  ;;  %v8428_v26 = vunpack.c.l.s4 %v11297_v37 }
 0x585   :  { %9804 = vmatprep.subr.bf16.mxu1 %v11295_v33 }
 0x586   :  { %v8429_v34 = vunpack.c.0.s8 %v8428_v26 }
 0x588   :  { %9805 = vmatpush3.bf16.msra.mxu1 %v11252_v46  ;;  %v8197_v46 = vld [vmem:[%s14836_s12] sm:$0x7] }
 0x589   :  { %9806 = vmatprep.subr.bf16.mxu1 %v11295_v33  ;;  %v8210_v32 = vrot.slane %v8197_v46, %v8209_v16  ;;  %v8206_v51 = vrot.slane %v8197_v46, %v868_v39 }
 0x58c   :  { %9807 = vmatpush3.bf16.msra.mxu1 %v11253_v49  ;;  %v8202_v49 = vrot.slane %v8197_v46, %v864_v35 }
 0x62f   :  { %v7931_v42 = vpop.f32.mrf.mxu1 }
 0x630   :  { %v7932_v43 = vadd.f32 %v9682_v38, %v7931_v42 }
 0x631   :  { %v9790_v58 = vpop.f32.mrf.mxu1 }
 0x632   :  { %v7937_v62 = vmax.f32 %v7932_v43, 0.0  ;;  %v8432_v58 = vsub.s32 %v8429_v34, %v12181_v28 }
 0x633   :  { %v7934_v61 = vpop.f32.mrf.mxu1 }
 0x634   :  { %v7938_v57 = vpack.c.bf16 %v7937_v62, %v7937_v62 }
 0x635   :  { %v9791_v3 = vpop.f32.mrf.mxu1 }
 0x636   :  { %9809 = vmatmul.mubr.bf16.vlgmr.msra.gmra.mxu1 %v7938_v57 }
 0x637   :  { %8374 = vmatprep.mubr.bf16.mxu1 %v11294_v7  ;;  %v11264_v7 = vld [vmem:[%s14833_s11 + $0xac] ss:$12 sps:$4 sm:$0xff]  }
 0x638   :  { %8342 = vmatprep.subr.bf16.mxu1 %v11264_v7 }
 0x639   :  { %8343 = vmatpush1.bf16.msra.mxu1 %v11262_v1 }
 0x63a   :  { %8344 = vmatprep.subr.bf16.mxu1 %v11268_v0 }
 0x63d   :  { %8345 = vmatpush1.bf16.msra.mxu1 %v11266_v50 }
 0x63e   :  { %8346 = vmatprep.subr.bf16.mxu1 %v11272_v5 }
 0x641   :  { %8347 = vmatpush1.bf16.msra.mxu1 %v11270_v36 }
 0x642   :  { %8348 = vmatprep.subr.bf16.mxu1 %v11276_v54 }
 0x645   :  { %8349 = vmatpush1.bf16.msra.mxu1 %v11274_v10 }
 0x646   :  { %8350 = vmatprep.subr.bf16.mxu1 %v11280_v8 }
 0x649   :  { %8351 = vmatpush1.bf16.msra.mxu1 %v11278_v59 }
 0x64a   :  { %8352 = vmatprep.subr.bf16.mxu1 %v11284_v60 }
 0x64d   :  { %8353 = vmatpush1.bf16.msra.mxu1 %v11282_v14 }
 0x64e   :  { %8354 = vmatprep.subr.bf16.mxu1 %v11288_v63 }
 0x651   :  { %8355 = vmatpush1.bf16.msra.mxu1 %v11286_v47 }
 0x652   :  { %8356 = vmatprep.subr.bf16.mxu1 %v11292_v48 }
 0x655   :  { %8357 = vmatpush1.bf16.msra.mxu1 %v11290_v19 }
 0x6f6   :  { %v8044_v31 = vpop.f32.mrf.mxu1 }
 0x6f7   :  { %v8045_v4 = vadd.f32 %v9691_v2, %v8044_v31 }
 0x6f8   :  { %v9810_v12 = vpop.f32.mrf.mxu1 }
 0x6f9   :  { %v8050_v6 = vmax.f32 %v8045_v4, 0.0 }
 0x6fa   :  { %v8047_v21 = vpop.f32.mrf.mxu1 }
 0x6fb   :  { %v8051_v23 = vpack.c.bf16 %v8050_v6, %v8050_v6 }
 0x6fc   :  { %v9811_v11 = vpop.f32.mrf.mxu1 }
 0x6fd   :  { %9829 = vmatmul.mubr.bf16.vlgmr.msra.gmra.mxu0 %v8051_v23 }
 0x6fe   :  { %9833 = vmatpush3.bf16.msra.mxu0 %v11265_v9  ;;  %9848 = vmatprep.mubr.msk.bf16.mxu0 %vm11296_vm9, %v11295_v33 }
 0x6ff   :  { %9834 = vmatprep.subr.bf16.mxu0 %v11295_v33 }
 0x702   :  { %9835 = vmatpush3.bf16.msra.mxu0 %v11269_v41 }
 0x703   :  { %9836 = vmatprep.subr.bf16.mxu0 %v11295_v33 }
 0x706   :  { %9837 = vmatpush3.bf16.msra.mxu0 %v11273_v13 }
 0x707   :  { %9838 = vmatprep.subr.bf16.mxu0 %v11295_v33 }
 0x70a   :  { %9839 = vmatpush3.bf16.msra.mxu0 %v11277_v27 }
 0x70b   :  { %9840 = vmatprep.subr.bf16.mxu0 %v11295_v33 }
 0x70e   :  { %9841 = vmatpush3.bf16.msra.mxu0 %v11281_v15 }
 0x70f   :  { %9842 = vmatprep.subr.bf16.mxu0 %v11295_v33 }
 0x712   :  { %9843 = vmatpush3.bf16.msra.mxu0 %v11285_v44 }
 0x713   :  { %9844 = vmatprep.subr.bf16.mxu0 %v11295_v33 }
 0x716   :  { %9845 = vmatpush3.bf16.msra.mxu0 %v11289_v53 }
 0x717   :  { %9846 = vmatprep.subr.bf16.mxu0 %v11295_v33 }
 0x71a   :  { %9847 = vmatpush3.bf16.msra.mxu0 %v11293_v20 }
 0x7bd   :  { %v8157_v22 = vpop.f32.mrf.mxu0 }
 0x7be   :  { %v8158_v56 = vadd.f32 %v9700_v40, %v8157_v22 }
 0x7bf   :  { %v9830_v25 = vpop.f32.mrf.mxu0 }
 0x7c0   :  { %v8163_v45 = vmax.f32 %v8158_v56, 0.0 }
 0x7c1   :  { %v8160_v33 = vpop.f32.mrf.mxu0 }
 0x7c2   :  { %v8164_v29 = vpack.c.bf16 %v8163_v45, %v8163_v45 }
 0x7c3   :  { %v9831_v30 = vpop.f32.mrf.mxu0 }
 0x7c4   :  { %8375 = vmatmul.mubr.bf16.vlgmr.msra.gmra.mxu1 %v8164_v29  ;;  %9849 = vmatmul.mubr.bf16.vlgmr.msra.gmra.mxu0 %v8164_v29 }
 0x884   :  { %v8376_v18 = vpop.f32.mrf.mxu1  ;;  %v8417_v52 = vpop.f32.mrf.mxu0 }
 0x885   :  { %v8377_v42 = vadd.f32 %v8376_v18, %v8202_v49  ;;  %v8418_v43 = vadd.f32 %v8417_v52, %v8210_v32 }
 0x886   :  { %v8378_v24 = vpop.f32.mrf.mxu1  ;;  %v9850_v38 = vpop.f32.mrf.mxu0 }
 0x887   :  { %v8379_v62 = vadd.f32 %v8378_v24, %v8206_v51  ;;  %v8440_v17 = vrot.slane %v8418_v43, %v8432_v58 }
 0x888   :  { %v8380_v61 = vpop.f32.mrf.mxu1  ;;  %v8420_v57 = vpop.f32.mrf.mxu0 }
 0x889   :  { %v8426_v35 = vcombine.low %v8377_v42, %v8379_v62 }
 0x88a   :  { %v8381_v3 = vpop.f32.mrf.mxu1  ;;  %v9851_v55 = vpop.f32.mrf.mxu0 }
 0x88b   :  { %v8433_v39 = vrot.slane %v8426_v35, %v8432_v58 }
 0x88d   :  { %v8441_v1 = vcombine.low %v8433_v39, %v8440_v17 }
 0x88f   :  { %8447 = vst.msk [vmem:[%s14837_s13] sm:$0x3f] %vm8446_vm13, %v8441_v1 }

</bundles_post_ra>
